<compile_context>
chip_gen: v7x
topology: tpu7x:2x2x1
jax: 0.10.0
libtpu: 0.0.40
codegen_flags: <defaults>
</compile_context>

<pallas_src>
import functools
import math

import jax
import jax.numpy as jnp
from jax.experimental import pallas as pl
from jax.experimental.pallas import tpu as pltpu

# Matmul inputs/activations live in this dtype; accumulation + statistics are f32.
MATMUL_DTYPE = jnp.bfloat16

# Explicit scoped-VMEM budget: above v5e's 16 MiB default, below v7x's 64 MiB
# physical capacity (leaves headroom for compiler-internal scratch).
VMEM_LIMIT_BYTES = 48 * 1024 * 1024


# ----------------------------- tiling helper -----------------------------

def _pick_tile(dim, target, multiple):
    """Largest t <= target that divides dim and (t == dim or t % multiple == 0).

    Falls back to the full dim (always legal: block == full array dim satisfies
    the (8,128) rule).  NOTE: for large awkward (prime) dims this fallback can
    blow the VMEM budget; acceptable at these validation shapes."""
    if dim <= target:
        return dim
    for t in range(target, 0, -1):
        if dim % t == 0 and t % multiple == 0:
            return t
    return dim


# ----------------------------- matmul (+bias, +act) -----------------------------

def _matmul_bias_kernel(x_ref, w_ref, b_ref, o_ref, acc_ref, *, activation):
    # o = act(x @ w + b), tiled over (M, N, K); K is the reduction axis.
    @pl.when(pl.program_id(2) == 0)
    def _():
        acc_ref[...] = jnp.zeros_like(acc_ref)

    acc_ref[...] += jnp.dot(x_ref[...], w_ref[...],
                            preferred_element_type=jnp.float32)

    @pl.when(pl.program_id(2) == pl.num_programs(2) - 1)
    def _():
        y = acc_ref[...] + b_ref[...].astype(jnp.float32)
        if activation == "relu":
            y = jnp.maximum(y, 0.0)
        o_ref[...] = y.astype(o_ref.dtype)


def matmul_bias(x2d, w, b, activation=None, out_dtype=MATMUL_DTYPE,
                tm=256, tn=256, tk=512):
    M, K = x2d.shape
    N = w.shape[1]
    tm = _pick_tile(M, tm, 8)
    tn = _pick_tile(N, tn, 128)
    tk = _pick_tile(K, tk, 128)
    kernel = functools.partial(_matmul_bias_kernel, activation=activation)
    return pl.pallas_call(
        kernel,
        out_shape=jax.ShapeDtypeStruct((M, N), out_dtype),
        grid=(M // tm, N // tn, K // tk),
        in_specs=[pl.BlockSpec((tm, tk), lambda i, j, k: (i, k)),
                  pl.BlockSpec((tk, tn), lambda i, j, k: (k, j)),
                  pl.BlockSpec((1, tn), lambda i, j, k: (0, j))],
        out_specs=pl.BlockSpec((tm, tn), lambda i, j, k: (i, j)),
        scratch_shapes=[pltpu.VMEM((tm, tn), jnp.float32)],
        compiler_params=pltpu.CompilerParams(
            dimension_semantics=("parallel", "parallel", "arbitrary"),
            vmem_limit_bytes=VMEM_LIMIT_BYTES),
    )(x2d, w, b.reshape(1, N))


# ----------------------------- matmul + residual + LayerNorm -----------------------------

def _matmul_add_ln_kernel(x_ref, w_ref, b_ref, r_ref, g_ref, beta_ref,
                          o_ref, acc_ref):
    # o = LayerNorm((x @ w + b) + residual) * gamma + beta   (eps = 1e-5)
    # Grid is (M tiles, K tiles); N (= d_model) is kept whole for row stats.
    @pl.when(pl.program_id(1) == 0)
    def _():
        acc_ref[...] = jnp.zeros_like(acc_ref)

    acc_ref[...] += jnp.dot(x_ref[...], w_ref[...],
                            preferred_element_type=jnp.float32)

    @pl.when(pl.program_id(1) == pl.num_programs(1) - 1)
    def _():
        y = acc_ref[...] + b_ref[...].astype(jnp.float32) \
            + r_ref[...].astype(jnp.float32)
        mean = jnp.mean(y, axis=-1, keepdims=True)
        var = jnp.mean(jnp.square(y - mean), axis=-1, keepdims=True)
        yn = (y - mean) * jax.lax.rsqrt(var + 1e-5)
        o_ref[...] = (yn * g_ref[...] + beta_ref[...]).astype(o_ref.dtype)


def matmul_add_ln(x2d, w, b, res2d, gamma, beta, out_dtype=MATMUL_DTYPE,
                  tm=256, tk=256):
    M, K = x2d.shape
    N = w.shape[1]
    tm = _pick_tile(M, tm, 8)
    tk = _pick_tile(K, tk, 128)
    return pl.pallas_call(
        _matmul_add_ln_kernel,
        out_shape=jax.ShapeDtypeStruct((M, N), out_dtype),
        grid=(M // tm, K // tk),
        in_specs=[pl.BlockSpec((tm, tk), lambda i, k: (i, k)),
                  pl.BlockSpec((tk, N), lambda i, k: (k, 0)),
                  pl.BlockSpec((1, N), lambda i, k: (0, 0)),
                  pl.BlockSpec((tm, N), lambda i, k: (i, 0)),
                  pl.BlockSpec((1, N), lambda i, k: (0, 0)),
                  pl.BlockSpec((1, N), lambda i, k: (0, 0))],
        out_specs=pl.BlockSpec((tm, N), lambda i, k: (i, 0)),
        scratch_shapes=[pltpu.VMEM((tm, N), jnp.float32)],
        compiler_params=pltpu.CompilerParams(
            dimension_semantics=("parallel", "arbitrary"),
            vmem_limit_bytes=VMEM_LIMIT_BYTES),
    )(x2d, w, b.reshape(1, N), res2d, gamma.reshape(1, N), beta.reshape(1, N))


# ----------------------------- attention (head-batched, lane-dense) -----------------------------

def _attention_body(q_all, k_all, v_all, neg_bias, n_head, dk, scale):
    # q_all: (Sq, D) bf16; k_all/v_all: (Sk, D) bf16; neg_bias: (Sq, Sk) f32 or None.
    # Heads are a small static Python loop; the output is one dense (Sq, D) slab.
    outs = []
    for h in range(n_head):
        q = q_all[:, h * dk:(h + 1) * dk]
        k = k_all[:, h * dk:(h + 1) * dk]
        v = v_all[:, h * dk:(h + 1) * dk]
        s = jax.lax.dot_general(q, k, (((1,), (1,)), ((), ())),
                                preferred_element_type=jnp.float32) * scale
        if neg_bias is not None:
            s = s + neg_bias
        s = s - jnp.max(s, axis=-1, keepdims=True)
        p = jnp.exp(s)
        p = p * pl.reciprocal(jnp.sum(p, axis=-1, keepdims=True), approx=True)
        outs.append(jnp.dot(p.astype(v.dtype), v,
                            preferred_element_type=jnp.float32))
    return jnp.concatenate(outs, axis=-1)


def _self_attn_causal_kernel(qkv_ref, o_ref, *, n_head, dk, scale):
    # Causal mask generated in-kernel (no mask DMA).
    S = o_ref.shape[0]
    D = n_head * dk
    qkv = qkv_ref[...]
    row = jax.lax.broadcasted_iota(jnp.int32, (S, S), 0)
    col = jax.lax.broadcasted_iota(jnp.int32, (S, S), 1)
    neg = jnp.where(row >= col, 0.0, -1e9).astype(jnp.float32)
    ctx = _attention_body(qkv[:, :D], qkv[:, D:2 * D], qkv[:, 2 * D:],
                          neg, n_head, dk, scale)
    o_ref[...] = ctx.astype(o_ref.dtype)


def _self_attn_masked_kernel(qkv_ref, m_ref, o_ref, *, n_head, dk, scale):
    D = n_head * dk
    qkv = qkv_ref[...]
    neg = jnp.where(m_ref[...] == 0, jnp.float32(-1e9), jnp.float32(0.0))
    ctx = _attention_body(qkv[:, :D], qkv[:, D:2 * D], qkv[:, 2 * D:],
                          neg, n_head, dk, scale)
    o_ref[...] = ctx.astype(o_ref.dtype)


def _cross_attn_kernel(q_ref, kv_ref, o_ref, *, n_head, dk, scale):
    D = n_head * dk
    kv = kv_ref[...]
    ctx = _attention_body(q_ref[...], kv[:, :D], kv[:, D:],
                          None, n_head, dk, scale)
    o_ref[...] = ctx.astype(o_ref.dtype)


def mha_self_attention(qkv3d, mask_i8, n_head):
    # qkv3d: (B, S, 3*D) bf16; mask_i8: (B, 1, S, S) int8 or None (=> causal).
    B, S, threeD = qkv3d.shape
    D = threeD // 3
    dk = D // n_head
    scale = 1.0 / math.sqrt(dk)
    out_shape = jax.ShapeDtypeStruct((B, S, D), MATMUL_DTYPE)
    cp = pltpu.CompilerParams(dimension_semantics=("parallel",),
                              vmem_limit_bytes=VMEM_LIMIT_BYTES)
    qkv_spec = pl.BlockSpec((None, S, threeD), lambda b: (b, 0, 0))
    out_spec = pl.BlockSpec((None, S, D), lambda b: (b, 0, 0))

    if mask_i8 is None:
        kern = functools.partial(_self_attn_causal_kernel,
                                 n_head=n_head, dk=dk, scale=scale)
        return pl.pallas_call(kern, out_shape=out_shape, grid=(B,),
                              in_specs=[qkv_spec], out_specs=out_spec,
                              compiler_params=cp)(qkv3d)

    kern = functools.partial(_self_attn_masked_kernel,
                             n_head=n_head, dk=dk, scale=scale)
    m_spec = pl.BlockSpec((None, None, S, S), lambda b: (b, 0, 0, 0))
    return pl.pallas_call(kern, out_shape=out_shape, grid=(B,),
                          in_specs=[qkv_spec, m_spec], out_specs=out_spec,
                          compiler_params=cp)(qkv3d, mask_i8)


def mha_cross_attention(q3d, kv3d, n_head):
    # q3d: (B, Sq, D) bf16; kv3d: (B, Sk, 2*D) bf16; unmasked.
    B, Sq, D = q3d.shape
    Sk = kv3d.shape[1]
    dk = D // n_head
    scale = 1.0 / math.sqrt(dk)
    kern = functools.partial(_cross_attn_kernel, n_head=n_head, dk=dk, scale=scale)
    return pl.pallas_call(
        kern,
        out_shape=jax.ShapeDtypeStruct((B, Sq, D), MATMUL_DTYPE),
        grid=(B,),
        in_specs=[pl.BlockSpec((None, Sq, D), lambda b: (b, 0, 0)),
                  pl.BlockSpec((None, Sk, 2 * D), lambda b: (b, 0, 0))],
        out_specs=pl.BlockSpec((None, Sq, D), lambda b: (b, 0, 0)),
        compiler_params=pltpu.CompilerParams(
            dimension_semantics=("parallel",),
            vmem_limit_bytes=VMEM_LIMIT_BYTES),
    )(q3d, kv3d)


# ----------------------------- fused fc_out + softmax -----------------------------

def _matmul_bias_softmax_kernel(x_ref, w_ref, b_ref, o_ref, acc_ref):
    # o = softmax(x @ w + b, axis=-1); grid = (M tiles, K tiles); V kept whole.
    @pl.when(pl.program_id(1) == 0)
    def _():
        acc_ref[...] = jnp.zeros_like(acc_ref)

    acc_ref[...] += jnp.dot(x_ref[...], w_ref[...],
                            preferred_element_type=jnp.float32)

    @pl.when(pl.program_id(1) == pl.num_programs(1) - 1)
    def _():
        y = acc_ref[...] + b_ref[...].astype(jnp.float32)
        y = y - jnp.max(y, axis=-1, keepdims=True)
        e = jnp.exp(y)
        inv = pl.reciprocal(jnp.sum(e, axis=-1, keepdims=True), approx=False)
        o_ref[...] = (e * inv).astype(o_ref.dtype)


def matmul_bias_softmax(x2d, w, b, tm=256, tk=256):
    M, K = x2d.shape
    V = w.shape[1]
    tm = _pick_tile(M, tm, 8)
    tk = _pick_tile(K, tk, 128)
    return pl.pallas_call(
        _matmul_bias_softmax_kernel,
        out_shape=jax.ShapeDtypeStruct((M, V), jnp.float32),
        grid=(M // tm, K // tk),
        in_specs=[pl.BlockSpec((tm, tk), lambda i, k: (i, k)),
                  pl.BlockSpec((tk, V), lambda i, k: (k, 0)),
                  pl.BlockSpec((1, V), lambda i, k: (0, 0))],
        out_specs=pl.BlockSpec((tm, V), lambda i, k: (i, 0)),
        scratch_shapes=[pltpu.VMEM((tm, V), jnp.float32)],
        compiler_params=pltpu.CompilerParams(
            dimension_semantics=("parallel", "arbitrary"),
            vmem_limit_bytes=VMEM_LIMIT_BYTES),
    )(x2d, w, b.reshape(1, V))


# ----------------------------- Model glue (plain JAX, reshapes only) -----------------------------

def self_attention_ctx(x2d, mask_i8, p, n_head, B, S):
    D = x2d.shape[1]
    qkv = matmul_bias(x2d, p["wqkv"], p["bqkv"])                  # (B*S, 3D) bf16
    ctx = mha_self_attention(qkv.reshape(B, S, 3 * D), mask_i8, n_head)
    return ctx.reshape(B * S, D)                                  # free reshape


def cross_attention_ctx(x2d, enc_bf16, p, n_head, B, S):
    D = x2d.shape[1]
    Sk = enc_bf16.shape[1]
    q = matmul_bias(x2d, p["wq"], p["bq"])                        # (B*S, D) bf16
    kv = matmul_bias(enc_bf16.reshape(B * Sk, D), p["wkv"], p["bkv"])  # (B*Sk, 2D)
    ctx = mha_cross_attention(q.reshape(B, S, D), kv.reshape(B, Sk, 2 * D), n_head)
    return ctx.reshape(B * S, D)


def decoder_block(x2d, enc_bf16, mask_i8, p, n_head, B, S):
    # masked self-attention; out-proj + residual + LayerNorm fused (dropout = id)
    ctx = self_attention_ctx(x2d, mask_i8, p["self_attn"], n_head, B, S)
    x1 = matmul_add_ln(ctx, p["self_attn"]["wo"], p["self_attn"]["bo"],
                       x2d, p["norm_g"], p["norm_b"])

    # cross-attention (K/V = encoder_out, no mask); fused out-proj + Add & LN
    ctx2 = cross_attention_ctx(x1, enc_bf16, p["cross_attn"], n_head, B, S)
    x2 = matmul_add_ln(ctx2, p["cross_attn"]["wo"], p["cross_attn"]["bo"],
                       x1, p["norm1_g"], p["norm1_b"])

    # FFN: relu(x @ w1 + b1), then (@ w2 + b2) fused with residual + LayerNorm
    h = matmul_bias(x2, p["w1"], p["b1"], activation="relu")
    return matmul_add_ln(h, p["w2"], p["b2"], x2, p["norm2_g"], p["norm2_b"])


def positional_encoding(seq_len, d_model):
    pos = jnp.arange(seq_len, dtype=jnp.float32)[:, None]
    i = jnp.arange(0, d_model, 2, dtype=jnp.float32)
    div = jnp.exp(-jnp.log(10000.0) * i / d_model)
    pe = jnp.zeros((seq_len, d_model), jnp.float32)
    pe = pe.at[:, 0::2].set(jnp.sin(pos * div))
    pe = pe.at[:, 1::2].set(jnp.cos(pos * div))
    return pe


def transformer_decoder(params, x_ids, encoder_out, mask, n_head, d_model,
                        mask_is_causal=True):
    """mask_is_causal=True regenerates the (identical) causal mask in-kernel and
    skips the O(B*S*S) mask DMA; pass False to apply an arbitrary `mask`."""
    B, S = x_ids.shape
    # Embedder (gather) + PositionalEncoder kept as XLA glue; Dropout = identity.
    x = jnp.take(params["embedding"], x_ids, axis=0)              # (B, S, D) f32
    x = x * math.sqrt(d_model) + params["pe"][None, :S, :]
    x2d = x.reshape(B * S, d_model).astype(MATMUL_DTYPE)          # bf16 activations
    enc_bf16 = encoder_out.astype(MATMUL_DTYPE)
    mask_i8 = None if mask_is_causal else (mask != 0).astype(jnp.int8)
    for lp in params["layers"]:
        x2d = decoder_block(x2d, enc_bf16, mask_i8, lp, n_head, B, S)
    probs = matmul_bias_softmax(x2d, params["w_out"], params["b_out"])
    return probs.reshape(B, S, -1)


# ----------------------------- Deterministic parameter init -----------------------------

def init_params(key, vocab_size, seq_len, d_model, num_layer, factor):
    keys = jax.random.split(key, 8 * num_layer + 8)
    it = iter(keys)

    def w(shape):
        # Matmul weights are pre-cast to bf16 ONCE here (halves weight DMA).
        return (0.02 * jax.random.normal(next(it), shape, jnp.float32)
                ).astype(MATMUL_DTYPE)

    def zeros(shape):
        return jnp.zeros(shape, jnp.float32)

    def ones(shape):
        return jnp.ones(shape, jnp.float32)

    layers = []
    for _ in range(num_layer):
        layers.append(dict(
            self_attn=dict(wqkv=w((d_model, 3 * d_model)), bqkv=zeros((3 * d_model,)),
                           wo=w((d_model, d_model)), bo=zeros((d_model,))),
            norm_g=ones((d_model,)), norm_b=zeros((d_model,)),
            cross_attn=dict(wq=w((d_model, d_model)), bq=zeros((d_model,)),
                            wkv=w((d_model, 2 * d_model)), bkv=zeros((2 * d_model,)),
                            wo=w((d_model, d_model)), bo=zeros((d_model,))),
            norm1_g=ones((d_model,)), norm1_b=zeros((d_model,)),
            w1=w((d_model, factor * d_model)), b1=zeros((factor * d_model,)),
            w2=w((factor * d_model, d_model)), b2=zeros((d_model,)),
            norm2_g=ones((d_model,)), norm2_b=zeros((d_model,)),
        ))

    return dict(
        embedding=0.02 * jax.random.normal(next(it), (vocab_size, d_model), jnp.float32),
        pe=positional_encoding(seq_len, d_model),
        layers=layers,
        w_out=w((d_model, vocab_size)),   # fc_out stored as (d_model, vocab)
        b_out=zeros((vocab_size,)),
    )


# ----------------------------- Main -----------------------------

if __name__ == "__main__":
    B, S, D, H, V, F, L = 2, 8, 32, 8, 16, 4, 2   # batch, seq, d_model, heads, vocab, factor, layers
    key = jax.random.PRNGKey(0)
    k_p, k_x, k_enc = jax.random.split(key, 3)

    params = init_params(k_p, V, S, D, L, F)
    x_ids = jax.random.randint(k_x, (B, S), 0, V, dtype=jnp.int32)
    encoder_out = jax.random.normal(k_enc, (B, S, D), jnp.float32)
    causal = jnp.tril(jnp.ones((S, S), jnp.float32))
    mask = jnp.broadcast_to(causal[None, None], (B, 1, S, S))

    # Fast path: causal mask generated in-kernel (no mask DMA).
    fwd = jax.jit(functools.partial(transformer_decoder, n_head=H, d_model=D,
                                    mask_is_causal=True))
    out = jax.block_until_ready(fwd(params, x_ids, encoder_out, mask))
    assert out.shape == (B, S, V), out.shape

    # softmax rows must sum to 1
    row_sums = jnp.sum(out, axis=-1)
    assert jnp.allclose(row_sums, 1.0, atol=1e-4), row_sums

    # Cross-check: explicit-mask path (DMAs the tril mask as int8) must agree.
    fwd_mask = jax.jit(functools.partial(transformer_decoder, n_head=H, d_model=D,
                                         mask_is_causal=False))
    out_mask = jax.block_until_ready(fwd_mask(params, x_ids, encoder_out, mask))
    assert jnp.allclose(out, out_mask, atol=1e-5), "causal vs explicit-mask mismatch"

    print("KERNEL_OK")
</pallas_src>

<mosaic_0001>
module attributes {stable_mosaic.version = 11 : i64} {
  func.func @_matmul_bias_kernel(%arg0: i32, %arg1: i32, %arg2: i32, %arg3: memref<16x32xbf16, #tpu.memory_space<vmem>>, %arg4: memref<32x96xbf16, #tpu.memory_space<vmem>>, %arg5: memref<1x96xf32, #tpu.memory_space<vmem>>, %arg6: memref<16x96xbf16, #tpu.memory_space<vmem>>, %arg7: memref<16x96xf32, #tpu.memory_space<vmem>>) attributes {dimension_semantics = [#tpu.dimension_semantics<parallel>, #tpu.dimension_semantics<parallel>, #tpu.dimension_semantics<arbitrary>], iteration_bounds = array<i64: 1, 1, 1>, scalar_prefetch = 0 : i64, scratch_operands = 1 : i64, tpu.core_type = #tpu.core_type<tc>, window_params = [{transform_indices = @transform_0, window_bounds = array<i64: 16, 32>}, {transform_indices = @transform_1, window_bounds = array<i64: 32, 96>}, {transform_indices = @transform_2, window_bounds = array<i64: 1, 96>}, {transform_indices = @transform_3, window_bounds = array<i64: 16, 96>}]} {
    %c0_i32 = arith.constant 0 : i32
    %0 = arith.cmpi eq, %arg2, %c0_i32 : i32
    %1 = arith.extui %0 : i1 to i32
    %c0_i32_0 = arith.constant 0 : i32
    %2 = arith.cmpi ne, %1, %c0_i32_0 : i32
    scf.if %2 {
      %cst_10 = arith.constant 0.000000e+00 : f32
      %12 = vector.broadcast %cst_10 : f32 to vector<16x96xf32>
      %c0_11 = arith.constant 0 : index
      %c0_12 = arith.constant 0 : index
      %13 = vector.load %arg7[%c0_11, %c0_12] : memref<16x96xf32, #tpu.memory_space<vmem>>, vector<16x96xf32>
      tpu.vector_store %arg7[%c0_11, %c0_12], %12 {strides = array<i32>} : memref<16x96xf32, #tpu.memory_space<vmem>>, vector<16x96xf32>,
    } else {
    }
    %c0 = arith.constant 0 : index
    %c0_1 = arith.constant 0 : index
    %3 = vector.load %arg7[%c0, %c0_1] : memref<16x96xf32, #tpu.memory_space<vmem>>, vector<16x96xf32>
    %c0_2 = arith.constant 0 : index
    %c0_3 = arith.constant 0 : index
    %4 = vector.load %arg3[%c0_2, %c0_3] : memref<16x32xbf16, #tpu.memory_space<vmem>>, vector<16x32xbf16>
    %c0_4 = arith.constant 0 : index
    %c0_5 = arith.constant 0 : index
    %5 = vector.load %arg4[%c0_4, %c0_5] : memref<32x96xbf16, #tpu.memory_space<vmem>>, vector<32x96xbf16>
    %cst = arith.constant dense<0.000000e+00> : vector<16x96xf32>
    %6 = tpu.matmul %4, %5, %cst {dimension_numbers = #tpu.dot_dimension_numbers<[1], [0], [0], [1], [0, 0, 1, 1], [], []>} : vector<16x32xbf16>, vector<32x96xbf16>, vector<16x96xf32> -> vector<16x96xf32>
    %7 = arith.addf %3, %6 : vector<16x96xf32>
    %c0_6 = arith.constant 0 : index
    %c0_7 = arith.constant 0 : index
    %8 = vector.load %arg7[%c0_6, %c0_7] : memref<16x96xf32, #tpu.memory_space<vmem>>, vector<16x96xf32>
    tpu.vector_store %arg7[%c0_6, %c0_7], %7 {strides = array<i32>} : memref<16x96xf32, #tpu.memory_space<vmem>>, vector<16x96xf32>,
    %c0_i32_8 = arith.constant 0 : i32
    %9 = arith.cmpi eq, %arg2, %c0_i32_8 : i32
    %10 = arith.extui %9 : i1 to i32
    %c0_i32_9 = arith.constant 0 : i32
    %11 = arith.cmpi ne, %10, %c0_i32_9 : i32
    scf.if %11 {
      %c0_10 = arith.constant 0 : index
      %c0_11 = arith.constant 0 : index
      %12 = vector.load %arg7[%c0_10, %c0_11] : memref<16x96xf32, #tpu.memory_space<vmem>>, vector<16x96xf32>
      %c0_12 = arith.constant 0 : index
      %c0_13 = arith.constant 0 : index
      %13 = vector.load %arg5[%c0_12, %c0_13] : memref<1x96xf32, #tpu.memory_space<vmem>>, vector<1x96xf32>
      %14 = vector.broadcast %13 : vector<1x96xf32> to vector<16x96xf32>
      %15 = arith.addf %12, %14 : vector<16x96xf32>
      %16 = arith.truncf %15 : vector<16x96xf32> to vector<16x96xbf16>
      %c0_14 = arith.constant 0 : index
      %c0_15 = arith.constant 0 : index
      %17 = vector.load %arg6[%c0_14, %c0_15] : memref<16x96xbf16, #tpu.memory_space<vmem>>, vector<16x96xbf16>
      tpu.vector_store %arg6[%c0_14, %c0_15], %16 {strides = array<i32>} : memref<16x96xbf16, #tpu.memory_space<vmem>>, vector<16x96xbf16>,
    } else {
    }
    return
  }
  func.func @transform_0(%arg0: i32, %arg1: i32, %arg2: i32) -> (i32, i32) {
    %c0_i32 = arith.constant 0 : i32
    return %arg0, %arg2 : i32, i32
  }
  func.func @transform_1(%arg0: i32, %arg1: i32, %arg2: i32) -> (i32, i32) {
    %c0_i32 = arith.constant 0 : i32
    return %arg2, %arg1 : i32, i32
  }
  func.func @transform_2(%arg0: i32, %arg1: i32, %arg2: i32) -> (i32, i32) {
    %c0_i32 = arith.constant 0 : i32
    %c0_i32_0 = arith.constant 0 : i32
    return %c0_i32, %arg1 : i32, i32
  }
  func.func @transform_3(%arg0: i32, %arg1: i32, %arg2: i32) -> (i32, i32) {
    %c0_i32 = arith.constant 0 : i32
    return %arg0, %arg1 : i32, i32
  }
}

module attributes {stable_mosaic.version = 11 : i64} {
  func.func @_matmul_add_ln_kernel(%arg0: i32, %arg1: i32, %arg2: memref<16x32xbf16, #tpu.memory_space<vmem>>, %arg3: memref<32x32xbf16, #tpu.memory_space<vmem>>, %arg4: memref<1x32xf32, #tpu.memory_space<vmem>>, %arg5: memref<16x32xbf16, #tpu.memory_space<vmem>>, %arg6: memref<1x32xf32, #tpu.memory_space<vmem>>, %arg7: memref<1x32xf32, #tpu.memory_space<vmem>>, %arg8: memref<16x32xbf16, #tpu.memory_space<vmem>>, %arg9: memref<16x32xf32, #tpu.memory_space<vmem>>) attributes {dimension_semantics = [#tpu.dimension_semantics<parallel>, #tpu.dimension_semantics<arbitrary>], iteration_bounds = array<i64: 1, 1>, scalar_prefetch = 0 : i64, scratch_operands = 1 : i64, tpu.core_type = #tpu.core_type<tc>, window_params = [{transform_indices = @transform_0, window_bounds = array<i64: 16, 32>}, {transform_indices = @transform_1, window_bounds = array<i64: 32, 32>}, {pipeline_mode = #tpu.pipeline_mode<synchronous>, transform_indices = @transform_2, window_bounds = array<i64: 1, 32>}, {transform_indices = @transform_3, window_bounds = array<i64: 16, 32>}, {pipeline_mode = #tpu.pipeline_mode<synchronous>, transform_indices = @transform_4, window_bounds = array<i64: 1, 32>}, {pipeline_mode = #tpu.pipeline_mode<synchronous>, transform_indices = @transform_5, window_bounds = array<i64: 1, 32>}, {transform_indices = @transform_6, window_bounds = array<i64: 16, 32>}]} {
    %c0_i32 = arith.constant 0 : i32
    %0 = arith.cmpi eq, %arg1, %c0_i32 : i32
    %1 = arith.extui %0 : i1 to i32
    %c0_i32_0 = arith.constant 0 : i32
    %2 = arith.cmpi ne, %1, %c0_i32_0 : i32
    scf.if %2 {
      %cst_10 = arith.constant 0.000000e+00 : f32
      %12 = vector.broadcast %cst_10 : f32 to vector<16x32xf32>
      %c0_11 = arith.constant 0 : index
      %c0_12 = arith.constant 0 : index
      %13 = vector.load %arg9[%c0_11, %c0_12] : memref<16x32xf32, #tpu.memory_space<vmem>>, vector<16x32xf32>
      tpu.vector_store %arg9[%c0_11, %c0_12], %12 {strides = array<i32>} : memref<16x32xf32, #tpu.memory_space<vmem>>, vector<16x32xf32>,
    } else {
    }
    %c0 = arith.constant 0 : index
    %c0_1 = arith.constant 0 : index
    %3 = vector.load %arg9[%c0, %c0_1] : memref<16x32xf32, #tpu.memory_space<vmem>>, vector<16x32xf32>
    %c0_2 = arith.constant 0 : index
    %c0_3 = arith.constant 0 : index
    %4 = vector.load %arg2[%c0_2, %c0_3] : memref<16x32xbf16, #tpu.memory_space<vmem>>, vector<16x32xbf16>
    %c0_4 = arith.constant 0 : index
    %c0_5 = arith.constant 0 : index
    %5 = vector.load %arg3[%c0_4, %c0_5] : memref<32x32xbf16, #tpu.memory_space<vmem>>, vector<32x32xbf16>
    %cst = arith.constant dense<0.000000e+00> : vector<16x32xf32>
    %6 = tpu.matmul %4, %5, %cst {dimension_numbers = #tpu.dot_dimension_numbers<[1], [0], [0], [1], [0, 0, 1, 1], [], []>} : vector<16x32xbf16>, vector<32x32xbf16>, vector<16x32xf32> -> vector<16x32xf32>
    %7 = arith.addf %3, %6 : vector<16x32xf32>
    %c0_6 = arith.constant 0 : index
    %c0_7 = arith.constant 0 : index
    %8 = vector.load %arg9[%c0_6, %c0_7] : memref<16x32xf32, #tpu.memory_space<vmem>>, vector<16x32xf32>
    tpu.vector_store %arg9[%c0_6, %c0_7], %7 {strides = array<i32>} : memref<16x32xf32, #tpu.memory_space<vmem>>, vector<16x32xf32>,
    %c0_i32_8 = arith.constant 0 : i32
    %9 = arith.cmpi eq, %arg1, %c0_i32_8 : i32
    %10 = arith.extui %9 : i1 to i32
    %c0_i32_9 = arith.constant 0 : i32
    %11 = arith.cmpi ne, %10, %c0_i32_9 : i32
    scf.if %11 {
      %c0_10 = arith.constant 0 : index
      %c0_11 = arith.constant 0 : index
      %12 = vector.load %arg9[%c0_10, %c0_11] : memref<16x32xf32, #tpu.memory_space<vmem>>, vector<16x32xf32>
      %c0_12 = arith.constant 0 : index
      %c0_13 = arith.constant 0 : index
      %13 = vector.load %arg4[%c0_12, %c0_13] : memref<1x32xf32, #tpu.memory_space<vmem>>, vector<1x32xf32>
      %14 = vector.broadcast %13 : vector<1x32xf32> to vector<16x32xf32>
      %15 = arith.addf %12, %14 : vector<16x32xf32>
      %c0_14 = arith.constant 0 : index
      %c0_15 = arith.constant 0 : index
      %16 = vector.load %arg5[%c0_14, %c0_15] : memref<16x32xbf16, #tpu.memory_space<vmem>>, vector<16x32xbf16>
      %17 = arith.extf %16 : vector<16x32xbf16> to vector<16x32xf32>
      %18 = arith.addf %15, %17 : vector<16x32xf32>
      %cst_16 = arith.constant dense<0.000000e+00> : vector<16xf32>
      %19 = vector.multi_reduction <add>, %18, %cst_16 [1] : vector<16x32xf32> to vector<16xf32>
      %20 = vector.shape_cast %19 : vector<16xf32> to vector<16x1xf32>
      %cst_17 = arith.constant 3.200000e+01 : f32
      %21 = vector.broadcast %cst_17 : f32 to vector<16x1xf32>
      %22 = arith.divf %20, %21 : vector<16x1xf32>
      %23 = vector.broadcast %22 : vector<16x1xf32> to vector<16x32xf32>
      %24 = arith.subf %18, %23 : vector<16x32xf32>
      %25 = arith.mulf %24, %24 : vector<16x32xf32>
      %cst_18 = arith.constant dense<0.000000e+00> : vector<16xf32>
      %26 = vector.multi_reduction <add>, %25, %cst_18 [1] : vector<16x32xf32> to vector<16xf32>
      %27 = vector.shape_cast %26 : vector<16xf32> to vector<16x1xf32>
      %cst_19 = arith.constant 3.200000e+01 : f32
      %28 = vector.broadcast %cst_19 : f32 to vector<16x1xf32>
      %29 = arith.divf %27, %28 : vector<16x1xf32>
      %30 = vector.broadcast %22 : vector<16x1xf32> to vector<16x32xf32>
      %31 = arith.subf %18, %30 : vector<16x32xf32>
      %cst_20 = arith.constant 9.99999974E-6 : f32
      %32 = vector.broadcast %cst_20 : f32 to vector<16x1xf32>
      %33 = arith.addf %29, %32 : vector<16x1xf32>
      %34 = math.rsqrt %33 : vector<16x1xf32>
      %35 = vector.broadcast %34 : vector<16x1xf32> to vector<16x32xf32>
      %36 = arith.mulf %31, %35 : vector<16x32xf32>
      %c0_21 = arith.constant 0 : index
      %c0_22 = arith.constant 0 : index
      %37 = vector.load %arg6[%c0_21, %c0_22] : memref<1x32xf32, #tpu.memory_space<vmem>>, vector<1x32xf32>
      %38 = vector.broadcast %37 : vector<1x32xf32> to vector<16x32xf32>
      %39 = arith.mulf %36, %38 : vector<16x32xf32>
      %c0_23 = arith.constant 0 : index
      %c0_24 = arith.constant 0 : index
      %40 = vector.load %arg7[%c0_23, %c0_24] : memref<1x32xf32, #tpu.memory_space<vmem>>, vector<1x32xf32>
      %41 = vector.broadcast %40 : vector<1x32xf32> to vector<16x32xf32>
      %42 = arith.addf %39, %41 : vector<16x32xf32>
      %43 = arith.truncf %42 : vector<16x32xf32> to vector<16x32xbf16>
      %c0_25 = arith.constant 0 : index
      %c0_26 = arith.constant 0 : index
      %44 = vector.load %arg8[%c0_25, %c0_26] : memref<16x32xbf16, #tpu.memory_space<vmem>>, vector<16x32xbf16>
      tpu.vector_store %arg8[%c0_25, %c0_26], %43 {strides = array<i32>} : memref<16x32xbf16, #tpu.memory_space<vmem>>, vector<16x32xbf16>,
    } else {
    }
    return
  }
  func.func @transform_0(%arg0: i32, %arg1: i32) -> (i32, i32) {
    %c0_i32 = arith.constant 0 : i32
    return %arg0, %arg1 : i32, i32
  }
  func.func @transform_1(%arg0: i32, %arg1: i32) -> (i32, i32) {
    %c0_i32 = arith.constant 0 : i32
    %c0_i32_0 = arith.constant 0 : i32
    return %arg1, %c0_i32 : i32, i32
  }
  func.func @transform_2(%arg0: i32, %arg1: i32) -> (i32, i32) {
    %c0_i32 = arith.constant 0 : i32
    %c0_i32_0 = arith.constant 0 : i32
    %c0_i32_1 = arith.constant 0 : i32
    return %c0_i32, %c0_i32_0 : i32, i32
  }
  func.func @transform_3(%arg0: i32, %arg1: i32) -> (i32, i32) {
    %c0_i32 = arith.constant 0 : i32
    %c0_i32_0 = arith.constant 0 : i32
    return %arg0, %c0_i32 : i32, i32
  }
  func.func @transform_4(%arg0: i32, %arg1: i32) -> (i32, i32) {
    %c0_i32 = arith.constant 0 : i32
    %c0_i32_0 = arith.constant 0 : i32
    %c0_i32_1 = arith.constant 0 : i32
    return %c0_i32, %c0_i32_0 : i32, i32
  }
  func.func @transform_5(%arg0: i32, %arg1: i32) -> (i32, i32) {
    %c0_i32 = arith.constant 0 : i32
    %c0_i32_0 = arith.constant 0 : i32
    %c0_i32_1 = arith.constant 0 : i32
    return %c0_i32, %c0_i32_0 : i32, i32
  }
  func.func @transform_6(%arg0: i32, %arg1: i32) -> (i32, i32) {
    %c0_i32 = arith.constant 0 : i32
    %c0_i32_0 = arith.constant 0 : i32
    return %arg0, %c0_i32 : i32, i32
  }
}

module attributes {stable_mosaic.version = 11 : i64} {
  func.func @_matmul_bias_kernel(%arg0: i32, %arg1: i32, %arg2: i32, %arg3: memref<16x32xbf16, #tpu.memory_space<vmem>>, %arg4: memref<32x32xbf16, #tpu.memory_space<vmem>>, %arg5: memref<1x32xf32, #tpu.memory_space<vmem>>, %arg6: memref<16x32xbf16, #tpu.memory_space<vmem>>, %arg7: memref<16x32xf32, #tpu.memory_space<vmem>>) attributes {dimension_semantics = [#tpu.dimension_semantics<parallel>, #tpu.dimension_semantics<parallel>, #tpu.dimension_semantics<arbitrary>], iteration_bounds = array<i64: 1, 1, 1>, scalar_prefetch = 0 : i64, scratch_operands = 1 : i64, tpu.core_type = #tpu.core_type<tc>, window_params = [{transform_indices = @transform_0, window_bounds = array<i64: 16, 32>}, {transform_indices = @transform_1, window_bounds = array<i64: 32, 32>}, {transform_indices = @transform_2, window_bounds = array<i64: 1, 32>}, {transform_indices = @transform_3, window_bounds = array<i64: 16, 32>}]} {
    %c0_i32 = arith.constant 0 : i32
    %0 = arith.cmpi eq, %arg2, %c0_i32 : i32
    %1 = arith.extui %0 : i1 to i32
    %c0_i32_0 = arith.constant 0 : i32
    %2 = arith.cmpi ne, %1, %c0_i32_0 : i32
    scf.if %2 {
      %cst_10 = arith.constant 0.000000e+00 : f32
      %12 = vector.broadcast %cst_10 : f32 to vector<16x32xf32>
      %c0_11 = arith.constant 0 : index
      %c0_12 = arith.constant 0 : index
      %13 = vector.load %arg7[%c0_11, %c0_12] : memref<16x32xf32, #tpu.memory_space<vmem>>, vector<16x32xf32>
      tpu.vector_store %arg7[%c0_11, %c0_12], %12 {strides = array<i32>} : memref<16x32xf32, #tpu.memory_space<vmem>>, vector<16x32xf32>,
    } else {
    }
    %c0 = arith.constant 0 : index
    %c0_1 = arith.constant 0 : index
    %3 = vector.load %arg7[%c0, %c0_1] : memref<16x32xf32, #tpu.memory_space<vmem>>, vector<16x32xf32>
    %c0_2 = arith.constant 0 : index
    %c0_3 = arith.constant 0 : index
    %4 = vector.load %arg3[%c0_2, %c0_3] : memref<16x32xbf16, #tpu.memory_space<vmem>>, vector<16x32xbf16>
    %c0_4 = arith.constant 0 : index
    %c0_5 = arith.constant 0 : index
    %5 = vector.load %arg4[%c0_4, %c0_5] : memref<32x32xbf16, #tpu.memory_space<vmem>>, vector<32x32xbf16>
    %cst = arith.constant dense<0.000000e+00> : vector<16x32xf32>
    %6 = tpu.matmul %4, %5, %cst {dimension_numbers = #tpu.dot_dimension_numbers<[1], [0], [0], [1], [0, 0, 1, 1], [], []>} : vector<16x32xbf16>, vector<32x32xbf16>, vector<16x32xf32> -> vector<16x32xf32>
    %7 = arith.addf %3, %6 : vector<16x32xf32>
    %c0_6 = arith.constant 0 : index
    %c0_7 = arith.constant 0 : index
    %8 = vector.load %arg7[%c0_6, %c0_7] : memref<16x32xf32, #tpu.memory_space<vmem>>, vector<16x32xf32>
    tpu.vector_store %arg7[%c0_6, %c0_7], %7 {strides = array<i32>} : memref<16x32xf32, #tpu.memory_space<vmem>>, vector<16x32xf32>,
    %c0_i32_8 = arith.constant 0 : i32
    %9 = arith.cmpi eq, %arg2, %c0_i32_8 : i32
    %10 = arith.extui %9 : i1 to i32
    %c0_i32_9 = arith.constant 0 : i32
    %11 = arith.cmpi ne, %10, %c0_i32_9 : i32
    scf.if %11 {
      %c0_10 = arith.constant 0 : index
      %c0_11 = arith.constant 0 : index
      %12 = vector.load %arg7[%c0_10, %c0_11] : memref<16x32xf32, #tpu.memory_space<vmem>>, vector<16x32xf32>
      %c0_12 = arith.constant 0 : index
      %c0_13 = arith.constant 0 : index
      %13 = vector.load %arg5[%c0_12, %c0_13] : memref<1x32xf32, #tpu.memory_space<vmem>>, vector<1x32xf32>
      %14 = vector.broadcast %13 : vector<1x32xf32> to vector<16x32xf32>
      %15 = arith.addf %12, %14 : vector<16x32xf32>
      %16 = arith.truncf %15 : vector<16x32xf32> to vector<16x32xbf16>
      %c0_14 = arith.constant 0 : index
      %c0_15 = arith.constant 0 : index
      %17 = vector.load %arg6[%c0_14, %c0_15] : memref<16x32xbf16, #tpu.memory_space<vmem>>, vector<16x32xbf16>
      tpu.vector_store %arg6[%c0_14, %c0_15], %16 {strides = array<i32>} : memref<16x32xbf16, #tpu.memory_space<vmem>>, vector<16x32xbf16>,
    } else {
    }
    return
  }
  func.func @transform_0(%arg0: i32, %arg1: i32, %arg2: i32) -> (i32, i32) {
    %c0_i32 = arith.constant 0 : i32
    return %arg0, %arg2 : i32, i32
  }
  func.func @transform_1(%arg0: i32, %arg1: i32, %arg2: i32) -> (i32, i32) {
    %c0_i32 = arith.constant 0 : i32
    return %arg2, %arg1 : i32, i32
  }
  func.func @transform_2(%arg0: i32, %arg1: i32, %arg2: i32) -> (i32, i32) {
    %c0_i32 = arith.constant 0 : i32
    %c0_i32_0 = arith.constant 0 : i32
    return %c0_i32, %arg1 : i32, i32
  }
  func.func @transform_3(%arg0: i32, %arg1: i32, %arg2: i32) -> (i32, i32) {
    %c0_i32 = arith.constant 0 : i32
    return %arg0, %arg1 : i32, i32
  }
}

module attributes {stable_mosaic.version = 11 : i64} {
  func.func @_self_attn_causal_kernel(%arg0: i32, %arg1: memref<1x8x96xbf16, #tpu.memory_space<vmem>>, %arg2: memref<1x8x32xbf16, #tpu.memory_space<vmem>>) attributes {dimension_semantics = [#tpu.dimension_semantics<parallel>], iteration_bounds = array<i64: 2>, scalar_prefetch = 0 : i64, scratch_operands = 0 : i64, tpu.core_type = #tpu.core_type<tc>, window_params = [{transform_indices = @transform_0, window_bounds = array<i64: 1, 8, 96>}, {transform_indices = @transform_1, window_bounds = array<i64: 1, 8, 32>}]} {
    %c0 = arith.constant 0 : index
    %c0_0 = arith.constant 0 : index
    %c0_1 = arith.constant 0 : index
    %0 = vector.load %arg1[%c0, %c0_0, %c0_1] : memref<1x8x96xbf16, #tpu.memory_space<vmem>>, vector<1x8x96xbf16>
    %1 = vector.shape_cast %0 : vector<1x8x96xbf16> to vector<8x96xbf16>
    %2 = tpu.iota {dimensions = array<i32: 0>} : vector<8x8xi32>
    %3 = tpu.iota {dimensions = array<i32: 1>} : vector<8x8xi32>
    %4 = arith.cmpi sge, %2, %3 : vector<8x8xi32>
    %cst = arith.constant 0.000000e+00 : f32
    %cst_2 = arith.constant -1.000000e+09 : f32
    %5 = vector.broadcast %cst : f32 to vector<8x8xf32>
    %6 = vector.broadcast %cst_2 : f32 to vector<8x8xf32>
    %7 = arith.select %4, %5, %6 : vector<8x8xi1>, vector<8x8xf32>
    %8 = vector.extract_strided_slice %1 {offsets = [0, 0], sizes = [8, 32], strides = [1, 1]} : vector<8x96xbf16> to vector<8x32xbf16>
    %9 = vector.extract_strided_slice %1 {offsets = [0, 32], sizes = [8, 32], strides = [1, 1]} : vector<8x96xbf16> to vector<8x32xbf16>
    %10 = vector.extract_strided_slice %1 {offsets = [0, 64], sizes = [8, 32], strides = [1, 1]} : vector<8x96xbf16> to vector<8x32xbf16>
    %11 = vector.extract_strided_slice %8 {offsets = [0, 0], sizes = [8, 4], strides = [1, 1]} : vector<8x32xbf16> to vector<8x4xbf16>
    %12 = vector.extract_strided_slice %9 {offsets = [0, 0], sizes = [8, 4], strides = [1, 1]} : vector<8x32xbf16> to vector<8x4xbf16>
    %13 = vector.extract_strided_slice %10 {offsets = [0, 0], sizes = [8, 4], strides = [1, 1]} : vector<8x32xbf16> to vector<8x4xbf16>
    %cst_3 = arith.constant dense<0.000000e+00> : vector<8x8xf32>
    %14 = tpu.matmul %11, %12, %cst_3 {dimension_numbers = #tpu.dot_dimension_numbers<[1], [1], [0], [0], [0, 0, 1, 0], [], []>} : vector<8x4xbf16>, vector<8x4xbf16>, vector<8x8xf32> -> vector<8x8xf32>
    %cst_4 = arith.constant 5.000000e-01 : f32
    %15 = vector.broadcast %cst_4 : f32 to vector<8x8xf32>
    %16 = arith.mulf %14, %15 : vector<8x8xf32>
    %17 = arith.addf %16, %7 : vector<8x8xf32>
    %cst_5 = arith.constant dense<0xFF800000> : vector<8xf32>
    %18 = vector.multi_reduction <maximumf>, %17, %cst_5 [1] : vector<8x8xf32> to vector<8xf32>
    %19 = vector.shape_cast %18 : vector<8xf32> to vector<8x1xf32>
    %20 = vector.broadcast %19 : vector<8x1xf32> to vector<8x8xf32>
    %21 = arith.subf %17, %20 : vector<8x8xf32>
    %22 = math.exp %21 : vector<8x8xf32>
    %cst_6 = arith.constant dense<0.000000e+00> : vector<8xf32>
    %23 = vector.multi_reduction <add>, %22, %cst_6 [1] : vector<8x8xf32> to vector<8xf32>
    %24 = vector.shape_cast %23 : vector<8xf32> to vector<8x1xf32>
    %25 = tpu.reciprocal %24 {approx = true} : vector<8x1xf32> -> vector<8x1xf32>
    %26 = vector.broadcast %25 : vector<8x1xf32> to vector<8x8xf32>
    %27 = arith.mulf %22, %26 : vector<8x8xf32>
    %28 = arith.truncf %27 : vector<8x8xf32> to vector<8x8xbf16>
    %cst_7 = arith.constant dense<0.000000e+00> : vector<8x4xf32>
    %29 = tpu.matmul %28, %13, %cst_7 {dimension_numbers = #tpu.dot_dimension_numbers<[1], [0], [0], [1], [0, 0, 1, 1], [], []>} : vector<8x8xbf16>, vector<8x4xbf16>, vector<8x4xf32> -> vector<8x4xf32>
    %30 = vector.extract_strided_slice %8 {offsets = [0, 4], sizes = [8, 4], strides = [1, 1]} : vector<8x32xbf16> to vector<8x4xbf16>
    %31 = vector.extract_strided_slice %9 {offsets = [0, 4], sizes = [8, 4], strides = [1, 1]} : vector<8x32xbf16> to vector<8x4xbf16>
    %32 = vector.extract_strided_slice %10 {offsets = [0, 4], sizes = [8, 4], strides = [1, 1]} : vector<8x32xbf16> to vector<8x4xbf16>
    %cst_8 = arith.constant dense<0.000000e+00> : vector<8x8xf32>
    %33 = tpu.matmul %30, %31, %cst_8 {dimension_numbers = #tpu.dot_dimension_numbers<[1], [1], [0], [0], [0, 0, 1, 0], [], []>} : vector<8x4xbf16>, vector<8x4xbf16>, vector<8x8xf32> -> vector<8x8xf32>
    %cst_9 = arith.constant 5.000000e-01 : f32
    %34 = vector.broadcast %cst_9 : f32 to vector<8x8xf32>
    %35 = arith.mulf %33, %34 : vector<8x8xf32>
    %36 = arith.addf %35, %7 : vector<8x8xf32>
    %cst_10 = arith.constant dense<0xFF800000> : vector<8xf32>
    %37 = vector.multi_reduction <maximumf>, %36, %cst_10 [1] : vector<8x8xf32> to vector<8xf32>
    %38 = vector.shape_cast %37 : vector<8xf32> to vector<8x1xf32>
    %39 = vector.broadcast %38 : vector<8x1xf32> to vector<8x8xf32>
    %40 = arith.subf %36, %39 : vector<8x8xf32>
    %41 = math.exp %40 : vector<8x8xf32>
    %cst_11 = arith.constant dense<0.000000e+00> : vector<8xf32>
    %42 = vector.multi_reduction <add>, %41, %cst_11 [1] : vector<8x8xf32> to vector<8xf32>
    %43 = vector.shape_cast %42 : vector<8xf32> to vector<8x1xf32>
    %44 = tpu.reciprocal %43 {approx = true} : vector<8x1xf32> -> vector<8x1xf32>
    %45 = vector.broadcast %44 : vector<8x1xf32> to vector<8x8xf32>
    %46 = arith.mulf %41, %45 : vector<8x8xf32>
    %47 = arith.truncf %46 : vector<8x8xf32> to vector<8x8xbf16>
    %cst_12 = arith.constant dense<0.000000e+00> : vector<8x4xf32>
    %48 = tpu.matmul %47, %32, %cst_12 {dimension_numbers = #tpu.dot_dimension_numbers<[1], [0], [0], [1], [0, 0, 1, 1], [], []>} : vector<8x8xbf16>, vector<8x4xbf16>, vector<8x4xf32> -> vector<8x4xf32>
    %49 = vector.extract_strided_slice %8 {offsets = [0, 8], sizes = [8, 4], strides = [1, 1]} : vector<8x32xbf16> to vector<8x4xbf16>
    %50 = vector.extract_strided_slice %9 {offsets = [0, 8], sizes = [8, 4], strides = [1, 1]} : vector<8x32xbf16> to vector<8x4xbf16>
    %51 = vector.extract_strided_slice %10 {offsets = [0, 8], sizes = [8, 4], strides = [1, 1]} : vector<8x32xbf16> to vector<8x4xbf16>
    %cst_13 = arith.constant dense<0.000000e+00> : vector<8x8xf32>
    %52 = tpu.matmul %49, %50, %cst_13 {dimension_numbers = #tpu.dot_dimension_numbers<[1], [1], [0], [0], [0, 0, 1, 0], [], []>} : vector<8x4xbf16>, vector<8x4xbf16>, vector<8x8xf32> -> vector<8x8xf32>
    %cst_14 = arith.constant 5.000000e-01 : f32
    %53 = vector.broadcast %cst_14 : f32 to vector<8x8xf32>
    %54 = arith.mulf %52, %53 : vector<8x8xf32>
    %55 = arith.addf %54, %7 : vector<8x8xf32>
    %cst_15 = arith.constant dense<0xFF800000> : vector<8xf32>
    %56 = vector.multi_reduction <maximumf>, %55, %cst_15 [1] : vector<8x8xf32> to vector<8xf32>
    %57 = vector.shape_cast %56 : vector<8xf32> to vector<8x1xf32>
    %58 = vector.broadcast %57 : vector<8x1xf32> to vector<8x8xf32>
    %59 = arith.subf %55, %58 : vector<8x8xf32>
    %60 = math.exp %59 : vector<8x8xf32>
    %cst_16 = arith.constant dense<0.000000e+00> : vector<8xf32>
    %61 = vector.multi_reduction <add>, %60, %cst_16 [1] : vector<8x8xf32> to vector<8xf32>
    %62 = vector.shape_cast %61 : vector<8xf32> to vector<8x1xf32>
    %63 = tpu.reciprocal %62 {approx = true} : vector<8x1xf32> -> vector<8x1xf32>
    %64 = vector.broadcast %63 : vector<8x1xf32> to vector<8x8xf32>
    %65 = arith.mulf %60, %64 : vector<8x8xf32>
    %66 = arith.truncf %65 : vector<8x8xf32> to vector<8x8xbf16>
    %cst_17 = arith.constant dense<0.000000e+00> : vector<8x4xf32>
    %67 = tpu.matmul %66, %51, %cst_17 {dimension_numbers = #tpu.dot_dimension_numbers<[1], [0], [0], [1], [0, 0, 1, 1], [], []>} : vector<8x8xbf16>, vector<8x4xbf16>, vector<8x4xf32> -> vector<8x4xf32>
    %68 = vector.extract_strided_slice %8 {offsets = [0, 12], sizes = [8, 4], strides = [1, 1]} : vector<8x32xbf16> to vector<8x4xbf16>
    %69 = vector.extract_strided_slice %9 {offsets = [0, 12], sizes = [8, 4], strides = [1, 1]} : vector<8x32xbf16> to vector<8x4xbf16>
    %70 = vector.extract_strided_slice %10 {offsets = [0, 12], sizes = [8, 4], strides = [1, 1]} : vector<8x32xbf16> to vector<8x4xbf16>
    %cst_18 = arith.constant dense<0.000000e+00> : vector<8x8xf32>
    %71 = tpu.matmul %68, %69, %cst_18 {dimension_numbers = #tpu.dot_dimension_numbers<[1], [1], [0], [0], [0, 0, 1, 0], [], []>} : vector<8x4xbf16>, vector<8x4xbf16>, vector<8x8xf32> -> vector<8x8xf32>
    %cst_19 = arith.constant 5.000000e-01 : f32
    %72 = vector.broadcast %cst_19 : f32 to vector<8x8xf32>
    %73 = arith.mulf %71, %72 : vector<8x8xf32>
    %74 = arith.addf %73, %7 : vector<8x8xf32>
    %cst_20 = arith.constant dense<0xFF800000> : vector<8xf32>
    %75 = vector.multi_reduction <maximumf>, %74, %cst_20 [1] : vector<8x8xf32> to vector<8xf32>
    %76 = vector.shape_cast %75 : vector<8xf32> to vector<8x1xf32>
    %77 = vector.broadcast %76 : vector<8x1xf32> to vector<8x8xf32>
    %78 = arith.subf %74, %77 : vector<8x8xf32>
    %79 = math.exp %78 : vector<8x8xf32>
    %cst_21 = arith.constant dense<0.000000e+00> : vector<8xf32>
    %80 = vector.multi_reduction <add>, %79, %cst_21 [1] : vector<8x8xf32> to vector<8xf32>
    %81 = vector.shape_cast %80 : vector<8xf32> to vector<8x1xf32>
    %82 = tpu.reciprocal %81 {approx = true} : vector<8x1xf32> -> vector<8x1xf32>
    %83 = vector.broadcast %82 : vector<8x1xf32> to vector<8x8xf32>
    %84 = arith.mulf %79, %83 : vector<8x8xf32>
    %85 = arith.truncf %84 : vector<8x8xf32> to vector<8x8xbf16>
    %cst_22 = arith.constant dense<0.000000e+00> : vector<8x4xf32>
    %86 = tpu.matmul %85, %70, %cst_22 {dimension_numbers = #tpu.dot_dimension_numbers<[1], [0], [0], [1], [0, 0, 1, 1], [], []>} : vector<8x8xbf16>, vector<8x4xbf16>, vector<8x4xf32> -> vector<8x4xf32>
    %87 = vector.extract_strided_slice %8 {offsets = [0, 16], sizes = [8, 4], strides = [1, 1]} : vector<8x32xbf16> to vector<8x4xbf16>
    %88 = vector.extract_strided_slice %9 {offsets = [0, 16], sizes = [8, 4], strides = [1, 1]} : vector<8x32xbf16> to vector<8x4xbf16>
    %89 = vector.extract_strided_slice %10 {offsets = [0, 16], sizes = [8, 4], strides = [1, 1]} : vector<8x32xbf16> to vector<8x4xbf16>
    %cst_23 = arith.constant dense<0.000000e+00> : vector<8x8xf32>
    %90 = tpu.matmul %87, %88, %cst_23 {dimension_numbers = #tpu.dot_dimension_numbers<[1], [1], [0], [0], [0, 0, 1, 0], [], []>} : vector<8x4xbf16>, vector<8x4xbf16>, vector<8x8xf32> -> vector<8x8xf32>
    %cst_24 = arith.constant 5.000000e-01 : f32
    %91 = vector.broadcast %cst_24 : f32 to vector<8x8xf32>
    %92 = arith.mulf %90, %91 : vector<8x8xf32>
    %93 = arith.addf %92, %7 : vector<8x8xf32>
    %cst_25 = arith.constant dense<0xFF800000> : vector<8xf32>
    %94 = vector.multi_reduction <maximumf>, %93, %cst_25 [1] : vector<8x8xf32> to vector<8xf32>
    %95 = vector.shape_cast %94 : vector<8xf32> to vector<8x1xf32>
    %96 = vector.broadcast %95 : vector<8x1xf32> to vector<8x8xf32>
    %97 = arith.subf %93, %96 : vector<8x8xf32>
    %98 = math.exp %97 : vector<8x8xf32>
    %cst_26 = arith.constant dense<0.000000e+00> : vector<8xf32>
    %99 = vector.multi_reduction <add>, %98, %cst_26 [1] : vector<8x8xf32> to vector<8xf32>
    %100 = vector.shape_cast %99 : vector<8xf32> to vector<8x1xf32>
    %101 = tpu.reciprocal %100 {approx = true} : vector<8x1xf32> -> vector<8x1xf32>
    %102 = vector.broadcast %101 : vector<8x1xf32> to vector<8x8xf32>
    %103 = arith.mulf %98, %102 : vector<8x8xf32>
    %104 = arith.truncf %103 : vector<8x8xf32> to vector<8x8xbf16>
    %cst_27 = arith.constant dense<0.000000e+00> : vector<8x4xf32>
    %105 = tpu.matmul %104, %89, %cst_27 {dimension_numbers = #tpu.dot_dimension_numbers<[1], [0], [0], [1], [0, 0, 1, 1], [], []>} : vector<8x8xbf16>, vector<8x4xbf16>, vector<8x4xf32> -> vector<8x4xf32>
    %106 = vector.extract_strided_slice %8 {offsets = [0, 20], sizes = [8, 4], strides = [1, 1]} : vector<8x32xbf16> to vector<8x4xbf16>
    %107 = vector.extract_strided_slice %9 {offsets = [0, 20], sizes = [8, 4], strides = [1, 1]} : vector<8x32xbf16> to vector<8x4xbf16>
    %108 = vector.extract_strided_slice %10 {offsets = [0, 20], sizes = [8, 4], strides = [1, 1]} : vector<8x32xbf16> to vector<8x4xbf16>
    %cst_28 = arith.constant dense<0.000000e+00> : vector<8x8xf32>
    %109 = tpu.matmul %106, %107, %cst_28 {dimension_numbers = #tpu.dot_dimension_numbers<[1], [1], [0], [0], [0, 0, 1, 0], [], []>} : vector<8x4xbf16>, vector<8x4xbf16>, vector<8x8xf32> -> vector<8x8xf32>
    %cst_29 = arith.constant 5.000000e-01 : f32
    %110 = vector.broadcast %cst_29 : f32 to vector<8x8xf32>
    %111 = arith.mulf %109, %110 : vector<8x8xf32>
    %112 = arith.addf %111, %7 : vector<8x8xf32>
    %cst_30 = arith.constant dense<0xFF800000> : vector<8xf32>
    %113 = vector.multi_reduction <maximumf>, %112, %cst_30 [1] : vector<8x8xf32> to vector<8xf32>
    %114 = vector.shape_cast %113 : vector<8xf32> to vector<8x1xf32>
    %115 = vector.broadcast %114 : vector<8x1xf32> to vector<8x8xf32>
    %116 = arith.subf %112, %115 : vector<8x8xf32>
    %117 = math.exp %116 : vector<8x8xf32>
    %cst_31 = arith.constant dense<0.000000e+00> : vector<8xf32>
    %118 = vector.multi_reduction <add>, %117, %cst_31 [1] : vector<8x8xf32> to vector<8xf32>
    %119 = vector.shape_cast %118 : vector<8xf32> to vector<8x1xf32>
    %120 = tpu.reciprocal %119 {approx = true} : vector<8x1xf32> -> vector<8x1xf32>
    %121 = vector.broadcast %120 : vector<8x1xf32> to vector<8x8xf32>
    %122 = arith.mulf %117, %121 : vector<8x8xf32>
    %123 = arith.truncf %122 : vector<8x8xf32> to vector<8x8xbf16>
    %cst_32 = arith.constant dense<0.000000e+00> : vector<8x4xf32>
    %124 = tpu.matmul %123, %108, %cst_32 {dimension_numbers = #tpu.dot_dimension_numbers<[1], [0], [0], [1], [0, 0, 1, 1], [], []>} : vector<8x8xbf16>, vector<8x4xbf16>, vector<8x4xf32> -> vector<8x4xf32>
    %125 = vector.extract_strided_slice %8 {offsets = [0, 24], sizes = [8, 4], strides = [1, 1]} : vector<8x32xbf16> to vector<8x4xbf16>
    %126 = vector.extract_strided_slice %9 {offsets = [0, 24], sizes = [8, 4], strides = [1, 1]} : vector<8x32xbf16> to vector<8x4xbf16>
    %127 = vector.extract_strided_slice %10 {offsets = [0, 24], sizes = [8, 4], strides = [1, 1]} : vector<8x32xbf16> to vector<8x4xbf16>
    %cst_33 = arith.constant dense<0.000000e+00> : vector<8x8xf32>
    %128 = tpu.matmul %125, %126, %cst_33 {dimension_numbers = #tpu.dot_dimension_numbers<[1], [1], [0], [0], [0, 0, 1, 0], [], []>} : vector<8x4xbf16>, vector<8x4xbf16>, vector<8x8xf32> -> vector<8x8xf32>
    %cst_34 = arith.constant 5.000000e-01 : f32
    %129 = vector.broadcast %cst_34 : f32 to vector<8x8xf32>
    %130 = arith.mulf %128, %129 : vector<8x8xf32>
    %131 = arith.addf %130, %7 : vector<8x8xf32>
    %cst_35 = arith.constant dense<0xFF800000> : vector<8xf32>
    %132 = vector.multi_reduction <maximumf>, %131, %cst_35 [1] : vector<8x8xf32> to vector<8xf32>
    %133 = vector.shape_cast %132 : vector<8xf32> to vector<8x1xf32>
    %134 = vector.broadcast %133 : vector<8x1xf32> to vector<8x8xf32>
    %135 = arith.subf %131, %134 : vector<8x8xf32>
    %136 = math.exp %135 : vector<8x8xf32>
    %cst_36 = arith.constant dense<0.000000e+00> : vector<8xf32>
    %137 = vector.multi_reduction <add>, %136, %cst_36 [1] : vector<8x8xf32> to vector<8xf32>
    %138 = vector.shape_cast %137 : vector<8xf32> to vector<8x1xf32>
    %139 = tpu.reciprocal %138 {approx = true} : vector<8x1xf32> -> vector<8x1xf32>
    %140 = vector.broadcast %139 : vector<8x1xf32> to vector<8x8xf32>
    %141 = arith.mulf %136, %140 : vector<8x8xf32>
    %142 = arith.truncf %141 : vector<8x8xf32> to vector<8x8xbf16>
    %cst_37 = arith.constant dense<0.000000e+00> : vector<8x4xf32>
    %143 = tpu.matmul %142, %127, %cst_37 {dimension_numbers = #tpu.dot_dimension_numbers<[1], [0], [0], [1], [0, 0, 1, 1], [], []>} : vector<8x8xbf16>, vector<8x4xbf16>, vector<8x4xf32> -> vector<8x4xf32>
    %144 = vector.extract_strided_slice %8 {offsets = [0, 28], sizes = [8, 4], strides = [1, 1]} : vector<8x32xbf16> to vector<8x4xbf16>
    %145 = vector.extract_strided_slice %9 {offsets = [0, 28], sizes = [8, 4], strides = [1, 1]} : vector<8x32xbf16> to vector<8x4xbf16>
    %146 = vector.extract_strided_slice %10 {offsets = [0, 28], sizes = [8, 4], strides = [1, 1]} : vector<8x32xbf16> to vector<8x4xbf16>
    %cst_38 = arith.constant dense<0.000000e+00> : vector<8x8xf32>
    %147 = tpu.matmul %144, %145, %cst_38 {dimension_numbers = #tpu.dot_dimension_numbers<[1], [1], [0], [0], [0, 0, 1, 0], [], []>} : vector<8x4xbf16>, vector<8x4xbf16>, vector<8x8xf32> -> vector<8x8xf32>
    %cst_39 = arith.constant 5.000000e-01 : f32
    %148 = vector.broadcast %cst_39 : f32 to vector<8x8xf32>
    %149 = arith.mulf %147, %148 : vector<8x8xf32>
    %150 = arith.addf %149, %7 : vector<8x8xf32>
    %cst_40 = arith.constant dense<0xFF800000> : vector<8xf32>
    %151 = vector.multi_reduction <maximumf>, %150, %cst_40 [1] : vector<8x8xf32> to vector<8xf32>
    %152 = vector.shape_cast %151 : vector<8xf32> to vector<8x1xf32>
    %153 = vector.broadcast %152 : vector<8x1xf32> to vector<8x8xf32>
    %154 = arith.subf %150, %153 : vector<8x8xf32>
    %155 = math.exp %154 : vector<8x8xf32>
    %cst_41 = arith.constant dense<0.000000e+00> : vector<8xf32>
    %156 = vector.multi_reduction <add>, %155, %cst_41 [1] : vector<8x8xf32> to vector<8xf32>
    %157 = vector.shape_cast %156 : vector<8xf32> to vector<8x1xf32>
    %158 = tpu.reciprocal %157 {approx = true} : vector<8x1xf32> -> vector<8x1xf32>
    %159 = vector.broadcast %158 : vector<8x1xf32> to vector<8x8xf32>
    %160 = arith.mulf %155, %159 : vector<8x8xf32>
    %161 = arith.truncf %160 : vector<8x8xf32> to vector<8x8xbf16>
    %cst_42 = arith.constant dense<0.000000e+00> : vector<8x4xf32>
    %162 = tpu.matmul %161, %146, %cst_42 {dimension_numbers = #tpu.dot_dimension_numbers<[1], [0], [0], [1], [0, 0, 1, 1], [], []>} : vector<8x8xbf16>, vector<8x4xbf16>, vector<8x4xf32> -> vector<8x4xf32>
    %163 = tpu.concatenate %29, %48, %67, %86, %105, %124, %143, %162 in 1 : vector<8x4xf32>, vector<8x4xf32>, vector<8x4xf32>, vector<8x4xf32>, vector<8x4xf32>, vector<8x4xf32>, vector<8x4xf32>, vector<8x4xf32> -> vector<8x32xf32>
    %164 = arith.truncf %163 : vector<8x32xf32> to vector<8x32xbf16>
    %c0_43 = arith.constant 0 : index
    %c0_44 = arith.constant 0 : index
    %c0_45 = arith.constant 0 : index
    %165 = vector.load %arg2[%c0_43, %c0_44, %c0_45] : memref<1x8x32xbf16, #tpu.memory_space<vmem>>, vector<1x8x32xbf16>
    %166 = vector.shape_cast %165 : vector<1x8x32xbf16> to vector<8x32xbf16>
    %167 = vector.shape_cast %164 : vector<8x32xbf16> to vector<1x8x32xbf16>
    tpu.vector_store %arg2[%c0_43, %c0_44, %c0_45], %167 {strides = array<i32>} : memref<1x8x32xbf16, #tpu.memory_space<vmem>>, vector<1x8x32xbf16>,
    return
  }
  func.func @transform_0(%arg0: i32) -> (i32, i32, i32) {
    %c0_i32 = arith.constant 0 : i32
    %c0_i32_0 = arith.constant 0 : i32
    %c0_i32_1 = arith.constant 0 : i32
    return %arg0, %c0_i32, %c0_i32_0 : i32, i32, i32
  }
  func.func @transform_1(%arg0: i32) -> (i32, i32, i32) {
    %c0_i32 = arith.constant 0 : i32
    %c0_i32_0 = arith.constant 0 : i32
    %c0_i32_1 = arith.constant 0 : i32
    return %arg0, %c0_i32, %c0_i32_0 : i32, i32, i32
  }
}

module attributes {stable_mosaic.version = 11 : i64} {
  func.func @_matmul_bias_kernel(%arg0: i32, %arg1: i32, %arg2: i32, %arg3: memref<16x32xbf16, #tpu.memory_space<vmem>>, %arg4: memref<32x64xbf16, #tpu.memory_space<vmem>>, %arg5: memref<1x64xf32, #tpu.memory_space<vmem>>, %arg6: memref<16x64xbf16, #tpu.memory_space<vmem>>, %arg7: memref<16x64xf32, #tpu.memory_space<vmem>>) attributes {dimension_semantics = [#tpu.dimension_semantics<parallel>, #tpu.dimension_semantics<parallel>, #tpu.dimension_semantics<arbitrary>], iteration_bounds = array<i64: 1, 1, 1>, scalar_prefetch = 0 : i64, scratch_operands = 1 : i64, tpu.core_type = #tpu.core_type<tc>, window_params = [{transform_indices = @transform_0, window_bounds = array<i64: 16, 32>}, {transform_indices = @transform_1, window_bounds = array<i64: 32, 64>}, {transform_indices = @transform_2, window_bounds = array<i64: 1, 64>}, {transform_indices = @transform_3, window_bounds = array<i64: 16, 64>}]} {
    %c0_i32 = arith.constant 0 : i32
    %0 = arith.cmpi eq, %arg2, %c0_i32 : i32
    %1 = arith.extui %0 : i1 to i32
    %c0_i32_0 = arith.constant 0 : i32
    %2 = arith.cmpi ne, %1, %c0_i32_0 : i32
    scf.if %2 {
      %cst_10 = arith.constant 0.000000e+00 : f32
      %12 = vector.broadcast %cst_10 : f32 to vector<16x64xf32>
      %c0_11 = arith.constant 0 : index
      %c0_12 = arith.constant 0 : index
      %13 = vector.load %arg7[%c0_11, %c0_12] : memref<16x64xf32, #tpu.memory_space<vmem>>, vector<16x64xf32>
      tpu.vector_store %arg7[%c0_11, %c0_12], %12 {strides = array<i32>} : memref<16x64xf32, #tpu.memory_space<vmem>>, vector<16x64xf32>,
    } else {
    }
    %c0 = arith.constant 0 : index
    %c0_1 = arith.constant 0 : index
    %3 = vector.load %arg7[%c0, %c0_1] : memref<16x64xf32, #tpu.memory_space<vmem>>, vector<16x64xf32>
    %c0_2 = arith.constant 0 : index
    %c0_3 = arith.constant 0 : index
    %4 = vector.load %arg3[%c0_2, %c0_3] : memref<16x32xbf16, #tpu.memory_space<vmem>>, vector<16x32xbf16>
    %c0_4 = arith.constant 0 : index
    %c0_5 = arith.constant 0 : index
    %5 = vector.load %arg4[%c0_4, %c0_5] : memref<32x64xbf16, #tpu.memory_space<vmem>>, vector<32x64xbf16>
    %cst = arith.constant dense<0.000000e+00> : vector<16x64xf32>
    %6 = tpu.matmul %4, %5, %cst {dimension_numbers = #tpu.dot_dimension_numbers<[1], [0], [0], [1], [0, 0, 1, 1], [], []>} : vector<16x32xbf16>, vector<32x64xbf16>, vector<16x64xf32> -> vector<16x64xf32>
    %7 = arith.addf %3, %6 : vector<16x64xf32>
    %c0_6 = arith.constant 0 : index
    %c0_7 = arith.constant 0 : index
    %8 = vector.load %arg7[%c0_6, %c0_7] : memref<16x64xf32, #tpu.memory_space<vmem>>, vector<16x64xf32>
    tpu.vector_store %arg7[%c0_6, %c0_7], %7 {strides = array<i32>} : memref<16x64xf32, #tpu.memory_space<vmem>>, vector<16x64xf32>,
    %c0_i32_8 = arith.constant 0 : i32
    %9 = arith.cmpi eq, %arg2, %c0_i32_8 : i32
    %10 = arith.extui %9 : i1 to i32
    %c0_i32_9 = arith.constant 0 : i32
    %11 = arith.cmpi ne, %10, %c0_i32_9 : i32
    scf.if %11 {
      %c0_10 = arith.constant 0 : index
      %c0_11 = arith.constant 0 : index
      %12 = vector.load %arg7[%c0_10, %c0_11] : memref<16x64xf32, #tpu.memory_space<vmem>>, vector<16x64xf32>
      %c0_12 = arith.constant 0 : index
      %c0_13 = arith.constant 0 : index
      %13 = vector.load %arg5[%c0_12, %c0_13] : memref<1x64xf32, #tpu.memory_space<vmem>>, vector<1x64xf32>
      %14 = vector.broadcast %13 : vector<1x64xf32> to vector<16x64xf32>
      %15 = arith.addf %12, %14 : vector<16x64xf32>
      %16 = arith.truncf %15 : vector<16x64xf32> to vector<16x64xbf16>
      %c0_14 = arith.constant 0 : index
      %c0_15 = arith.constant 0 : index
      %17 = vector.load %arg6[%c0_14, %c0_15] : memref<16x64xbf16, #tpu.memory_space<vmem>>, vector<16x64xbf16>
      tpu.vector_store %arg6[%c0_14, %c0_15], %16 {strides = array<i32>} : memref<16x64xbf16, #tpu.memory_space<vmem>>, vector<16x64xbf16>,
    } else {
    }
    return
  }
  func.func @transform_0(%arg0: i32, %arg1: i32, %arg2: i32) -> (i32, i32) {
    %c0_i32 = arith.constant 0 : i32
    return %arg0, %arg2 : i32, i32
  }
  func.func @transform_1(%arg0: i32, %arg1: i32, %arg2: i32) -> (i32, i32) {
    %c0_i32 = arith.constant 0 : i32
    return %arg2, %arg1 : i32, i32
  }
  func.func @transform_2(%arg0: i32, %arg1: i32, %arg2: i32) -> (i32, i32) {
    %c0_i32 = arith.constant 0 : i32
    %c0_i32_0 = arith.constant 0 : i32
    return %c0_i32, %arg1 : i32, i32
  }
  func.func @transform_3(%arg0: i32, %arg1: i32, %arg2: i32) -> (i32, i32) {
    %c0_i32 = arith.constant 0 : i32
    return %arg0, %arg1 : i32, i32
  }
}

module attributes {stable_mosaic.version = 11 : i64} {
  func.func @_matmul_bias_kernel(%arg0: i32, %arg1: i32, %arg2: i32, %arg3: memref<16x32xbf16, #tpu.memory_space<vmem>>, %arg4: memref<32x128xbf16, #tpu.memory_space<vmem>>, %arg5: memref<1x128xf32, #tpu.memory_space<vmem>>, %arg6: memref<16x128xbf16, #tpu.memory_space<vmem>>, %arg7: memref<16x128xf32, #tpu.memory_space<vmem>>) attributes {dimension_semantics = [#tpu.dimension_semantics<parallel>, #tpu.dimension_semantics<parallel>, #tpu.dimension_semantics<arbitrary>], iteration_bounds = array<i64: 1, 1, 1>, scalar_prefetch = 0 : i64, scratch_operands = 1 : i64, tpu.core_type = #tpu.core_type<tc>, window_params = [{transform_indices = @transform_0, window_bounds = array<i64: 16, 32>}, {transform_indices = @transform_1, window_bounds = array<i64: 32, 128>}, {transform_indices = @transform_2, window_bounds = array<i64: 1, 128>}, {transform_indices = @transform_3, window_bounds = array<i64: 16, 128>}]} {
    %c0_i32 = arith.constant 0 : i32
    %0 = arith.cmpi eq, %arg2, %c0_i32 : i32
    %1 = arith.extui %0 : i1 to i32
    %c0_i32_0 = arith.constant 0 : i32
    %2 = arith.cmpi ne, %1, %c0_i32_0 : i32
    scf.if %2 {
      %cst_10 = arith.constant 0.000000e+00 : f32
      %12 = vector.broadcast %cst_10 : f32 to vector<16x128xf32>
      %c0_11 = arith.constant 0 : index
      %c0_12 = arith.constant 0 : index
      %13 = vector.load %arg7[%c0_11, %c0_12] : memref<16x128xf32, #tpu.memory_space<vmem>>, vector<16x128xf32>
      tpu.vector_store %arg7[%c0_11, %c0_12], %12 {strides = array<i32>} : memref<16x128xf32, #tpu.memory_space<vmem>>, vector<16x128xf32>,
    } else {
    }
    %c0 = arith.constant 0 : index
    %c0_1 = arith.constant 0 : index
    %3 = vector.load %arg7[%c0, %c0_1] : memref<16x128xf32, #tpu.memory_space<vmem>>, vector<16x128xf32>
    %c0_2 = arith.constant 0 : index
    %c0_3 = arith.constant 0 : index
    %4 = vector.load %arg3[%c0_2, %c0_3] : memref<16x32xbf16, #tpu.memory_space<vmem>>, vector<16x32xbf16>
    %c0_4 = arith.constant 0 : index
    %c0_5 = arith.constant 0 : index
    %5 = vector.load %arg4[%c0_4, %c0_5] : memref<32x128xbf16, #tpu.memory_space<vmem>>, vector<32x128xbf16>
    %cst = arith.constant dense<0.000000e+00> : vector<16x128xf32>
    %6 = tpu.matmul %4, %5, %cst {dimension_numbers = #tpu.dot_dimension_numbers<[1], [0], [0], [1], [0, 0, 1, 1], [], []>} : vector<16x32xbf16>, vector<32x128xbf16>, vector<16x128xf32> -> vector<16x128xf32>
    %7 = arith.addf %3, %6 : vector<16x128xf32>
    %c0_6 = arith.constant 0 : index
    %c0_7 = arith.constant 0 : index
    %8 = vector.load %arg7[%c0_6, %c0_7] : memref<16x128xf32, #tpu.memory_space<vmem>>, vector<16x128xf32>
    tpu.vector_store %arg7[%c0_6, %c0_7], %7 {strides = array<i32>} : memref<16x128xf32, #tpu.memory_space<vmem>>, vector<16x128xf32>,
    %c0_i32_8 = arith.constant 0 : i32
    %9 = arith.cmpi eq, %arg2, %c0_i32_8 : i32
    %10 = arith.extui %9 : i1 to i32
    %c0_i32_9 = arith.constant 0 : i32
    %11 = arith.cmpi ne, %10, %c0_i32_9 : i32
    scf.if %11 {
      %c0_10 = arith.constant 0 : index
      %c0_11 = arith.constant 0 : index
      %12 = vector.load %arg7[%c0_10, %c0_11] : memref<16x128xf32, #tpu.memory_space<vmem>>, vector<16x128xf32>
      %c0_12 = arith.constant 0 : index
      %c0_13 = arith.constant 0 : index
      %13 = vector.load %arg5[%c0_12, %c0_13] : memref<1x128xf32, #tpu.memory_space<vmem>>, vector<1x128xf32>
      %14 = vector.broadcast %13 : vector<1x128xf32> to vector<16x128xf32>
      %15 = arith.addf %12, %14 : vector<16x128xf32>
      %cst_14 = arith.constant 0.000000e+00 : f32
      %16 = vector.broadcast %cst_14 : f32 to vector<16x128xf32>
      %17 = arith.maximumf %15, %16 : vector<16x128xf32>
      %18 = arith.truncf %17 : vector<16x128xf32> to vector<16x128xbf16>
      %c0_15 = arith.constant 0 : index
      %c0_16 = arith.constant 0 : index
      %19 = vector.load %arg6[%c0_15, %c0_16] : memref<16x128xbf16, #tpu.memory_space<vmem>>, vector<16x128xbf16>
      tpu.vector_store %arg6[%c0_15, %c0_16], %18 {strides = array<i32>} : memref<16x128xbf16, #tpu.memory_space<vmem>>, vector<16x128xbf16>,
    } else {
    }
    return
  }
  func.func @transform_0(%arg0: i32, %arg1: i32, %arg2: i32) -> (i32, i32) {
    %c0_i32 = arith.constant 0 : i32
    return %arg0, %arg2 : i32, i32
  }
  func.func @transform_1(%arg0: i32, %arg1: i32, %arg2: i32) -> (i32, i32) {
    %c0_i32 = arith.constant 0 : i32
    return %arg2, %arg1 : i32, i32
  }
  func.func @transform_2(%arg0: i32, %arg1: i32, %arg2: i32) -> (i32, i32) {
    %c0_i32 = arith.constant 0 : i32
    %c0_i32_0 = arith.constant 0 : i32
    return %c0_i32, %arg1 : i32, i32
  }
  func.func @transform_3(%arg0: i32, %arg1: i32, %arg2: i32) -> (i32, i32) {
    %c0_i32 = arith.constant 0 : i32
    return %arg0, %arg1 : i32, i32
  }
}

module attributes {stable_mosaic.version = 11 : i64} {
  func.func @_cross_attn_kernel(%arg0: i32, %arg1: memref<1x8x32xbf16, #tpu.memory_space<vmem>>, %arg2: memref<1x8x64xbf16, #tpu.memory_space<vmem>>, %arg3: memref<1x8x32xbf16, #tpu.memory_space<vmem>>) attributes {dimension_semantics = [#tpu.dimension_semantics<parallel>], iteration_bounds = array<i64: 2>, scalar_prefetch = 0 : i64, scratch_operands = 0 : i64, tpu.core_type = #tpu.core_type<tc>, window_params = [{transform_indices = @transform_0, window_bounds = array<i64: 1, 8, 32>}, {transform_indices = @transform_1, window_bounds = array<i64: 1, 8, 64>}, {transform_indices = @transform_2, window_bounds = array<i64: 1, 8, 32>}]} {
    %c0 = arith.constant 0 : index
    %c0_0 = arith.constant 0 : index
    %c0_1 = arith.constant 0 : index
    %0 = vector.load %arg2[%c0, %c0_0, %c0_1] : memref<1x8x64xbf16, #tpu.memory_space<vmem>>, vector<1x8x64xbf16>
    %1 = vector.shape_cast %0 : vector<1x8x64xbf16> to vector<8x64xbf16>
    %c0_2 = arith.constant 0 : index
    %c0_3 = arith.constant 0 : index
    %c0_4 = arith.constant 0 : index
    %2 = vector.load %arg1[%c0_2, %c0_3, %c0_4] : memref<1x8x32xbf16, #tpu.memory_space<vmem>>, vector<1x8x32xbf16>
    %3 = vector.shape_cast %2 : vector<1x8x32xbf16> to vector<8x32xbf16>
    %4 = vector.extract_strided_slice %1 {offsets = [0, 0], sizes = [8, 32], strides = [1, 1]} : vector<8x64xbf16> to vector<8x32xbf16>
    %5 = vector.extract_strided_slice %1 {offsets = [0, 32], sizes = [8, 32], strides = [1, 1]} : vector<8x64xbf16> to vector<8x32xbf16>
    %6 = vector.extract_strided_slice %3 {offsets = [0, 0], sizes = [8, 4], strides = [1, 1]} : vector<8x32xbf16> to vector<8x4xbf16>
    %7 = vector.extract_strided_slice %4 {offsets = [0, 0], sizes = [8, 4], strides = [1, 1]} : vector<8x32xbf16> to vector<8x4xbf16>
    %8 = vector.extract_strided_slice %5 {offsets = [0, 0], sizes = [8, 4], strides = [1, 1]} : vector<8x32xbf16> to vector<8x4xbf16>
    %cst = arith.constant dense<0.000000e+00> : vector<8x8xf32>
    %9 = tpu.matmul %6, %7, %cst {dimension_numbers = #tpu.dot_dimension_numbers<[1], [1], [0], [0], [0, 0, 1, 0], [], []>} : vector<8x4xbf16>, vector<8x4xbf16>, vector<8x8xf32> -> vector<8x8xf32>
    %cst_5 = arith.constant 5.000000e-01 : f32
    %10 = vector.broadcast %cst_5 : f32 to vector<8x8xf32>
    %11 = arith.mulf %9, %10 : vector<8x8xf32>
    %cst_6 = arith.constant dense<0xFF800000> : vector<8xf32>
    %12 = vector.multi_reduction <maximumf>, %11, %cst_6 [1] : vector<8x8xf32> to vector<8xf32>
    %13 = vector.shape_cast %12 : vector<8xf32> to vector<8x1xf32>
    %14 = vector.broadcast %13 : vector<8x1xf32> to vector<8x8xf32>
    %15 = arith.subf %11, %14 : vector<8x8xf32>
    %16 = math.exp %15 : vector<8x8xf32>
    %cst_7 = arith.constant dense<0.000000e+00> : vector<8xf32>
    %17 = vector.multi_reduction <add>, %16, %cst_7 [1] : vector<8x8xf32> to vector<8xf32>
    %18 = vector.shape_cast %17 : vector<8xf32> to vector<8x1xf32>
    %19 = tpu.reciprocal %18 {approx = true} : vector<8x1xf32> -> vector<8x1xf32>
    %20 = vector.broadcast %19 : vector<8x1xf32> to vector<8x8xf32>
    %21 = arith.mulf %16, %20 : vector<8x8xf32>
    %22 = arith.truncf %21 : vector<8x8xf32> to vector<8x8xbf16>
    %cst_8 = arith.constant dense<0.000000e+00> : vector<8x4xf32>
    %23 = tpu.matmul %22, %8, %cst_8 {dimension_numbers = #tpu.dot_dimension_numbers<[1], [0], [0], [1], [0, 0, 1, 1], [], []>} : vector<8x8xbf16>, vector<8x4xbf16>, vector<8x4xf32> -> vector<8x4xf32>
    %24 = vector.extract_strided_slice %3 {offsets = [0, 4], sizes = [8, 4], strides = [1, 1]} : vector<8x32xbf16> to vector<8x4xbf16>
    %25 = vector.extract_strided_slice %4 {offsets = [0, 4], sizes = [8, 4], strides = [1, 1]} : vector<8x32xbf16> to vector<8x4xbf16>
    %26 = vector.extract_strided_slice %5 {offsets = [0, 4], sizes = [8, 4], strides = [1, 1]} : vector<8x32xbf16> to vector<8x4xbf16>
    %cst_9 = arith.constant dense<0.000000e+00> : vector<8x8xf32>
    %27 = tpu.matmul %24, %25, %cst_9 {dimension_numbers = #tpu.dot_dimension_numbers<[1], [1], [0], [0], [0, 0, 1, 0], [], []>} : vector<8x4xbf16>, vector<8x4xbf16>, vector<8x8xf32> -> vector<8x8xf32>
    %cst_10 = arith.constant 5.000000e-01 : f32
    %28 = vector.broadcast %cst_10 : f32 to vector<8x8xf32>
    %29 = arith.mulf %27, %28 : vector<8x8xf32>
    %cst_11 = arith.constant dense<0xFF800000> : vector<8xf32>
    %30 = vector.multi_reduction <maximumf>, %29, %cst_11 [1] : vector<8x8xf32> to vector<8xf32>
    %31 = vector.shape_cast %30 : vector<8xf32> to vector<8x1xf32>
    %32 = vector.broadcast %31 : vector<8x1xf32> to vector<8x8xf32>
    %33 = arith.subf %29, %32 : vector<8x8xf32>
    %34 = math.exp %33 : vector<8x8xf32>
    %cst_12 = arith.constant dense<0.000000e+00> : vector<8xf32>
    %35 = vector.multi_reduction <add>, %34, %cst_12 [1] : vector<8x8xf32> to vector<8xf32>
    %36 = vector.shape_cast %35 : vector<8xf32> to vector<8x1xf32>
    %37 = tpu.reciprocal %36 {approx = true} : vector<8x1xf32> -> vector<8x1xf32>
    %38 = vector.broadcast %37 : vector<8x1xf32> to vector<8x8xf32>
    %39 = arith.mulf %34, %38 : vector<8x8xf32>
    %40 = arith.truncf %39 : vector<8x8xf32> to vector<8x8xbf16>
    %cst_13 = arith.constant dense<0.000000e+00> : vector<8x4xf32>
    %41 = tpu.matmul %40, %26, %cst_13 {dimension_numbers = #tpu.dot_dimension_numbers<[1], [0], [0], [1], [0, 0, 1, 1], [], []>} : vector<8x8xbf16>, vector<8x4xbf16>, vector<8x4xf32> -> vector<8x4xf32>
    %42 = vector.extract_strided_slice %3 {offsets = [0, 8], sizes = [8, 4], strides = [1, 1]} : vector<8x32xbf16> to vector<8x4xbf16>
    %43 = vector.extract_strided_slice %4 {offsets = [0, 8], sizes = [8, 4], strides = [1, 1]} : vector<8x32xbf16> to vector<8x4xbf16>
    %44 = vector.extract_strided_slice %5 {offsets = [0, 8], sizes = [8, 4], strides = [1, 1]} : vector<8x32xbf16> to vector<8x4xbf16>
    %cst_14 = arith.constant dense<0.000000e+00> : vector<8x8xf32>
    %45 = tpu.matmul %42, %43, %cst_14 {dimension_numbers = #tpu.dot_dimension_numbers<[1], [1], [0], [0], [0, 0, 1, 0], [], []>} : vector<8x4xbf16>, vector<8x4xbf16>, vector<8x8xf32> -> vector<8x8xf32>
    %cst_15 = arith.constant 5.000000e-01 : f32
    %46 = vector.broadcast %cst_15 : f32 to vector<8x8xf32>
    %47 = arith.mulf %45, %46 : vector<8x8xf32>
    %cst_16 = arith.constant dense<0xFF800000> : vector<8xf32>
    %48 = vector.multi_reduction <maximumf>, %47, %cst_16 [1] : vector<8x8xf32> to vector<8xf32>
    %49 = vector.shape_cast %48 : vector<8xf32> to vector<8x1xf32>
    %50 = vector.broadcast %49 : vector<8x1xf32> to vector<8x8xf32>
    %51 = arith.subf %47, %50 : vector<8x8xf32>
    %52 = math.exp %51 : vector<8x8xf32>
    %cst_17 = arith.constant dense<0.000000e+00> : vector<8xf32>
    %53 = vector.multi_reduction <add>, %52, %cst_17 [1] : vector<8x8xf32> to vector<8xf32>
    %54 = vector.shape_cast %53 : vector<8xf32> to vector<8x1xf32>
    %55 = tpu.reciprocal %54 {approx = true} : vector<8x1xf32> -> vector<8x1xf32>
    %56 = vector.broadcast %55 : vector<8x1xf32> to vector<8x8xf32>
    %57 = arith.mulf %52, %56 : vector<8x8xf32>
    %58 = arith.truncf %57 : vector<8x8xf32> to vector<8x8xbf16>
    %cst_18 = arith.constant dense<0.000000e+00> : vector<8x4xf32>
    %59 = tpu.matmul %58, %44, %cst_18 {dimension_numbers = #tpu.dot_dimension_numbers<[1], [0], [0], [1], [0, 0, 1, 1], [], []>} : vector<8x8xbf16>, vector<8x4xbf16>, vector<8x4xf32> -> vector<8x4xf32>
    %60 = vector.extract_strided_slice %3 {offsets = [0, 12], sizes = [8, 4], strides = [1, 1]} : vector<8x32xbf16> to vector<8x4xbf16>
    %61 = vector.extract_strided_slice %4 {offsets = [0, 12], sizes = [8, 4], strides = [1, 1]} : vector<8x32xbf16> to vector<8x4xbf16>
    %62 = vector.extract_strided_slice %5 {offsets = [0, 12], sizes = [8, 4], strides = [1, 1]} : vector<8x32xbf16> to vector<8x4xbf16>
    %cst_19 = arith.constant dense<0.000000e+00> : vector<8x8xf32>
    %63 = tpu.matmul %60, %61, %cst_19 {dimension_numbers = #tpu.dot_dimension_numbers<[1], [1], [0], [0], [0, 0, 1, 0], [], []>} : vector<8x4xbf16>, vector<8x4xbf16>, vector<8x8xf32> -> vector<8x8xf32>
    %cst_20 = arith.constant 5.000000e-01 : f32
    %64 = vector.broadcast %cst_20 : f32 to vector<8x8xf32>
    %65 = arith.mulf %63, %64 : vector<8x8xf32>
    %cst_21 = arith.constant dense<0xFF800000> : vector<8xf32>
    %66 = vector.multi_reduction <maximumf>, %65, %cst_21 [1] : vector<8x8xf32> to vector<8xf32>
    %67 = vector.shape_cast %66 : vector<8xf32> to vector<8x1xf32>
    %68 = vector.broadcast %67 : vector<8x1xf32> to vector<8x8xf32>
    %69 = arith.subf %65, %68 : vector<8x8xf32>
    %70 = math.exp %69 : vector<8x8xf32>
    %cst_22 = arith.constant dense<0.000000e+00> : vector<8xf32>
    %71 = vector.multi_reduction <add>, %70, %cst_22 [1] : vector<8x8xf32> to vector<8xf32>
    %72 = vector.shape_cast %71 : vector<8xf32> to vector<8x1xf32>
    %73 = tpu.reciprocal %72 {approx = true} : vector<8x1xf32> -> vector<8x1xf32>
    %74 = vector.broadcast %73 : vector<8x1xf32> to vector<8x8xf32>
    %75 = arith.mulf %70, %74 : vector<8x8xf32>
    %76 = arith.truncf %75 : vector<8x8xf32> to vector<8x8xbf16>
    %cst_23 = arith.constant dense<0.000000e+00> : vector<8x4xf32>
    %77 = tpu.matmul %76, %62, %cst_23 {dimension_numbers = #tpu.dot_dimension_numbers<[1], [0], [0], [1], [0, 0, 1, 1], [], []>} : vector<8x8xbf16>, vector<8x4xbf16>, vector<8x4xf32> -> vector<8x4xf32>
    %78 = vector.extract_strided_slice %3 {offsets = [0, 16], sizes = [8, 4], strides = [1, 1]} : vector<8x32xbf16> to vector<8x4xbf16>
    %79 = vector.extract_strided_slice %4 {offsets = [0, 16], sizes = [8, 4], strides = [1, 1]} : vector<8x32xbf16> to vector<8x4xbf16>
    %80 = vector.extract_strided_slice %5 {offsets = [0, 16], sizes = [8, 4], strides = [1, 1]} : vector<8x32xbf16> to vector<8x4xbf16>
    %cst_24 = arith.constant dense<0.000000e+00> : vector<8x8xf32>
    %81 = tpu.matmul %78, %79, %cst_24 {dimension_numbers = #tpu.dot_dimension_numbers<[1], [1], [0], [0], [0, 0, 1, 0], [], []>} : vector<8x4xbf16>, vector<8x4xbf16>, vector<8x8xf32> -> vector<8x8xf32>
    %cst_25 = arith.constant 5.000000e-01 : f32
    %82 = vector.broadcast %cst_25 : f32 to vector<8x8xf32>
    %83 = arith.mulf %81, %82 : vector<8x8xf32>
    %cst_26 = arith.constant dense<0xFF800000> : vector<8xf32>
    %84 = vector.multi_reduction <maximumf>, %83, %cst_26 [1] : vector<8x8xf32> to vector<8xf32>
    %85 = vector.shape_cast %84 : vector<8xf32> to vector<8x1xf32>
    %86 = vector.broadcast %85 : vector<8x1xf32> to vector<8x8xf32>
    %87 = arith.subf %83, %86 : vector<8x8xf32>
    %88 = math.exp %87 : vector<8x8xf32>
    %cst_27 = arith.constant dense<0.000000e+00> : vector<8xf32>
    %89 = vector.multi_reduction <add>, %88, %cst_27 [1] : vector<8x8xf32> to vector<8xf32>
    %90 = vector.shape_cast %89 : vector<8xf32> to vector<8x1xf32>
    %91 = tpu.reciprocal %90 {approx = true} : vector<8x1xf32> -> vector<8x1xf32>
    %92 = vector.broadcast %91 : vector<8x1xf32> to vector<8x8xf32>
    %93 = arith.mulf %88, %92 : vector<8x8xf32>
    %94 = arith.truncf %93 : vector<8x8xf32> to vector<8x8xbf16>
    %cst_28 = arith.constant dense<0.000000e+00> : vector<8x4xf32>
    %95 = tpu.matmul %94, %80, %cst_28 {dimension_numbers = #tpu.dot_dimension_numbers<[1], [0], [0], [1], [0, 0, 1, 1], [], []>} : vector<8x8xbf16>, vector<8x4xbf16>, vector<8x4xf32> -> vector<8x4xf32>
    %96 = vector.extract_strided_slice %3 {offsets = [0, 20], sizes = [8, 4], strides = [1, 1]} : vector<8x32xbf16> to vector<8x4xbf16>
    %97 = vector.extract_strided_slice %4 {offsets = [0, 20], sizes = [8, 4], strides = [1, 1]} : vector<8x32xbf16> to vector<8x4xbf16>
    %98 = vector.extract_strided_slice %5 {offsets = [0, 20], sizes = [8, 4], strides = [1, 1]} : vector<8x32xbf16> to vector<8x4xbf16>
    %cst_29 = arith.constant dense<0.000000e+00> : vector<8x8xf32>
    %99 = tpu.matmul %96, %97, %cst_29 {dimension_numbers = #tpu.dot_dimension_numbers<[1], [1], [0], [0], [0, 0, 1, 0], [], []>} : vector<8x4xbf16>, vector<8x4xbf16>, vector<8x8xf32> -> vector<8x8xf32>
    %cst_30 = arith.constant 5.000000e-01 : f32
    %100 = vector.broadcast %cst_30 : f32 to vector<8x8xf32>
    %101 = arith.mulf %99, %100 : vector<8x8xf32>
    %cst_31 = arith.constant dense<0xFF800000> : vector<8xf32>
    %102 = vector.multi_reduction <maximumf>, %101, %cst_31 [1] : vector<8x8xf32> to vector<8xf32>
    %103 = vector.shape_cast %102 : vector<8xf32> to vector<8x1xf32>
    %104 = vector.broadcast %103 : vector<8x1xf32> to vector<8x8xf32>
    %105 = arith.subf %101, %104 : vector<8x8xf32>
    %106 = math.exp %105 : vector<8x8xf32>
    %cst_32 = arith.constant dense<0.000000e+00> : vector<8xf32>
    %107 = vector.multi_reduction <add>, %106, %cst_32 [1] : vector<8x8xf32> to vector<8xf32>
    %108 = vector.shape_cast %107 : vector<8xf32> to vector<8x1xf32>
    %109 = tpu.reciprocal %108 {approx = true} : vector<8x1xf32> -> vector<8x1xf32>
    %110 = vector.broadcast %109 : vector<8x1xf32> to vector<8x8xf32>
    %111 = arith.mulf %106, %110 : vector<8x8xf32>
    %112 = arith.truncf %111 : vector<8x8xf32> to vector<8x8xbf16>
    %cst_33 = arith.constant dense<0.000000e+00> : vector<8x4xf32>
    %113 = tpu.matmul %112, %98, %cst_33 {dimension_numbers = #tpu.dot_dimension_numbers<[1], [0], [0], [1], [0, 0, 1, 1], [], []>} : vector<8x8xbf16>, vector<8x4xbf16>, vector<8x4xf32> -> vector<8x4xf32>
    %114 = vector.extract_strided_slice %3 {offsets = [0, 24], sizes = [8, 4], strides = [1, 1]} : vector<8x32xbf16> to vector<8x4xbf16>
    %115 = vector.extract_strided_slice %4 {offsets = [0, 24], sizes = [8, 4], strides = [1, 1]} : vector<8x32xbf16> to vector<8x4xbf16>
    %116 = vector.extract_strided_slice %5 {offsets = [0, 24], sizes = [8, 4], strides = [1, 1]} : vector<8x32xbf16> to vector<8x4xbf16>
    %cst_34 = arith.constant dense<0.000000e+00> : vector<8x8xf32>
    %117 = tpu.matmul %114, %115, %cst_34 {dimension_numbers = #tpu.dot_dimension_numbers<[1], [1], [0], [0], [0, 0, 1, 0], [], []>} : vector<8x4xbf16>, vector<8x4xbf16>, vector<8x8xf32> -> vector<8x8xf32>
    %cst_35 = arith.constant 5.000000e-01 : f32
    %118 = vector.broadcast %cst_35 : f32 to vector<8x8xf32>
    %119 = arith.mulf %117, %118 : vector<8x8xf32>
    %cst_36 = arith.constant dense<0xFF800000> : vector<8xf32>
    %120 = vector.multi_reduction <maximumf>, %119, %cst_36 [1] : vector<8x8xf32> to vector<8xf32>
    %121 = vector.shape_cast %120 : vector<8xf32> to vector<8x1xf32>
    %122 = vector.broadcast %121 : vector<8x1xf32> to vector<8x8xf32>
    %123 = arith.subf %119, %122 : vector<8x8xf32>
    %124 = math.exp %123 : vector<8x8xf32>
    %cst_37 = arith.constant dense<0.000000e+00> : vector<8xf32>
    %125 = vector.multi_reduction <add>, %124, %cst_37 [1] : vector<8x8xf32> to vector<8xf32>
    %126 = vector.shape_cast %125 : vector<8xf32> to vector<8x1xf32>
    %127 = tpu.reciprocal %126 {approx = true} : vector<8x1xf32> -> vector<8x1xf32>
    %128 = vector.broadcast %127 : vector<8x1xf32> to vector<8x8xf32>
    %129 = arith.mulf %124, %128 : vector<8x8xf32>
    %130 = arith.truncf %129 : vector<8x8xf32> to vector<8x8xbf16>
    %cst_38 = arith.constant dense<0.000000e+00> : vector<8x4xf32>
    %131 = tpu.matmul %130, %116, %cst_38 {dimension_numbers = #tpu.dot_dimension_numbers<[1], [0], [0], [1], [0, 0, 1, 1], [], []>} : vector<8x8xbf16>, vector<8x4xbf16>, vector<8x4xf32> -> vector<8x4xf32>
    %132 = vector.extract_strided_slice %3 {offsets = [0, 28], sizes = [8, 4], strides = [1, 1]} : vector<8x32xbf16> to vector<8x4xbf16>
    %133 = vector.extract_strided_slice %4 {offsets = [0, 28], sizes = [8, 4], strides = [1, 1]} : vector<8x32xbf16> to vector<8x4xbf16>
    %134 = vector.extract_strided_slice %5 {offsets = [0, 28], sizes = [8, 4], strides = [1, 1]} : vector<8x32xbf16> to vector<8x4xbf16>
    %cst_39 = arith.constant dense<0.000000e+00> : vector<8x8xf32>
    %135 = tpu.matmul %132, %133, %cst_39 {dimension_numbers = #tpu.dot_dimension_numbers<[1], [1], [0], [0], [0, 0, 1, 0], [], []>} : vector<8x4xbf16>, vector<8x4xbf16>, vector<8x8xf32> -> vector<8x8xf32>
    %cst_40 = arith.constant 5.000000e-01 : f32
    %136 = vector.broadcast %cst_40 : f32 to vector<8x8xf32>
    %137 = arith.mulf %135, %136 : vector<8x8xf32>
    %cst_41 = arith.constant dense<0xFF800000> : vector<8xf32>
    %138 = vector.multi_reduction <maximumf>, %137, %cst_41 [1] : vector<8x8xf32> to vector<8xf32>
    %139 = vector.shape_cast %138 : vector<8xf32> to vector<8x1xf32>
    %140 = vector.broadcast %139 : vector<8x1xf32> to vector<8x8xf32>
    %141 = arith.subf %137, %140 : vector<8x8xf32>
    %142 = math.exp %141 : vector<8x8xf32>
    %cst_42 = arith.constant dense<0.000000e+00> : vector<8xf32>
    %143 = vector.multi_reduction <add>, %142, %cst_42 [1] : vector<8x8xf32> to vector<8xf32>
    %144 = vector.shape_cast %143 : vector<8xf32> to vector<8x1xf32>
    %145 = tpu.reciprocal %144 {approx = true} : vector<8x1xf32> -> vector<8x1xf32>
    %146 = vector.broadcast %145 : vector<8x1xf32> to vector<8x8xf32>
    %147 = arith.mulf %142, %146 : vector<8x8xf32>
    %148 = arith.truncf %147 : vector<8x8xf32> to vector<8x8xbf16>
    %cst_43 = arith.constant dense<0.000000e+00> : vector<8x4xf32>
    %149 = tpu.matmul %148, %134, %cst_43 {dimension_numbers = #tpu.dot_dimension_numbers<[1], [0], [0], [1], [0, 0, 1, 1], [], []>} : vector<8x8xbf16>, vector<8x4xbf16>, vector<8x4xf32> -> vector<8x4xf32>
    %150 = tpu.concatenate %23, %41, %59, %77, %95, %113, %131, %149 in 1 : vector<8x4xf32>, vector<8x4xf32>, vector<8x4xf32>, vector<8x4xf32>, vector<8x4xf32>, vector<8x4xf32>, vector<8x4xf32>, vector<8x4xf32> -> vector<8x32xf32>
    %151 = arith.truncf %150 : vector<8x32xf32> to vector<8x32xbf16>
    %c0_44 = arith.constant 0 : index
    %c0_45 = arith.constant 0 : index
    %c0_46 = arith.constant 0 : index
    %152 = vector.load %arg3[%c0_44, %c0_45, %c0_46] : memref<1x8x32xbf16, #tpu.memory_space<vmem>>, vector<1x8x32xbf16>
    %153 = vector.shape_cast %152 : vector<1x8x32xbf16> to vector<8x32xbf16>
    %154 = vector.shape_cast %151 : vector<8x32xbf16> to vector<1x8x32xbf16>
    tpu.vector_store %arg3[%c0_44, %c0_45, %c0_46], %154 {strides = array<i32>} : memref<1x8x32xbf16, #tpu.memory_space<vmem>>, vector<1x8x32xbf16>,
    return
  }
  func.func @transform_0(%arg0: i32) -> (i32, i32, i32) {
    %c0_i32 = arith.constant 0 : i32
    %c0_i32_0 = arith.constant 0 : i32
    %c0_i32_1 = arith.constant 0 : i32
    return %arg0, %c0_i32, %c0_i32_0 : i32, i32, i32
  }
  func.func @transform_1(%arg0: i32) -> (i32, i32, i32) {
    %c0_i32 = arith.constant 0 : i32
    %c0_i32_0 = arith.constant 0 : i32
    %c0_i32_1 = arith.constant 0 : i32
    return %arg0, %c0_i32, %c0_i32_0 : i32, i32, i32
  }
  func.func @transform_2(%arg0: i32) -> (i32, i32, i32) {
    %c0_i32 = arith.constant 0 : i32
    %c0_i32_0 = arith.constant 0 : i32
    %c0_i32_1 = arith.constant 0 : i32
    return %arg0, %c0_i32, %c0_i32_0 : i32, i32, i32
  }
}

module attributes {stable_mosaic.version = 11 : i64} {
  func.func @_matmul_bias_softmax_kernel(%arg0: i32, %arg1: i32, %arg2: memref<16x32xbf16, #tpu.memory_space<vmem>>, %arg3: memref<32x16xbf16, #tpu.memory_space<vmem>>, %arg4: memref<1x16xf32, #tpu.memory_space<vmem>>, %arg5: memref<16x16xf32, #tpu.memory_space<vmem>>, %arg6: memref<16x16xf32, #tpu.memory_space<vmem>>) attributes {dimension_semantics = [#tpu.dimension_semantics<parallel>, #tpu.dimension_semantics<arbitrary>], iteration_bounds = array<i64: 1, 1>, scalar_prefetch = 0 : i64, scratch_operands = 1 : i64, tpu.core_type = #tpu.core_type<tc>, window_params = [{transform_indices = @transform_0, window_bounds = array<i64: 16, 32>}, {transform_indices = @transform_1, window_bounds = array<i64: 32, 16>}, {pipeline_mode = #tpu.pipeline_mode<synchronous>, transform_indices = @transform_2, window_bounds = array<i64: 1, 16>}, {transform_indices = @transform_3, window_bounds = array<i64: 16, 16>}]} {
    %c0_i32 = arith.constant 0 : i32
    %0 = arith.cmpi eq, %arg1, %c0_i32 : i32
    %1 = arith.extui %0 : i1 to i32
    %c0_i32_0 = arith.constant 0 : i32
    %2 = arith.cmpi ne, %1, %c0_i32_0 : i32
    scf.if %2 {
      %cst_10 = arith.constant 0.000000e+00 : f32
      %12 = vector.broadcast %cst_10 : f32 to vector<16x16xf32>
      %c0_11 = arith.constant 0 : index
      %c0_12 = arith.constant 0 : index
      %13 = vector.load %arg6[%c0_11, %c0_12] : memref<16x16xf32, #tpu.memory_space<vmem>>, vector<16x16xf32>
      tpu.vector_store %arg6[%c0_11, %c0_12], %12 {strides = array<i32>} : memref<16x16xf32, #tpu.memory_space<vmem>>, vector<16x16xf32>,
    } else {
    }
    %c0 = arith.constant 0 : index
    %c0_1 = arith.constant 0 : index
    %3 = vector.load %arg6[%c0, %c0_1] : memref<16x16xf32, #tpu.memory_space<vmem>>, vector<16x16xf32>
    %c0_2 = arith.constant 0 : index
    %c0_3 = arith.constant 0 : index
    %4 = vector.load %arg2[%c0_2, %c0_3] : memref<16x32xbf16, #tpu.memory_space<vmem>>, vector<16x32xbf16>
    %c0_4 = arith.constant 0 : index
    %c0_5 = arith.constant 0 : index
    %5 = vector.load %arg3[%c0_4, %c0_5] : memref<32x16xbf16, #tpu.memory_space<vmem>>, vector<32x16xbf16>
    %cst = arith.constant dense<0.000000e+00> : vector<16x16xf32>
    %6 = tpu.matmul %4, %5, %cst {dimension_numbers = #tpu.dot_dimension_numbers<[1], [0], [0], [1], [0, 0, 1, 1], [], []>} : vector<16x32xbf16>, vector<32x16xbf16>, vector<16x16xf32> -> vector<16x16xf32>
    %7 = arith.addf %3, %6 : vector<16x16xf32>
    %c0_6 = arith.constant 0 : index
    %c0_7 = arith.constant 0 : index
    %8 = vector.load %arg6[%c0_6, %c0_7] : memref<16x16xf32, #tpu.memory_space<vmem>>, vector<16x16xf32>
    tpu.vector_store %arg6[%c0_6, %c0_7], %7 {strides = array<i32>} : memref<16x16xf32, #tpu.memory_space<vmem>>, vector<16x16xf32>,
    %c0_i32_8 = arith.constant 0 : i32
    %9 = arith.cmpi eq, %arg1, %c0_i32_8 : i32
    %10 = arith.extui %9 : i1 to i32
    %c0_i32_9 = arith.constant 0 : i32
    %11 = arith.cmpi ne, %10, %c0_i32_9 : i32
    scf.if %11 {
      %c0_10 = arith.constant 0 : index
      %c0_11 = arith.constant 0 : index
      %12 = vector.load %arg6[%c0_10, %c0_11] : memref<16x16xf32, #tpu.memory_space<vmem>>, vector<16x16xf32>
      %c0_12 = arith.constant 0 : index
      %c0_13 = arith.constant 0 : index
      %13 = vector.load %arg4[%c0_12, %c0_13] : memref<1x16xf32, #tpu.memory_space<vmem>>, vector<1x16xf32>
      %14 = vector.broadcast %13 : vector<1x16xf32> to vector<16x16xf32>
      %15 = arith.addf %12, %14 : vector<16x16xf32>
      %cst_14 = arith.constant dense<0xFF800000> : vector<16xf32>
      %16 = vector.multi_reduction <maximumf>, %15, %cst_14 [1] : vector<16x16xf32> to vector<16xf32>
      %17 = vector.shape_cast %16 : vector<16xf32> to vector<16x1xf32>
      %18 = vector.broadcast %17 : vector<16x1xf32> to vector<16x16xf32>
      %19 = arith.subf %15, %18 : vector<16x16xf32>
      %20 = math.exp %19 : vector<16x16xf32>
      %cst_15 = arith.constant dense<0.000000e+00> : vector<16xf32>
      %21 = vector.multi_reduction <add>, %20, %cst_15 [1] : vector<16x16xf32> to vector<16xf32>
      %22 = vector.shape_cast %21 : vector<16xf32> to vector<16x1xf32>
      %23 = tpu.reciprocal %22 : vector<16x1xf32> -> vector<16x1xf32>
      %24 = vector.broadcast %23 : vector<16x1xf32> to vector<16x16xf32>
      %25 = arith.mulf %20, %24 : vector<16x16xf32>
      %c0_16 = arith.constant 0 : index
      %c0_17 = arith.constant 0 : index
      %26 = vector.load %arg5[%c0_16, %c0_17] : memref<16x16xf32, #tpu.memory_space<vmem>>, vector<16x16xf32>
      tpu.vector_store %arg5[%c0_16, %c0_17], %25 {strides = array<i32>} : memref<16x16xf32, #tpu.memory_space<vmem>>, vector<16x16xf32>,
    } else {
    }
    return
  }
  func.func @transform_0(%arg0: i32, %arg1: i32) -> (i32, i32) {
    %c0_i32 = arith.constant 0 : i32
    return %arg0, %arg1 : i32, i32
  }
  func.func @transform_1(%arg0: i32, %arg1: i32) -> (i32, i32) {
    %c0_i32 = arith.constant 0 : i32
    %c0_i32_0 = arith.constant 0 : i32
    return %arg1, %c0_i32 : i32, i32
  }
  func.func @transform_2(%arg0: i32, %arg1: i32) -> (i32, i32) {
    %c0_i32 = arith.constant 0 : i32
    %c0_i32_0 = arith.constant 0 : i32
    %c0_i32_1 = arith.constant 0 : i32
    return %c0_i32, %c0_i32_0 : i32, i32
  }
  func.func @transform_3(%arg0: i32, %arg1: i32) -> (i32, i32) {
    %c0_i32 = arith.constant 0 : i32
    %c0_i32_0 = arith.constant 0 : i32
    return %arg0, %c0_i32 : i32, i32
  }
}

module attributes {stable_mosaic.version = 11 : i64} {
  func.func @_matmul_add_ln_kernel(%arg0: i32, %arg1: i32, %arg2: memref<16x128xbf16, #tpu.memory_space<vmem>>, %arg3: memref<128x32xbf16, #tpu.memory_space<vmem>>, %arg4: memref<1x32xf32, #tpu.memory_space<vmem>>, %arg5: memref<16x32xbf16, #tpu.memory_space<vmem>>, %arg6: memref<1x32xf32, #tpu.memory_space<vmem>>, %arg7: memref<1x32xf32, #tpu.memory_space<vmem>>, %arg8: memref<16x32xbf16, #tpu.memory_space<vmem>>, %arg9: memref<16x32xf32, #tpu.memory_space<vmem>>) attributes {dimension_semantics = [#tpu.dimension_semantics<parallel>, #tpu.dimension_semantics<arbitrary>], iteration_bounds = array<i64: 1, 1>, scalar_prefetch = 0 : i64, scratch_operands = 1 : i64, tpu.core_type = #tpu.core_type<tc>, window_params = [{transform_indices = @transform_0, window_bounds = array<i64: 16, 128>}, {transform_indices = @transform_1, window_bounds = array<i64: 128, 32>}, {pipeline_mode = #tpu.pipeline_mode<synchronous>, transform_indices = @transform_2, window_bounds = array<i64: 1, 32>}, {transform_indices = @transform_3, window_bounds = array<i64: 16, 32>}, {pipeline_mode = #tpu.pipeline_mode<synchronous>, transform_indices = @transform_4, window_bounds = array<i64: 1, 32>}, {pipeline_mode = #tpu.pipeline_mode<synchronous>, transform_indices = @transform_5, window_bounds = array<i64: 1, 32>}, {transform_indices = @transform_6, window_bounds = array<i64: 16, 32>}]} {
    %c0_i32 = arith.constant 0 : i32
    %0 = arith.cmpi eq, %arg1, %c0_i32 : i32
    %1 = arith.extui %0 : i1 to i32
    %c0_i32_0 = arith.constant 0 : i32
    %2 = arith.cmpi ne, %1, %c0_i32_0 : i32
    scf.if %2 {
      %cst_10 = arith.constant 0.000000e+00 : f32
      %12 = vector.broadcast %cst_10 : f32 to vector<16x32xf32>
      %c0_11 = arith.constant 0 : index
      %c0_12 = arith.constant 0 : index
      %13 = vector.load %arg9[%c0_11, %c0_12] : memref<16x32xf32, #tpu.memory_space<vmem>>, vector<16x32xf32>
      tpu.vector_store %arg9[%c0_11, %c0_12], %12 {strides = array<i32>} : memref<16x32xf32, #tpu.memory_space<vmem>>, vector<16x32xf32>,
    } else {
    }
    %c0 = arith.constant 0 : index
    %c0_1 = arith.constant 0 : index
    %3 = vector.load %arg9[%c0, %c0_1] : memref<16x32xf32, #tpu.memory_space<vmem>>, vector<16x32xf32>
    %c0_2 = arith.constant 0 : index
    %c0_3 = arith.constant 0 : index
    %4 = vector.load %arg2[%c0_2, %c0_3] : memref<16x128xbf16, #tpu.memory_space<vmem>>, vector<16x128xbf16>
    %c0_4 = arith.constant 0 : index
    %c0_5 = arith.constant 0 : index
    %5 = vector.load %arg3[%c0_4, %c0_5] : memref<128x32xbf16, #tpu.memory_space<vmem>>, vector<128x32xbf16>
    %cst = arith.constant dense<0.000000e+00> : vector<16x32xf32>
    %6 = tpu.matmul %4, %5, %cst {dimension_numbers = #tpu.dot_dimension_numbers<[1], [0], [0], [1], [0, 0, 1, 1], [], []>} : vector<16x128xbf16>, vector<128x32xbf16>, vector<16x32xf32> -> vector<16x32xf32>
    %7 = arith.addf %3, %6 : vector<16x32xf32>
    %c0_6 = arith.constant 0 : index
    %c0_7 = arith.constant 0 : index
    %8 = vector.load %arg9[%c0_6, %c0_7] : memref<16x32xf32, #tpu.memory_space<vmem>>, vector<16x32xf32>
    tpu.vector_store %arg9[%c0_6, %c0_7], %7 {strides = array<i32>} : memref<16x32xf32, #tpu.memory_space<vmem>>, vector<16x32xf32>,
    %c0_i32_8 = arith.constant 0 : i32
    %9 = arith.cmpi eq, %arg1, %c0_i32_8 : i32
    %10 = arith.extui %9 : i1 to i32
    %c0_i32_9 = arith.constant 0 : i32
    %11 = arith.cmpi ne, %10, %c0_i32_9 : i32
    scf.if %11 {
      %c0_10 = arith.constant 0 : index
      %c0_11 = arith.constant 0 : index
      %12 = vector.load %arg9[%c0_10, %c0_11] : memref<16x32xf32, #tpu.memory_space<vmem>>, vector<16x32xf32>
      %c0_12 = arith.constant 0 : index
      %c0_13 = arith.constant 0 : index
      %13 = vector.load %arg4[%c0_12, %c0_13] : memref<1x32xf32, #tpu.memory_space<vmem>>, vector<1x32xf32>
      %14 = vector.broadcast %13 : vector<1x32xf32> to vector<16x32xf32>
      %15 = arith.addf %12, %14 : vector<16x32xf32>
      %c0_14 = arith.constant 0 : index
      %c0_15 = arith.constant 0 : index
      %16 = vector.load %arg5[%c0_14, %c0_15] : memref<16x32xbf16, #tpu.memory_space<vmem>>, vector<16x32xbf16>
      %17 = arith.extf %16 : vector<16x32xbf16> to vector<16x32xf32>
      %18 = arith.addf %15, %17 : vector<16x32xf32>
      %cst_16 = arith.constant dense<0.000000e+00> : vector<16xf32>
      %19 = vector.multi_reduction <add>, %18, %cst_16 [1] : vector<16x32xf32> to vector<16xf32>
      %20 = vector.shape_cast %19 : vector<16xf32> to vector<16x1xf32>
      %cst_17 = arith.constant 3.200000e+01 : f32
      %21 = vector.broadcast %cst_17 : f32 to vector<16x1xf32>
      %22 = arith.divf %20, %21 : vector<16x1xf32>
      %23 = vector.broadcast %22 : vector<16x1xf32> to vector<16x32xf32>
      %24 = arith.subf %18, %23 : vector<16x32xf32>
      %25 = arith.mulf %24, %24 : vector<16x32xf32>
      %cst_18 = arith.constant dense<0.000000e+00> : vector<16xf32>
      %26 = vector.multi_reduction <add>, %25, %cst_18 [1] : vector<16x32xf32> to vector<16xf32>
      %27 = vector.shape_cast %26 : vector<16xf32> to vector<16x1xf32>
      %cst_19 = arith.constant 3.200000e+01 : f32
      %28 = vector.broadcast %cst_19 : f32 to vector<16x1xf32>
      %29 = arith.divf %27, %28 : vector<16x1xf32>
      %30 = vector.broadcast %22 : vector<16x1xf32> to vector<16x32xf32>
      %31 = arith.subf %18, %30 : vector<16x32xf32>
      %cst_20 = arith.constant 9.99999974E-6 : f32
      %32 = vector.broadcast %cst_20 : f32 to vector<16x1xf32>
      %33 = arith.addf %29, %32 : vector<16x1xf32>
      %34 = math.rsqrt %33 : vector<16x1xf32>
      %35 = vector.broadcast %34 : vector<16x1xf32> to vector<16x32xf32>
      %36 = arith.mulf %31, %35 : vector<16x32xf32>
      %c0_21 = arith.constant 0 : index
      %c0_22 = arith.constant 0 : index
      %37 = vector.load %arg6[%c0_21, %c0_22] : memref<1x32xf32, #tpu.memory_space<vmem>>, vector<1x32xf32>
      %38 = vector.broadcast %37 : vector<1x32xf32> to vector<16x32xf32>
      %39 = arith.mulf %36, %38 : vector<16x32xf32>
      %c0_23 = arith.constant 0 : index
      %c0_24 = arith.constant 0 : index
      %40 = vector.load %arg7[%c0_23, %c0_24] : memref<1x32xf32, #tpu.memory_space<vmem>>, vector<1x32xf32>
      %41 = vector.broadcast %40 : vector<1x32xf32> to vector<16x32xf32>
      %42 = arith.addf %39, %41 : vector<16x32xf32>
      %43 = arith.truncf %42 : vector<16x32xf32> to vector<16x32xbf16>
      %c0_25 = arith.constant 0 : index
      %c0_26 = arith.constant 0 : index
      %44 = vector.load %arg8[%c0_25, %c0_26] : memref<16x32xbf16, #tpu.memory_space<vmem>>, vector<16x32xbf16>
      tpu.vector_store %arg8[%c0_25, %c0_26], %43 {strides = array<i32>} : memref<16x32xbf16, #tpu.memory_space<vmem>>, vector<16x32xbf16>,
    } else {
    }
    return
  }
  func.func @transform_0(%arg0: i32, %arg1: i32) -> (i32, i32) {
    %c0_i32 = arith.constant 0 : i32
    return %arg0, %arg1 : i32, i32
  }
  func.func @transform_1(%arg0: i32, %arg1: i32) -> (i32, i32) {
    %c0_i32 = arith.constant 0 : i32
    %c0_i32_0 = arith.constant 0 : i32
    return %arg1, %c0_i32 : i32, i32
  }
  func.func @transform_2(%arg0: i32, %arg1: i32) -> (i32, i32) {
    %c0_i32 = arith.constant 0 : i32
    %c0_i32_0 = arith.constant 0 : i32
    %c0_i32_1 = arith.constant 0 : i32
    return %c0_i32, %c0_i32_0 : i32, i32
  }
  func.func @transform_3(%arg0: i32, %arg1: i32) -> (i32, i32) {
    %c0_i32 = arith.constant 0 : i32
    %c0_i32_0 = arith.constant 0 : i32
    return %arg0, %c0_i32 : i32, i32
  }
  func.func @transform_4(%arg0: i32, %arg1: i32) -> (i32, i32) {
    %c0_i32 = arith.constant 0 : i32
    %c0_i32_0 = arith.constant 0 : i32
    %c0_i32_1 = arith.constant 0 : i32
    return %c0_i32, %c0_i32_0 : i32, i32
  }
  func.func @transform_5(%arg0: i32, %arg1: i32) -> (i32, i32) {
    %c0_i32 = arith.constant 0 : i32
    %c0_i32_0 = arith.constant 0 : i32
    %c0_i32_1 = arith.constant 0 : i32
    return %c0_i32, %c0_i32_0 : i32, i32
  }
  func.func @transform_6(%arg0: i32, %arg1: i32) -> (i32, i32) {
    %c0_i32 = arith.constant 0 : i32
    %c0_i32_0 = arith.constant 0 : i32
    return %arg0, %c0_i32 : i32, i32
  }
}

</mosaic_0001>

<bundles_post_ra>
// kernel: transformer_decoder.21
= control target key start
LH: loop header
LB: loop body
LE: loop exit
PB: predicated region body
PF: predicated region fallthrough
CT: control target
= control target key end

     0   :  { %vm28_vm0 = vcmask 261120   ;;  %v220_v0 = vmov 0.0   ;;  %vm221_vm1 = vmmov 0   ;;  %vm178_vm2 = vcmask 257024   ;;  %s293_s1 = inlined_call_operand.vmem [shape: bf16[32,32], index: 1, kind: input, shape index: {}]   ;;  %s294_s0 = inlined_call_operand.vmem [shape: bf16[16,32], index: 0, kind: input, shape index: {}]   ;;  %s295_s3 = inlined_call_operand.vmem [shape: bf16[16,32], index: 3, kind: input, shape index: {}]   ;;  %s296_s2 = inlined_call_operand.vmem [shape: f32[1,32], index: 2, kind: input, shape index: {}]   ;;  %s297_s4 = inlined_call_operand.vmem [shape: f32[1,32], index: 4, kind: input, shape index: {}]   ;;  %s298_s5 = inlined_call_operand.vmem [shape: f32[1,32], index: 5, kind: input, shape index: {}]   ;;  %s299_s6 = inlined_call_operand.vmem [shape: bf16[16,32], index: 6, kind: output, shape index: {}]  }
   0x1   :  { %203 = vmatprep.subr.bf16.mxu0 %v220_v0  ;;  %v213_v1 = vld [vmem:[%s293_s1] sm:$0xff]   ;;  %207 = vmatprep.mubr.msk.bf16.mxu0 %vm221_vm1, %v220_v0  ;;  %29 = vst.msk [vmem:[#allocation2] sm:$0xff] %vm28_vm0, %v220_v0  ;;  %30 = vst.msk [vmem:[#allocation2 + $0x8] sm:$0xff] %vm28_vm0, %v220_v0  ;;  %v214_v2 = vld [vmem:[%s293_s1 + $0x8] sm:$0xff]  }
   0x2   :  { %204 = vmatpush3.bf16.msra.mxu0 %v213_v1  ;;  %v215_v3 = vld [vmem:[%s294_s0] sm:$0xff]  }
   0x3   :  { %205 = vmatprep.subr.bf16.mxu0 %v220_v0  ;;  %v197_v12 = vld [vmem:[%s295_s3] sm:$0xff]  }
   0x4   :  { %v189_v13 = vld [vmem:[%s296_s2] ss:$0 sm:$0xff]  ;;  %v198_v14 = vunpack.c.l.bf16 %v197_v12  ;;  %v199_v17 = vunpack.c.h.bf16 %v197_v12 }
   0x5   :  { %v190_v41 = vld [vmem:[%s297_s4] ss:$0 sm:$0xff] }
   0x6   :  { %206 = vmatpush3.bf16.msra.mxu0 %v214_v2  ;;  %v191_v43 = vld [vmem:[%s298_s5] ss:$0 sm:$0xff] }
   0x8   :  { %v31_v4 = vld [vmem:[#allocation2] sm:$0xff]  ;;  %v32_v6 = vld [vmem:[#allocation2 + $0x8] sm:$0xff] }
   0x9   :  { %208 = vmatmul.mubr.msk.bf16.vlgmr.msra.gmra.mrb[0].mxu0 %vm28_vm0, %v215_v3 }
  0xdc   :  { %v94_v5 = vpop.f32.mrb[0].mxu0 }
  0xdd   :  { %v101_v7 = vadd.f32 %v94_v5, %v31_v4  ;;  %v209_v8 = vpop.f32.mrb[1].mxu0 }
  0xde   :  { %v97_v9 = vpop.f32.mrb[2].mxu0 }
  0xdf   :  { %103 = vst.msk [vmem:[#allocation2] sm:$0xff] %vm28_vm0, %v101_v7  ;;  %v102_v10 = vadd.f32 %v97_v9, %v32_v6  ;;  %v210_v11 = vpop.f32.mrb[3].mxu0 }
  0xe1   :  { %104 = vst.msk [vmem:[#allocation2 + $0x8] sm:$0xff] %vm28_vm0, %v102_v10 }
  0xe6   :  { %v108_v15 = vld [vmem:[#allocation2] sm:$0xff] }
  0xe7   :  { %v117_v16 = vadd.f32 %v189_v13, %v108_v15 }
  0xe8   :  { %v109_v18 = vld [vmem:[#allocation2 + $0x8] sm:$0xff] }
  0xe9   :  { %v123_v19 = vadd.f32 %v198_v14, %v117_v16  ;;  %v118_v20 = vadd.f32 %v189_v13, %v109_v18 }
  0xeb   :  { %v125_v21 = vsel %vm28_vm0, %v123_v19, 0.0  ;;  %v124_v22 = vadd.f32 %v199_v17, %v118_v20 }
  0xec   :  { %126 = vadd.xlane.f32.xlu0 %v125_v21 }
  0xed   :  { %v128_v23 = vsel %vm28_vm0, %v124_v22, 0.0 }
  0xf0   :  { %129 = vadd.xlane.f32.xlu0 %v128_v23 }
 0x179   :  { %v127_v24 = vpop.xlane.xlu0 %126 }
 0x17a   :  { %v132_v25 = vmul.f32 0.03125, %v127_v24 }
 0x17c   :  { %v134_v26 = vsub.f32 %v123_v19, %v132_v25 }
 0x17d   :  { %v130_v27 = vpop.xlane.xlu0 %129 }
 0x17e   :  { %v133_v28 = vmul.f32 0.03125, %v130_v27  ;;  %v136_v29 = vmul.f32 %v134_v26, %v134_v26 }
 0x180   :  { %v135_v30 = vsub.f32 %v124_v22, %v133_v28  ;;  %v138_v31 = vsel %vm28_vm0, %v136_v29, 0.0 }
 0x181   :  { %139 = vadd.xlane.f32.xlu1 %v138_v31 }
 0x182   :  { %v137_v32 = vmul.f32 %v135_v30, %v135_v30 }
 0x184   :  { %v141_v33 = vsel %vm28_vm0, %v137_v32, 0.0 }
 0x185   :  { %142 = vadd.xlane.f32.xlu1 %v141_v33 }
 0x20e   :  { %v140_v34 = vpop.xlane.xlu1 %139 }
 0x20f   :  { %v144_v35 = vmul.f32 0.03125, %v140_v34 }
 0x211   :  { %v146_v36 = vadd.f32 1e-05, %v144_v35 }
 0x212   :  { %v143_v37 = vpop.xlane.xlu1 %142 }
 0x213   :  { %216 = vrsqrt.f32 %v146_v36  ;;  %v145_v38 = vmul.f32 0.03125, %v143_v37 }
 0x215   :  { %v147_v39 = vadd.f32 1e-05, %v145_v38 }
 0x217   :  { %218 = vrsqrt.f32 %v147_v39 }
 0x21d   :  { %v217_v40 = vpop.eup %216 }
 0x21e   :  { %v150_v42 = vmul.f32 %v217_v40, %v134_v26 }
 0x220   :  { %v159_v44 = vmul.f32 %v190_v41, %v150_v42 }
 0x221   :  { %v219_v45 = vpop.eup %218 }
 0x222   :  { %v168_v46 = vadd.f32 %v191_v43, %v159_v44  ;;  %v151_v47 = vmul.f32 %v219_v45, %v135_v30 }
 0x224   :  { %v194_v48 = vpack.c.bf16 %v168_v46, %v168_v46  ;;  %v160_v49 = vmul.f32 %v190_v41, %v151_v47 }
 0x226   :  { %179 = vst.msk [vmem:[%s299_s6] sm:$0xf] %vm178_vm2, %v194_v48  ;;  %v169_v50 = vadd.f32 %v191_v43, %v160_v49 }
 0x228   :  { %v195_v51 = vpack.c.bf16 %v169_v50, %v169_v50 }
 0x22a   :  { %180 = vst.msk [vmem:[%s299_s6 + $0x4] sm:$0xf] %vm178_vm2, %v195_v51 }

// kernel: transformer_decoder.19
= control target key start
LH: loop header
LB: loop body
LE: loop exit
PB: predicated region body
PF: predicated region fallthrough
CT: control target
= control target key end

     0   :  { %vm19_vm0 = vcmask 785408   ;;  %v151_v0 = vmov 0.0   ;;  %vm152_vm1 = vmmov 0   ;;  %vm47_vm2 = vcmask 261120   ;;  %s195_s1 = inlined_call_operand.vmem [shape: bf16[32,96], index: 1, kind: input, shape index: {}]   ;;  %s196_s0 = inlined_call_operand.vmem [shape: bf16[16,32], index: 0, kind: input, shape index: {}]   ;;  %s197_s2 = inlined_call_operand.vmem [shape: f32[1,96], index: 2, kind: input, shape index: {}]   ;;  %s198_s3 = inlined_call_operand.vmem [shape: bf16[16,96], index: 3, kind: output, shape index: {}]  }
   0x1   :  { %138 = vmatprep.subr.bf16.mxu0 %v151_v0  ;;  %v148_v1 = vld [vmem:[%s195_s1] sm:$0xff]   ;;  %142 = vmatprep.mubr.msk.bf16.mxu0 %vm152_vm1, %v151_v0  ;;  %20 = vst.msk [vmem:[#allocation2] sm:$0xff] %vm19_vm0, %v151_v0  ;;  %21 = vst.msk [vmem:[#allocation2 + $0x8] sm:$0xff] %vm19_vm0, %v151_v0  ;;  %v149_v2 = vld [vmem:[%s195_s1 + $0x8] sm:$0xff]   ;;  %vm119_vm3 = vcmask 781312  }
   0x2   :  { %139 = vmatpush3.bf16.msra.mxu0 %v148_v1  ;;  %v150_v3 = vld [vmem:[%s196_s0] sm:$0xff]  }
   0x3   :  { %140 = vmatprep.subr.bf16.mxu0 %v151_v0  ;;  %v130_v12 = vld [vmem:[%s197_s2] ss:$0 sm:$0xff] }
   0x6   :  { %141 = vmatpush3.bf16.msra.mxu0 %v149_v2 }
   0x8   :  { %v22_v4 = vld [vmem:[#allocation2] sm:$0xff]  ;;  %v23_v6 = vld [vmem:[#allocation2 + $0x8] sm:$0xff] }
   0x9   :  { %143 = vmatmul.mubr.msk.bf16.vlgmr.msra.gmra.mrb[0].mxu0 %vm47_vm2, %v150_v3 }
  0xdc   :  { %v85_v5 = vpop.f32.mrb[0].mxu0 }
  0xdd   :  { %v92_v7 = vadd.f32 %v85_v5, %v22_v4  ;;  %v144_v8 = vpop.f32.mrb[1].mxu0 }
  0xde   :  { %v88_v9 = vpop.f32.mrb[2].mxu0 }
  0xdf   :  { %95 = vst.msk [vmem:[#allocation2] sm:$0xff] %vm19_vm0, %v92_v7  ;;  %v93_v10 = vadd.f32 %v88_v9, %v23_v6  ;;  %v145_v11 = vpop.f32.mrb[3].mxu0 }
  0xe1   :  { %96 = vst.msk [vmem:[#allocation2 + $0x8] sm:$0xff] %vm19_vm0, %v93_v10 }
  0xe6   :  { %v100_v13 = vld [vmem:[#allocation2] sm:$0xff] }
  0xe7   :  { %v109_v14 = vadd.f32 %v130_v12, %v100_v13 }
  0xe8   :  { %v101_v15 = vld [vmem:[#allocation2 + $0x8] sm:$0xff] }
  0xe9   :  { %v133_v16 = vpack.c.bf16 %v109_v14, %v109_v14  ;;  %v110_v17 = vadd.f32 %v130_v12, %v101_v15 }
  0xeb   :  { %120 = vst.msk [vmem:[%s198_s3] sm:$0xf] %vm119_vm3, %v133_v16  ;;  %v134_v18 = vpack.c.bf16 %v110_v17, %v110_v17 }
  0xed   :  { %121 = vst.msk [vmem:[%s198_s3 + $0x4] sm:$0xf] %vm119_vm3, %v134_v18 }

// kernel: transformer_decoder.22
= control target key start
LH: loop header
LB: loop body
LE: loop exit
PB: predicated region body
PF: predicated region fallthrough
CT: control target
= control target key end

     0   :  { %vm19_vm0 = vcmask 261120   ;;  %v150_v0 = vmov 0.0   ;;  %vm151_vm1 = vmmov 0   ;;  %vm118_vm2 = vcmask 257024   ;;  %s195_s1 = inlined_call_operand.vmem [shape: bf16[32,32], index: 1, kind: input, shape index: {}]   ;;  %s196_s0 = inlined_call_operand.vmem [shape: bf16[16,32], index: 0, kind: input, shape index: {}]   ;;  %s197_s2 = inlined_call_operand.vmem [shape: f32[1,32], index: 2, kind: input, shape index: {}]   ;;  %s198_s3 = inlined_call_operand.vmem [shape: bf16[16,32], index: 3, kind: output, shape index: {}]  }
   0x1   :  { %137 = vmatprep.subr.bf16.mxu0 %v150_v0  ;;  %v147_v1 = vld [vmem:[%s195_s1] sm:$0xff]   ;;  %141 = vmatprep.mubr.msk.bf16.mxu0 %vm151_vm1, %v150_v0  ;;  %20 = vst.msk [vmem:[#allocation2] sm:$0xff] %vm19_vm0, %v150_v0  ;;  %21 = vst.msk [vmem:[#allocation2 + $0x8] sm:$0xff] %vm19_vm0, %v150_v0  ;;  %v148_v2 = vld [vmem:[%s195_s1 + $0x8] sm:$0xff]  }
   0x2   :  { %138 = vmatpush3.bf16.msra.mxu0 %v147_v1  ;;  %v149_v3 = vld [vmem:[%s196_s0] sm:$0xff]  }
   0x3   :  { %139 = vmatprep.subr.bf16.mxu0 %v150_v0  ;;  %v129_v12 = vld [vmem:[%s197_s2] ss:$0 sm:$0xff] }
   0x6   :  { %140 = vmatpush3.bf16.msra.mxu0 %v148_v2 }
   0x8   :  { %v22_v4 = vld [vmem:[#allocation2] sm:$0xff]  ;;  %v23_v6 = vld [vmem:[#allocation2 + $0x8] sm:$0xff] }
   0x9   :  { %142 = vmatmul.mubr.msk.bf16.vlgmr.msra.gmra.mrb[0].mxu0 %vm19_vm0, %v149_v3 }
  0xdc   :  { %v85_v5 = vpop.f32.mrb[0].mxu0 }
  0xdd   :  { %v92_v7 = vadd.f32 %v85_v5, %v22_v4  ;;  %v143_v8 = vpop.f32.mrb[1].mxu0 }
  0xde   :  { %v88_v9 = vpop.f32.mrb[2].mxu0 }
  0xdf   :  { %94 = vst.msk [vmem:[#allocation2] sm:$0xff] %vm19_vm0, %v92_v7  ;;  %v93_v10 = vadd.f32 %v88_v9, %v23_v6  ;;  %v144_v11 = vpop.f32.mrb[3].mxu0 }
  0xe1   :  { %95 = vst.msk [vmem:[#allocation2 + $0x8] sm:$0xff] %vm19_vm0, %v93_v10 }
  0xe6   :  { %v99_v13 = vld [vmem:[#allocation2] sm:$0xff] }
  0xe7   :  { %v108_v14 = vadd.f32 %v129_v12, %v99_v13 }
  0xe8   :  { %v100_v15 = vld [vmem:[#allocation2 + $0x8] sm:$0xff] }
  0xe9   :  { %v132_v16 = vpack.c.bf16 %v108_v14, %v108_v14  ;;  %v109_v17 = vadd.f32 %v129_v12, %v100_v15 }
  0xeb   :  { %119 = vst.msk [vmem:[%s198_s3] sm:$0xf] %vm118_vm2, %v132_v16  ;;  %v133_v18 = vpack.c.bf16 %v109_v17, %v109_v17 }
  0xed   :  { %120 = vst.msk [vmem:[%s198_s3 + $0x4] sm:$0xf] %vm118_vm2, %v133_v18 }

// kernel: transformer_decoder.20
= control target key start
LH: loop header
LB: loop body
LE: loop exit
PB: predicated region body
PF: predicated region fallthrough
CT: control target
= control target key end

     0   :  { %s1395_s6 = smov 0   ;;  %s1579_s0 = inlined_call_operand.vmem [shape: bf16[2,8,96], index: 0, kind: input, shape index: {}]   ;;  %s1580_s1 = inlined_call_operand.vmem [shape: bf16[2,8,32], index: 1, kind: output, shape index: {}]  }
   0x1 LB: > { %s1116_s7 = sadd.s32 4294967295, %s1350_s6   ;;  %p1120_p0 = scmp.ge.s32.totalorder %s1350_s6, 1  ;;  %s1350_s6 = sphi %s1395_s6, %s11_s6  }
   0x2   : > { %p86_p1 = scmp.lt.s32.totalorder %s1350_s6, 3 }
   0x4   : > { %p87_p2 = pnand %p1120_p0, %p86_p1 }
   0x5   : > { %p104_p3 = scmp.lt.s32.totalorder (!%p87_p2), %s1116_s7, 1  ;;  %v1352_v0 = vmov (!%p87_p2), 0.0   ;;  %vm1353_vm0 = vmmov (!%p87_p2), 0   ;;  %s1354_s12 = smov (!%p87_p2), 96   ;;  %vm125_vm1 = vcmask (!%p87_p2), 31744   ;;  %v114_v5 = vlaneseq (!%p87_p2) }
   0x6   : > { %90 = sbr.rel (%p87_p2) target bundleno = 1639 (0x667), region = 24  ;;  %1174 = vmatprep.subr.bf16.mxu0 (!%p87_p2), %v1352_v0  ;;  %1176 = vmatprep.mubr.msk.bf16.mxu0 (!%p87_p2), %vm1353_vm0, %v1352_v0  ;;  %s1355_s13 = smov (!%p87_p2), 64   ;;  %v1357_v9 = vmov (!%p87_p2), -1e+09   ;;  %vm174_vm3 = vcmask (!%p87_p2), 64512   ;;  %vm192_vm4 = vcmask (!%p87_p2), 1043456  }
   0x7   : > { %1180 = vmatprep.subr.bf16.mxu1 (!%p87_p2), %v1352_v0  ;;  %1182 = vmatprep.mubr.msk.bf16.mxu1 (!%p87_p2), %vm1353_vm0, %v1352_v0  ;;  %s1356_s14 = smov (!%p87_p2), 92   ;;  %v115_v6 = vshrl.u32 (!%p87_p2), %v114_v5, 7  ;;  %v117_v7 = vand.u32 (!%p87_p2), 127, %v114_v5  ;;  %s1358_s15 = smov (!%p87_p2), 84   ;;  %vm1050_vm5 = vcmask (!%p87_p2), 97280   ;;  %vm1052_vm6 = vcmask (!%p87_p2), 130048  }
   0x8   : > { %s1359_s16 = smov (!%p87_p2), 72   ;;  %s1360_s17 = smov (!%p87_p2), 68   ;;  %vm1054_vm7 = vcmask (!%p87_p2), 162816   ;;  %vm1056_vm8 = vcmask (!%p87_p2), 195584   ;;  %vm1058_vm9 = vcmask (!%p87_p2), 228352   ;;  %vm1061_vm10 = vcmask (!%p87_p2), 257024  }
   0x9   : > { %vm118_vm2 = vcmp.ge.s32.totalorder (!%p87_p2), %v115_v6, %v117_v7  ;;  %s1361_s18 = smov (!%p87_p2), 124   ;;  %s1362_s19 = smov (!%p87_p2), 88  }
   0xa   : > { %v1427_v10 = vsel (!%p87_p2), %vm118_vm2, 0.0, %v1357_v9  ;;  %s1363_s20 = smov (!%p87_p2), 120   ;;  %s1364_s21 = smov (!%p87_p2), 116  }
   0xb   : > { %s1365_s22 = smov (!%p87_p2), 80   ;;  %s1366_s23 = smov (!%p87_p2), 112  }
   0xc   : > { %s1367_s24 = smov (!%p87_p2), 76   ;;  %s1368_s25 = smov (!%p87_p2), 108  }
   0xd   : > { %s1582_s7 = smov (!%p104_p3, %s1116_s7), 1  ;;  %s1369_s26 = smov 104  }
   0xe   : > { %s1121_s8 = sshll.u32 %s1582_s7, 2  ;;  %s1370_s27 = smov 100  }
   0xf   : > { %s107_s11 = scalar_lea.vmem %s1579_s0, %s1121_s8  ;;  %s1371_s28 = smov 56  }
  0x10   : > { %v113_v1 = vld [vmem:[%s107_s11] sm:$0xf]  ;;  %s1372_s29 = smov 60   ;;  %s1373_s30 = smov 52  }
  0x11   : > { %v1417_v2 = vcombine.low %v113_v1, %v113_v1  ;;  %s1374_s2 = smov 48   ;;  %s1375_s3 = smov 40  }
  0x12   : > { %s1376_s4 = smov 36   ;;  %s1377_s5 = smov 44  }
  0x13   : > { %123 = vrot.lane.b32.xlu0 %v1417_v2, %s1354_s12  ;;  %187 = vrot.lane.b32.xlu1 %v1417_v2, %s1355_s13  ;;  %s1378_s9 = smov 4   ;;  %s1379_s10 = smov 8  }
  0x14   : > { %s1380_s11 = smov 12   ;;  %s1381_s12 = smov 16  }
  0x15   : > { %s1382_s13 = smov 20  }
  0x17   : > { %238 = vrot.lane.b32.xlu1 %v1417_v2, %s1356_s14  ;;  %s1383_s14 = smov 24  }
  0x85   : > { %v124_v3 = vpop.permute.xlu0 %123  ;;  %v188_v17 = vpop.permute.xlu1 %187 }
  0x86   : > { %v130_v4 = vsel %vm125_vm1, %v124_v3, 0  ;;  %v194_v18 = vsel %vm192_vm4, %v188_v17, 0 }
  0x87   : > { %1175 = vmatpush3.bf16.xpose.msra.mxu0 %v130_v4  ;;  %1181 = vmatpush3.bf16.msra.mxu1 %v194_v18 }
  0x88   : > { %1192 = vmatprep.subr.bf16.mxu0 %v1352_v0  ;;  %1186 = vmatprep.subr.bf16.mxu1 %v1352_v0 }
  0x89   : > { %v239_v24 = vpop.permute.xlu1 %238 }
  0x8a   : > { %v244_v31 = vsel %vm125_vm1, %v239_v24, 0 }
  0x8e   : > { %1177 = vmatmul.mubr.msk.bf16.vlgmr.msra.gmra.mrb[0].mxu0 %vm125_vm1, %v113_v1 }
  0x8f   : > { %1194 = vmatprep.mubr.msk.bf16.mxu0 %vm1353_vm0, %v1352_v0 }
 0x161   : > { %v166_v8 = vpop.f32.mrb[0].mxu0 }
 0x162   : > { %v172_v11 = vmul.f32 0.5, %v166_v8  ;;  %v1178_v12 = vpop.f32.mrb[1].mxu0 }
 0x163   : > { %v169_v13 = vpop.f32.mrb[2].mxu0 }
 0x164   : > { %v1179_v14 = vpop.f32.mrb[3].mxu0  ;;  %v173_v15 = vadd.f32 %v172_v11, %v1427_v10 }
 0x166   : > { %v175_v16 = vsel %vm174_vm3, %v173_v15, -inf }
 0x167   : > { %176 = vmax.xlane.f32.xlu0 %v175_v16 }
 0x17d   : > { %462 = vrot.lane.b32.xlu0 %v1417_v2, %s1358_s15  ;;  %s1384_s15 = smov 28  }
 0x181   : > { %798 = vrot.lane.b32.xlu0 %v1417_v2, %s1359_s16 }
 0x185   : > { %910 = vrot.lane.b32.xlu0 %v1417_v2, %s1360_s17 }
 0x1f4   : > { %v177_v19 = vpop.xlane.xlu0 %176 }
 0x1f5   : > { %v178_v20 = vsub.f32 %v173_v15, %v177_v19 }
 0x1f7   : > { %v179_v21 = vmul.f32 1.442695, %v178_v20 }
 0x1f8   : > { %v463_v35 = vpop.permute.xlu0 %462 }
 0x1f9   : > { %1312 = vpow2.f32 %v179_v21  ;;  %v468_v36 = vsel %vm125_vm1, %v463_v35, 0 }
 0x1fc   : > { %v799_v42 = vpop.permute.xlu0 %798 }
 0x1fd   : > { %v804_v44 = vsel %vm125_vm1, %v799_v42, 0 }
 0x200   : > { %v911_v45 = vpop.permute.xlu0 %910 }
 0x201   : > { %v916_v47 = vsel %vm125_vm1, %v911_v45, 0 }
 0x203   : > { %v1313_v22 = vpop.eup %1312 }
 0x204   : > { %v181_v23 = vsel %vm174_vm3, %v1313_v22, 0.0 }
 0x205   : > { %182 = vadd.xlane.f32.xlu1 %v181_v23 }
 0x216   : > { %236 = vrot.lane.b32.xlu1 %v1417_v2, %s1361_s18  ;;  %s111_s18 = scalar_lea.vmem %s1580_s1, %s1121_s8 }
 0x21a   : > { %350 = vrot.lane.b32.xlu1 %v1417_v2, %s1362_s19 }
 0x21e   : > { %348 = vrot.lane.b32.xlu1 %v1417_v2, %s1363_s20 }
 0x222   : > { %460 = vrot.lane.b32.xlu1 %v1417_v2, %s1364_s21 }
 0x226   : > { %574 = vrot.lane.b32.xlu1 %v1417_v2, %s1365_s22 }
 0x22a   : > { %572 = vrot.lane.b32.xlu1 %v1417_v2, %s1366_s23 }
 0x22e   : > { %686 = vrot.lane.b32.xlu1 %v1417_v2, %s1367_s24 }
 0x232   : > { %684 = vrot.lane.b32.xlu1 %v1417_v2, %s1368_s25 }
 0x236   : > { %796 = vrot.lane.b32.xlu1 %v1417_v2, %s1369_s26 }
 0x23a   : > { %908 = vrot.lane.b32.xlu1 %v1417_v2, %s1370_s27 }
 0x292   : > { %v183_v25 = vpop.xlane.xlu1 %182 }
 0x293   : > { %1314 = vrcp.f32 %v183_v25 }
 0x296   : > { %v237_v26 = vpop.permute.xlu1 %236 }
 0x29a   : > { %v351_v30 = vpop.permute.xlu1 %350 }
 0x29b   : > { %v356_v33 = vsel %vm125_vm1, %v351_v30, 0 }
 0x29d   : > { %v1315_v27 = vpop.eup %1314 }
 0x29e   : > { %v185_v28 = vmul.f32 %v1315_v27, %v1313_v22  ;;  %v349_v32 = vpop.permute.xlu1 %348 }
 0x2a0   : > { %v186_v29 = vpack.c.bf16 %v185_v28, %v185_v28 }
 0x2a2   : > { %1183 = vmatmul.mubr.msk.bf16.vlgmr.msra.gmra.mrb[0].mxu1 %vm174_vm3, %v186_v29  ;;  %v461_v34 = vpop.permute.xlu1 %460 }
 0x2a3   : > { %1187 = vmatpush3.bf16.xpose.msra.mxu1 %v244_v31  ;;  %1188 = vmatprep.mubr.msk.bf16.mxu1 %vm1353_vm0, %v1352_v0 }
 0x2a4   : > { %1198 = vmatprep.subr.bf16.mxu1 %v1352_v0 }
 0x2a6   : > { %v575_v37 = vpop.permute.xlu1 %574 }
 0x2a7   : > { %v580_v39 = vsel %vm125_vm1, %v575_v37, 0 }
 0x2aa   : > { %1189 = vmatmul.mubr.msk.bf16.vlgmr.msra.gmra.mrb[4].mxu1 %vm125_vm1, %v237_v26  ;;  %v573_v38 = vpop.permute.xlu1 %572 }
 0x2ab   : > { %1199 = vmatpush3.bf16.xpose.msra.mxu1 %v356_v33  ;;  %1200 = vmatprep.mubr.msk.bf16.mxu1 %vm1353_vm0, %v1352_v0 }
 0x2ac   : > { %1210 = vmatprep.subr.bf16.mxu1 %v1352_v0 }
 0x2ae   : > { %v687_v40 = vpop.permute.xlu1 %686 }
 0x2af   : > { %v692_v41 = vsel %vm125_vm1, %v687_v40, 0 }
 0x2b2   : > { %1201 = vmatmul.mubr.msk.bf16.vlgmr.msra.gmra.mrb[8].mxu1 %vm125_vm1, %v349_v32  ;;  %v685_v43 = vpop.permute.xlu1 %684 }
 0x2b3   : > { %1211 = vmatpush3.bf16.xpose.msra.mxu1 %v468_v36  ;;  %1212 = vmatprep.mubr.msk.bf16.mxu1 %vm1353_vm0, %v1352_v0 }
 0x2b4   : > { %1222 = vmatprep.subr.bf16.mxu1 %v1352_v0 }
 0x2b6   : > { %v797_v46 = vpop.permute.xlu1 %796 }
 0x2ba   : > { %1213 = vmatmul.mubr.msk.bf16.vlgmr.msra.gmra.mrb[12].mxu1 %vm125_vm1, %v461_v34  ;;  %v909_v48 = vpop.permute.xlu1 %908 }
 0x2bb   : > { %1223 = vmatpush3.bf16.xpose.msra.mxu1 %v580_v39  ;;  %1224 = vmatprep.mubr.msk.bf16.mxu1 %vm1353_vm0, %v1352_v0 }
 0x2bc   : > { %1234 = vmatprep.subr.bf16.mxu1 %v1352_v0 }
 0x2c2   : > { %1225 = vmatmul.mubr.msk.bf16.vlgmr.msra.gmra.mrb[16].mxu1 %vm125_vm1, %v573_v38 }
 0x2c3   : > { %1235 = vmatpush3.bf16.xpose.msra.mxu1 %v692_v41  ;;  %1236 = vmatprep.mubr.msk.bf16.mxu1 %vm1353_vm0, %v1352_v0 }
 0x2c4   : > { %1246 = vmatprep.subr.bf16.mxu1 %v1352_v0 }
 0x2ca   : > { %1237 = vmatmul.mubr.msk.bf16.vlgmr.msra.gmra.mrb[20].mxu1 %vm125_vm1, %v685_v43 }
 0x2cb   : > { %1247 = vmatpush3.bf16.xpose.msra.mxu1 %v804_v44  ;;  %1248 = vmatprep.mubr.msk.bf16.mxu1 %vm1353_vm0, %v1352_v0 }
 0x2cc   : > { %1258 = vmatprep.subr.bf16.mxu1 %v1352_v0 }
 0x2d2   : > { %1249 = vmatmul.mubr.msk.bf16.vlgmr.msra.gmra.mrb[24].mxu1 %vm125_vm1, %v797_v46 }
 0x2d3   : > { %1259 = vmatpush3.bf16.xpose.msra.mxu1 %v916_v47  ;;  %1260 = vmatprep.mubr.msk.bf16.mxu1 %vm1353_vm0, %v1352_v0 }
 0x2da   : > { %1261 = vmatmul.mubr.msk.bf16.vlgmr.msra.gmra.mrb[28].mxu1 %vm125_vm1, %v909_v48 }
 0x375   : > { %v1482_v49 = vpop.f32.mrb[0].mxu1 }
 0x376   : > { %v1184_v50 = vpop.f32.mrb[1].mxu1 }
 0x377   : > { %v233_v51 = vpop.f32.mrb[2].mxu1 }
 0x378   : > { %v1185_v52 = vpop.f32.mrb[3].mxu1 }
 0x37d   : > { %v280_v53 = vpop.f32.mrb[4].mxu1 }
 0x37e   : > { %v286_v54 = vmul.f32 0.5, %v280_v53  ;;  %v1190_v55 = vpop.f32.mrb[5].mxu1 }
 0x37f   : > { %v283_v56 = vpop.f32.mrb[6].mxu1 }
 0x380   : > { %v1191_v57 = vpop.f32.mrb[7].mxu1  ;;  %v287_v58 = vadd.f32 %v286_v54, %v1427_v10 }
 0x382   : > { %v288_v59 = vsel %vm174_vm3, %v287_v58, -inf }
 0x383   : > { %289 = vmax.xlane.f32.xlu0 %v288_v59 }
 0x385   : > { %v392_v60 = vpop.f32.mrb[8].mxu1 }
 0x386   : > { %v398_v61 = vmul.f32 0.5, %v392_v60  ;;  %v1202_v62 = vpop.f32.mrb[9].mxu1 }
 0x387   : > { %v395_v63 = vpop.f32.mrb[10].mxu1 }
 0x388   : > { %v1203_v1 = vpop.f32.mrb[11].mxu1  ;;  %v399_v3 = vadd.f32 %v398_v61, %v1427_v10 }
 0x38a   : > { %v400_v4 = vsel %vm174_vm3, %v399_v3, -inf }
 0x38b   : > { %401 = vmax.xlane.f32.xlu1 %v400_v4 }
 0x38d   : > { %v504_v5 = vpop.f32.mrb[12].mxu1 }
 0x38e   : > { %v510_v6 = vmul.f32 0.5, %v504_v5  ;;  %v1214_v7 = vpop.f32.mrb[13].mxu1 }
 0x38f   : > { %v507_v8 = vpop.f32.mrb[14].mxu1 }
 0x390   : > { %v1215_v9 = vpop.f32.mrb[15].mxu1  ;;  %v511_v11 = vadd.f32 %v510_v6, %v1427_v10 }
 0x392   : > { %v512_v12 = vsel %vm174_vm3, %v511_v11, -inf }
 0x393   : > { %513 = vmax.xlane.f32.xlu0 %v512_v12 }
 0x395   : > { %v616_v13 = vpop.f32.mrb[16].mxu1 }
 0x396   : > { %v622_v14 = vmul.f32 0.5, %v616_v13  ;;  %v1226_v15 = vpop.f32.mrb[17].mxu1 }
 0x397   : > { %v619_v16 = vpop.f32.mrb[18].mxu1 }
 0x398   : > { %v1227_v17 = vpop.f32.mrb[19].mxu1  ;;  %v1491_v18 = vadd.f32 %v622_v14, %v1427_v10 }
 0x39a   : > { %v624_v19 = vsel %vm174_vm3, %v1491_v18, -inf }
 0x39b   : > { %625 = vmax.xlane.f32.xlu0 %v624_v19 }
 0x39d   : > { %v728_v20 = vpop.f32.mrb[20].mxu1 }
 0x39e   : > { %v734_v21 = vmul.f32 0.5, %v728_v20  ;;  %v1238_v22 = vpop.f32.mrb[21].mxu1 }
 0x39f   : > { %v731_v23 = vpop.f32.mrb[22].mxu1 }
 0x3a0   : > { %v1239_v24 = vpop.f32.mrb[23].mxu1  ;;  %v735_v25 = vadd.f32 %v734_v21, %v1427_v10 }
 0x3a2   : > { %v736_v26 = vsel %vm174_vm3, %v735_v25, -inf }
 0x3a3   : > { %737 = vmax.xlane.f32.xlu1 %v736_v26 }
 0x3a5   : > { %v840_v27 = vpop.f32.mrb[24].mxu1 }
 0x3a6   : > { %v846_v28 = vmul.f32 0.5, %v840_v27  ;;  %v1250_v29 = vpop.f32.mrb[25].mxu1 }
 0x3a7   : > { %v843_v30 = vpop.f32.mrb[26].mxu1 }
 0x3a8   : > { %v847_v31 = vadd.f32 %v846_v28, %v1427_v10  ;;  %v1251_v32 = vpop.f32.mrb[27].mxu1 }
 0x3aa   : > { %v848_v33 = vsel %vm174_vm3, %v847_v31, -inf }
 0x3ab   : > { %849 = vmax.xlane.f32.xlu0 %v848_v33 }
 0x3ad   : > { %v952_v34 = vpop.f32.mrb[28].mxu1 }
 0x3ae   : > { %v1262_v35 = vpop.f32.mrb[29].mxu1  ;;  %v958_v38 = vmul.f32 0.5, %v952_v34 }
 0x3af   : > { %v955_v36 = vpop.f32.mrb[30].mxu1 }
 0x3b0   : > { %v1263_v37 = vpop.f32.mrb[31].mxu1  ;;  %v959_v39 = vadd.f32 %v958_v38, %v1427_v10 }
 0x3b2   : > { %v960_v40 = vsel %vm174_vm3, %v959_v39, -inf }
 0x3b4   : > { %412 = vrot.lane.b32.xlu1 %v1417_v2, %s1371_s28 }
 0x3c1   : > { %300 = vrot.lane.b32.xlu0 %v1417_v2, %s1372_s29 }
 0x3d8   : > { %961 = vmax.xlane.f32.xlu1 %v960_v40 }
 0x410   : > { %v290_v41 = vpop.xlane.xlu0 %289 }
 0x411   : > { %v291_v42 = vsub.f32 %v287_v58, %v290_v41 }
 0x413   : > { %v292_v43 = vmul.f32 1.442695, %v291_v42 }
 0x415   : > { %1316 = vpow2.f32 %v292_v43 }
 0x418   : > { %v402_v44 = vpop.xlane.xlu1 %401 }
 0x419   : > { %v403_v45 = vsub.f32 %v399_v3, %v402_v44 }
 0x41b   : > { %v404_v46 = vmul.f32 1.442695, %v403_v45 }
 0x41d   : > { %1318 = vpow2.f32 %v404_v46 }
 0x41f   : > { %v1317_v47 = vpop.eup %1316 }
 0x420   : > { %v514_v48 = vpop.xlane.xlu0 %513  ;;  %v294_v50 = vsel %vm174_vm3, %v1317_v47, 0.0 }
 0x421   : > { %v515_v51 = vsub.f32 %v511_v11, %v514_v48  ;;  %295 = vadd.xlane.f32.xlu0 %v294_v50 }
 0x423   : > { %v516_v52 = vmul.f32 1.442695, %v515_v51 }
 0x425   : > { %1320 = vpow2.f32 %v516_v52 }
 0x427   : > { %v1504_v10 = vpop.eup %1318 }
 0x428   : > { %v406_v53 = vsel %vm174_vm3, %v1504_v10, 0.0  ;;  %v626_v56 = vpop.xlane.xlu0 %625 }
 0x429   : > { %407 = vadd.xlane.f32.xlu1 %v406_v53  ;;  %v627_v60 = vsub.f32 %v1491_v18, %v626_v56 }
 0x42b   : > { %v628_v62 = vmul.f32 1.442695, %v627_v60 }
 0x42d   : > { %1322 = vpow2.f32 %v628_v62 }
 0x42f   : > { %v1508_v54 = vpop.eup %1320 }
 0x430   : > { %v518_v55 = vsel %vm174_vm3, %v1508_v54, 0.0  ;;  %v738_v61 = vpop.xlane.xlu1 %737 }
 0x431   : > { %519 = vadd.xlane.f32.xlu0 %v518_v55  ;;  %v739_v63 = vsub.f32 %v735_v25, %v738_v61 }
 0x433   : > { %v740_v1 = vmul.f32 1.442695, %v739_v63 }
 0x434   : > { %v413_v8 = vpop.permute.xlu1 %412 }
 0x435   : > { %1324 = vpow2.f32 %v740_v1  ;;  %v418_v23 = vsel %vm192_vm4, %v413_v8, 0 }
 0x437   : > { %v1323_v5 = vpop.eup %1322 }
 0x438   : > { %v850_v57 = vpop.xlane.xlu0 %849  ;;  %v630_v6 = vsel %vm174_vm3, %v1323_v5, 0.0 }
 0x439   : > { %v851_v3 = vsub.f32 %v847_v31, %v850_v57 }
 0x43a   : > { %524 = vrot.lane.b32.xlu1 %v1417_v2, %s1373_s30 }
 0x43b   : > { %v852_v4 = vmul.f32 1.442695, %v851_v3 }
 0x43c   : > { %v301_v58 = vpop.permute.xlu0 %300 }
 0x43d   : > { %v306_v59 = vsel %vm192_vm4, %v301_v58, 0  ;;  %1326 = vpow2.f32 %v852_v4 }
 0x43e   : > { %1193 = vmatpush3.bf16.msra.mxu0 %v306_v59 }
 0x43f   : > { %1204 = vmatprep.subr.bf16.mxu0 %v1352_v0  ;;  %v1518_v7 = vpop.eup %1324 }
 0x440   : > { %v742_v9 = vsel %vm174_vm3, %v1518_v7, 0.0 }
 0x447   : > { %636 = vrot.lane.b32.xlu0 %v1417_v2, %s1374_s2  ;;  %v1522_v11 = vpop.eup %1326 }
 0x448   : > { %v854_v13 = vsel %vm174_vm3, %v1522_v11, 0.0 }
 0x45e   : > { %631 = vadd.xlane.f32.xlu1 %v630_v6 }
 0x462   : > { %743 = vadd.xlane.f32.xlu1 %v742_v9 }
 0x465   : > { %v962_v12 = vpop.xlane.xlu1 %961 }
 0x466   : > { %v963_v14 = vsub.f32 %v959_v39, %v962_v12  ;;  %855 = vadd.xlane.f32.xlu0 %v854_v13 }
 0x468   : > { %v964_v15 = vmul.f32 1.442695, %v963_v14 }
 0x46a   : > { %1328 = vpow2.f32 %v964_v15 }
 0x474   : > { %v1526_v16 = vpop.eup %1328 }
 0x475   : > { %v966_v17 = vsel %vm174_vm3, %v1526_v16, 0.0 }
 0x476   : > { %967 = vadd.xlane.f32.xlu1 %v966_v17 }
 0x47c   : > { %860 = vrot.lane.b32.xlu0 %v1417_v2, %s1375_s3 }
 0x480   : > { %972 = vrot.lane.b32.xlu0 %v1417_v2, %s1376_s4 }
 0x487   : > { %748 = vrot.lane.b32.xlu1 %v1417_v2, %s1377_s5 }
 0x4ae   : > { %v296_v18 = vpop.xlane.xlu0 %295 }
 0x4af   : > { %1330 = vrcp.f32 %v296_v18 }
 0x4b6   : > { %v408_v19 = vpop.xlane.xlu1 %407 }
 0x4b7   : > { %1332 = vrcp.f32 %v408_v19 }
 0x4b9   : > { %v1331_v20 = vpop.eup %1330 }
 0x4ba   : > { %v298_v21 = vmul.f32 %v1331_v20, %v1317_v47  ;;  %v525_v26 = vpop.permute.xlu1 %524 }
 0x4bb   : > { %v530_v28 = vsel %vm192_vm4, %v525_v26, 0 }
 0x4bc   : > { %v299_v22 = vpack.c.bf16 %v298_v21, %v298_v21 }
 0x4be   : > { %1195 = vmatmul.mubr.msk.bf16.vlgmr.msra.gmra.mrb[4].mxu0 %vm174_vm3, %v299_v22  ;;  %v520_v24 = vpop.xlane.xlu0 %519 }
 0x4bf   : > { %1205 = vmatpush3.bf16.msra.mxu0 %v418_v23  ;;  %1334 = vrcp.f32 %v520_v24  ;;  %1206 = vmatprep.mubr.msk.bf16.mxu0 %vm1353_vm0, %v1352_v0 }
 0x4c0   : > { %1216 = vmatprep.subr.bf16.mxu0 %v1352_v0 }
 0x4c1   : > { %v1333_v2 = vpop.eup %1332 }
 0x4c2   : > { %v410_v25 = vmul.f32 %v1333_v2, %v1504_v10  ;;  %v637_v31 = vpop.permute.xlu0 %636 }
 0x4c3   : > { %v642_v33 = vsel %vm192_vm4, %v637_v31, 0 }
 0x4c4   : > { %v411_v27 = vpack.c.bf16 %v410_v25, %v410_v25 }
 0x4c6   : > { %1207 = vmatmul.mubr.msk.bf16.vlgmr.msra.gmra.mrb[8].mxu0 %vm174_vm3, %v411_v27 }
 0x4c7   : > { %1217 = vmatpush3.bf16.msra.mxu0 %v530_v28  ;;  %1218 = vmatprep.mubr.msk.bf16.mxu0 %vm1353_vm0, %v1352_v0 }
 0x4c8   : > { %1228 = vmatprep.subr.bf16.mxu0 %v1352_v0 }
 0x4c9   : > { %v1335_v29 = vpop.eup %1334 }
 0x4ca   : > { %v522_v30 = vmul.f32 %v1335_v29, %v1508_v54 }
 0x4cc   : > { %v523_v32 = vpack.c.bf16 %v522_v30, %v522_v30 }
 0x4ce   : > { %1219 = vmatmul.mubr.msk.bf16.vlgmr.msra.gmra.mrb[12].mxu0 %vm174_vm3, %v523_v32 }
 0x4cf   : > { %1229 = vmatpush3.bf16.msra.mxu0 %v642_v33  ;;  %1230 = vmatprep.mubr.msk.bf16.mxu0 %vm1353_vm0, %v1352_v0 }
 0x4d0   : > { %1240 = vmatprep.subr.bf16.mxu0 %v1352_v0 }
 0x4eb   : > { %v632_v34 = vpop.xlane.xlu1 %631 }
 0x4ec   : > { %1336 = vrcp.f32 %v632_v34 }
 0x4ef   : > { %v744_v36 = vpop.xlane.xlu1 %743 }
 0x4f0   : > { %1338 = vrcp.f32 %v744_v36 }
 0x4f3   : > { %v856_v39 = vpop.xlane.xlu0 %855 }
 0x4f4   : > { %1340 = vrcp.f32 %v856_v39 }
 0x4f6   : > { %v1337_v35 = vpop.eup %1336 }
 0x4f7   : > { %v634_v37 = vmul.f32 %v1337_v35, %v1323_v5  ;;  %v861_v44 = vpop.permute.xlu0 %860 }
 0x4f8   : > { %v866_v47 = vsel %vm192_vm4, %v861_v44, 0 }
 0x4f9   : > { %v635_v38 = vpack.c.bf16 %v634_v37, %v634_v37 }
 0x4fa   : > { %v1339_v40 = vpop.eup %1338 }
 0x4fb   : > { %1231 = vmatmul.mubr.msk.bf16.vlgmr.msra.gmra.mrb[16].mxu0 %vm174_vm3, %v635_v38  ;;  %v746_v42 = vmul.f32 %v1339_v40, %v1518_v7  ;;  %v973_v51 = vpop.permute.xlu0 %972 }
 0x4fc   : > { %1242 = vmatprep.mubr.msk.bf16.mxu0 %vm1353_vm0, %v1352_v0  ;;  %v978_v10 = vsel %vm192_vm4, %v973_v51, 0 }
 0x4fd   : > { %v747_v46 = vpack.c.bf16 %v746_v42, %v746_v42 }
 0x4fe   : > { %v1341_v48 = vpop.eup %1340 }
 0x4ff   : > { %v858_v50 = vmul.f32 %v1341_v48, %v1522_v11 }
 0x501   : > { %v859_v52 = vpack.c.bf16 %v858_v50, %v858_v50 }
 0x503   : > { %v968_v41 = vpop.xlane.xlu1 %967 }
 0x504   : > { %1342 = vrcp.f32 %v968_v41 }
 0x507   : > { %v749_v43 = vpop.permute.xlu1 %748 }
 0x508   : > { %v754_v45 = vsel %vm192_vm4, %v749_v43, 0 }
 0x509   : > { %1241 = vmatpush3.bf16.msra.mxu0 %v754_v45 }
 0x50a   : > { %1252 = vmatprep.subr.bf16.mxu0 %v1352_v0 }
 0x50c   : > { %1243 = vmatmul.mubr.msk.bf16.vlgmr.msra.gmra.mrb[20].mxu0 %vm174_vm3, %v747_v46 }
 0x50d   : > { %1253 = vmatpush3.bf16.msra.mxu0 %v866_v47  ;;  %1254 = vmatprep.mubr.msk.bf16.mxu0 %vm1353_vm0, %v1352_v0 }
 0x50e   : > { %1264 = vmatprep.subr.bf16.mxu0 %v1352_v0  ;;  %v1343_v53 = vpop.eup %1342 }
 0x50f   : > { %v970_v54 = vmul.f32 %v1343_v53, %v1526_v16 }
 0x511   : > { %v971_v55 = vpack.c.bf16 %v970_v54, %v970_v54 }
 0x514   : > { %1255 = vmatmul.mubr.msk.bf16.vlgmr.msra.gmra.mrb[24].mxu0 %vm174_vm3, %v859_v52 }
 0x515   : > { %1265 = vmatpush3.bf16.msra.mxu0 %v978_v10  ;;  %1266 = vmatprep.mubr.msk.bf16.mxu0 %vm1353_vm0, %v1352_v0 }
 0x51c   : > { %1267 = vmatmul.mubr.msk.bf16.vlgmr.msra.gmra.mrb[28].mxu0 %vm174_vm3, %v971_v55 }
 0x591   : > { %v342_v56 = vpop.f32.mrb[4].mxu0 }
 0x592   : > { %1021 = vrot.lane.b32.xlu1 %v342_v56, %s1378_s9  ;;  %v1196_v57 = vpop.f32.mrb[5].mxu0 }
 0x593   : > { %v345_v58 = vpop.f32.mrb[6].mxu0 }
 0x594   : > { %v1197_v59 = vpop.f32.mrb[7].mxu0 }
 0x599   : > { %v454_v60 = vpop.f32.mrb[8].mxu0 }
 0x59a   : > { %1025 = vrot.lane.b32.xlu0 %v454_v60, %s1379_s10  ;;  %v1208_v61 = vpop.f32.mrb[9].mxu0 }
 0x59b   : > { %v457_v62 = vpop.f32.mrb[10].mxu0 }
 0x59c   : > { %v1209_v63 = vpop.f32.mrb[11].mxu0 }
 0x5a1   : > { %v566_v1 = vpop.f32.mrb[12].mxu0 }
 0x5a2   : > { %1029 = vrot.lane.b32.xlu1 %v566_v1, %s1380_s11  ;;  %v1220_v0 = vpop.f32.mrb[13].mxu0 }
 0x5a3   : > { %v569_v3 = vpop.f32.mrb[14].mxu0 }
 0x5a4   : > { %v1221_v4 = vpop.f32.mrb[15].mxu0 }
 0x5ce   : > { %v678_v5 = vpop.f32.mrb[16].mxu0 }
 0x5cf   : > { %1033 = vrot.lane.b32.xlu0 %v678_v5, %s1381_s12  ;;  %v1232_v6 = vpop.f32.mrb[17].mxu0 }
 0x5d0   : > { %v681_v7 = vpop.f32.mrb[18].mxu0 }
 0x5d1   : > { %v1233_v8 = vpop.f32.mrb[19].mxu0 }
 0x5df   : > { %v790_v9 = vpop.f32.mrb[20].mxu0 }
 0x5e0   : > { %1037 = vrot.lane.b32.xlu1 %v790_v9, %s1382_s13  ;;  %v1244_v11 = vpop.f32.mrb[21].mxu0 }
 0x5e1   : > { %v793_v12 = vpop.f32.mrb[22].mxu0 }
 0x5e2   : > { %v1245_v13 = vpop.f32.mrb[23].mxu0 }
 0x5e7   : > { %v902_v14 = vpop.f32.mrb[24].mxu0 }
 0x5e8   : > { %1041 = vrot.lane.b32.xlu0 %v902_v14, %s1383_s14  ;;  %v1256_v15 = vpop.f32.mrb[25].mxu0 }
 0x5e9   : > { %v905_v16 = vpop.f32.mrb[26].mxu0 }
 0x5ea   : > { %v1257_v17 = vpop.f32.mrb[27].mxu0 }
 0x5ef   : > { %v1014_v18 = vpop.f32.mrb[28].mxu0 }
 0x5f0   : > { %1045 = vrot.lane.b32.xlu1 %v1014_v18, %s1384_s15  ;;  %v1268_v19 = vpop.f32.mrb[29].mxu0 }
 0x5f1   : > { %v1017_v20 = vpop.f32.mrb[30].mxu0 }
 0x5f2   : > { %v1269_v21 = vpop.f32.mrb[31].mxu0 }
 0x604   : > { %v1022_v22 = vpop.permute.xlu1 %1021 }
 0x605   : > { %v1048_v25 = vsel %vm125_vm1, %v1482_v49, %v1022_v22 }
 0x60c   : > { %v1026_v23 = vpop.permute.xlu0 %1025 }
 0x60d   : > { %v1049_v26 = vsel %vm174_vm3, %v1048_v25, %v1026_v23 }
 0x614   : > { %v1030_v24 = vpop.permute.xlu1 %1029 }
 0x615   : > { %v1051_v28 = vsel %vm1050_vm5, %v1049_v26, %v1030_v24 }
 0x641   : > { %v1034_v2 = vpop.permute.xlu0 %1033 }
 0x642   : > { %v1053_v30 = vsel %vm1052_vm6, %v1051_v28, %v1034_v2 }
 0x652   : > { %v1038_v27 = vpop.permute.xlu1 %1037 }
 0x653   : > { %v1055_v31 = vsel %vm1054_vm7, %v1053_v30, %v1038_v27 }
 0x65a   : > { %v1042_v29 = vpop.permute.xlu0 %1041 }
 0x65b   : > { %v1057_v32 = vsel %vm1056_vm8, %v1055_v31, %v1042_v29 }
 0x662   : > { %v1046_v33 = vpop.permute.xlu1 %1045 }
 0x663   : > { %v1059_v49 = vsel %vm1058_vm9, %v1057_v32, %v1046_v33 }
 0x664   : > { %v1060_v34 = vpack.c.bf16 %v1059_v49, %v1059_v49 }
 0x666   : > { %1062 = vst.msk [vmem:[%s111_s18] sm:$0xf] %vm1061_vm10, %v1060_v34 }
 0x667 PF: > { %s11_s6 = sadd.s32 1, %s1350_s6  }
 0x668   : > { %p8_p4 = scmp.ge.s32.totalorder %s11_s6, 4  }
 0x66a   :  { %10 = sbr.rel (!%p8_p4) target bundleno = 1 (0x1), region = 54 }

// kernel: transformer_decoder.23
= control target key start
LH: loop header
LB: loop body
LE: loop exit
PB: predicated region body
PF: predicated region fallthrough
CT: control target
= control target key end

     0   :  { %vm19_vm0 = vcmask 523264   ;;  %v151_v0 = vmov 0.0   ;;  %vm152_vm1 = vmmov 0   ;;  %vm47_vm2 = vcmask 261120   ;;  %s195_s1 = inlined_call_operand.vmem [shape: bf16[32,64], index: 1, kind: input, shape index: {}]   ;;  %s196_s0 = inlined_call_operand.vmem [shape: bf16[16,32], index: 0, kind: input, shape index: {}]   ;;  %s197_s2 = inlined_call_operand.vmem [shape: f32[1,64], index: 2, kind: input, shape index: {}]   ;;  %s198_s3 = inlined_call_operand.vmem [shape: bf16[16,64], index: 3, kind: output, shape index: {}]  }
   0x1   :  { %138 = vmatprep.subr.bf16.mxu0 %v151_v0  ;;  %v148_v1 = vld [vmem:[%s195_s1] sm:$0xff]   ;;  %142 = vmatprep.mubr.msk.bf16.mxu0 %vm152_vm1, %v151_v0  ;;  %20 = vst.msk [vmem:[#allocation2] sm:$0xff] %vm19_vm0, %v151_v0  ;;  %21 = vst.msk [vmem:[#allocation2 + $0x8] sm:$0xff] %vm19_vm0, %v151_v0  ;;  %v149_v2 = vld [vmem:[%s195_s1 + $0x8] sm:$0xff]   ;;  %vm119_vm3 = vcmask 519168  }
   0x2   :  { %139 = vmatpush3.bf16.msra.mxu0 %v148_v1  ;;  %v150_v3 = vld [vmem:[%s196_s0] sm:$0xff]  }
   0x3   :  { %140 = vmatprep.subr.bf16.mxu0 %v151_v0  ;;  %v130_v12 = vld [vmem:[%s197_s2] ss:$0 sm:$0xff] }
   0x6   :  { %141 = vmatpush3.bf16.msra.mxu0 %v149_v2 }
   0x8   :  { %v22_v4 = vld [vmem:[#allocation2] sm:$0xff]  ;;  %v23_v6 = vld [vmem:[#allocation2 + $0x8] sm:$0xff] }
   0x9   :  { %143 = vmatmul.mubr.msk.bf16.vlgmr.msra.gmra.mrb[0].mxu0 %vm47_vm2, %v150_v3 }
  0xdc   :  { %v85_v5 = vpop.f32.mrb[0].mxu0 }
  0xdd   :  { %v92_v7 = vadd.f32 %v85_v5, %v22_v4  ;;  %v144_v8 = vpop.f32.mrb[1].mxu0 }
  0xde   :  { %v88_v9 = vpop.f32.mrb[2].mxu0 }
  0xdf   :  { %95 = vst.msk [vmem:[#allocation2] sm:$0xff] %vm19_vm0, %v92_v7  ;;  %v93_v10 = vadd.f32 %v88_v9, %v23_v6  ;;  %v145_v11 = vpop.f32.mrb[3].mxu0 }
  0xe1   :  { %96 = vst.msk [vmem:[#allocation2 + $0x8] sm:$0xff] %vm19_vm0, %v93_v10 }
  0xe6   :  { %v100_v13 = vld [vmem:[#allocation2] sm:$0xff] }
  0xe7   :  { %v109_v14 = vadd.f32 %v130_v12, %v100_v13 }
  0xe8   :  { %v101_v15 = vld [vmem:[#allocation2 + $0x8] sm:$0xff] }
  0xe9   :  { %v133_v16 = vpack.c.bf16 %v109_v14, %v109_v14  ;;  %v110_v17 = vadd.f32 %v130_v12, %v101_v15 }
  0xeb   :  { %120 = vst.msk [vmem:[%s198_s3] sm:$0xf] %vm119_vm3, %v133_v16  ;;  %v134_v18 = vpack.c.bf16 %v110_v17, %v110_v17 }
  0xed   :  { %121 = vst.msk [vmem:[%s198_s3 + $0x4] sm:$0xf] %vm119_vm3, %v134_v18 }

// kernel: transformer_decoder.26
= control target key start
LH: loop header
LB: loop body
LE: loop exit
PB: predicated region body
PF: predicated region fallthrough
CT: control target
= control target key end

     0   :  { %v155_v0 = vmov 0.0   ;;  %vm156_vm0 = vmmov 0   ;;  %vm46_vm1 = vcmask 261120   ;;  %s192_s1 = inlined_call_operand.vmem [shape: bf16[32,128], index: 1, kind: input, shape index: {}]   ;;  %s193_s0 = inlined_call_operand.vmem [shape: bf16[16,32], index: 0, kind: input, shape index: {}]   ;;  %s194_s2 = inlined_call_operand.vmem [shape: f32[1,128], index: 2, kind: input, shape index: {}]   ;;  %s195_s3 = inlined_call_operand.vmem [shape: bf16[16,128], index: 3, kind: output, shape index: {}]  }
   0x1   :  { %142 = vmatprep.subr.bf16.mxu0 %v155_v0  ;;  %v152_v1 = vld [vmem:[%s192_s1] sm:$0xff]   ;;  %146 = vmatprep.mubr.msk.bf16.mxu0 %vm156_vm0, %v155_v0  ;;  %v153_v2 = vld [vmem:[%s192_s1 + $0x8] sm:$0xff]  }
   0x2   :  { %143 = vmatpush3.bf16.msra.mxu0 %v152_v1  ;;  %v154_v3 = vld [vmem:[%s193_s0] sm:$0xff]  }
   0x3   :  { %144 = vmatprep.subr.bf16.mxu0 %v155_v0  ;;  %v129_v4 = vld [vmem:[%s194_s2] ss:$0 sm:$0xff] }
   0x6   :  { %145 = vmatpush3.bf16.msra.mxu0 %v153_v2 }
   0x9   :  { %147 = vmatmul.mubr.msk.bf16.vlgmr.msra.gmra.mrb[0].mxu0 %vm46_vm1, %v154_v3 }
  0xdc   :  { %v84_v5 = vpop.f32.mrb[0].mxu0 }
  0xdd   :  { %v107_v6 = vadd.f32 %v129_v4, %v84_v5  ;;  %v148_v7 = vpop.f32.mrb[1].mxu0 }
  0xde   :  { %v87_v8 = vpop.f32.mrb[2].mxu0 }
  0xdf   :  { %v108_v9 = vadd.f32 %v129_v4, %v87_v8  ;;  %v149_v10 = vpop.f32.mrb[3].mxu0  ;;  %v109_v11 = vmax.f32 %v107_v6, 0.0 }
  0xe1   :  { %v110_v12 = vmax.f32 %v108_v9, 0.0 }
  0xe3   :  { %v137_v13 = vpack.c.bf16 %v110_v12, %v109_v11 }
  0xe5   :  { %138 = vst [vmem:[%s195_s3] sm:$0xff] %v137_v13  }

// kernel: transformer_decoder.24
= control target key start
LH: loop header
LB: loop body
LE: loop exit
PB: predicated region body
PF: predicated region fallthrough
CT: control target
= control target key end

     0   :  { %s1429_s9 = smov 0   ;;  %s1596_s0 = inlined_call_operand.vmem [shape: bf16[2,8,32], index: 0, kind: input, shape index: {}]   ;;  %s1597_s1 = inlined_call_operand.vmem [shape: bf16[2,8,64], index: 1, kind: input, shape index: {}]   ;;  %s1598_s2 = inlined_call_operand.vmem [shape: bf16[2,8,32], index: 2, kind: output, shape index: {}]  }
   0x1 LB: > { %s1160_s10 = sadd.s32 4294967295, %s1388_s9   ;;  %p1164_p0 = scmp.ge.s32.totalorder %s1388_s9, 1  ;;  %s1388_s9 = sphi %s1429_s9, %s12_s9  }
   0x2   : > { %p120_p1 = scmp.lt.s32.totalorder %s1388_s9, 3 }
   0x4   : > { %p121_p2 = pnand %p1164_p0, %p120_p1 }
   0x5   : > { %p144_p3 = scmp.lt.s32.totalorder (!%p121_p2), %s1160_s10, 1  ;;  %v1390_v0 = vmov (!%p121_p2), 0.0   ;;  %vm1391_vm0 = vmmov (!%p121_p2), 0   ;;  %vm159_vm1 = vcmask (!%p121_p2), 31744   ;;  %vm207_vm2 = vcmask (!%p121_p2), 64512   ;;  %s1392_s18 = smov (!%p121_p2), 96  }
   0x6   : > { %124 = sbr.rel (%p121_p2) target bundleno = 1518 (0x5ee), region = 28  ;;  %1220 = vmatprep.subr.bf16.mxu0 (!%p121_p2), %v1390_v0  ;;  %1222 = vmatprep.mubr.msk.bf16.mxu0 (!%p121_p2), %vm1391_vm0, %v1390_v0  ;;  %s1393_s19 = smov (!%p121_p2), 124   ;;  %vm228_vm3 = vcmask (!%p121_p2), 1043456   ;;  %vm1082_vm4 = vcmask (!%p121_p2), 97280   ;;  %vm1084_vm5 = vcmask (!%p121_p2), 130048   ;;  %vm1086_vm6 = vcmask (!%p121_p2), 162816  }
   0x7   : > { %1226 = vmatprep.subr.bf16.mxu1 (!%p121_p2), %v1390_v0  ;;  %1228 = vmatprep.mubr.msk.bf16.mxu1 (!%p121_p2), %vm1391_vm0, %v1390_v0  ;;  %s1394_s20 = smov (!%p121_p2), 120   ;;  %s1395_s21 = smov (!%p121_p2), 116   ;;  %vm1088_vm7 = vcmask (!%p121_p2), 195584   ;;  %vm1090_vm8 = vcmask (!%p121_p2), 228352   ;;  %vm1093_vm9 = vcmask (!%p121_p2), 257024  }
   0x8   : > { %s1396_s22 = smov (!%p121_p2), 112   ;;  %s1397_s23 = smov (!%p121_p2), 108  }
   0x9   : > { %s1398_s24 = smov (!%p121_p2), 104   ;;  %s1399_s25 = smov (!%p121_p2), 100  }
   0xa   : > { %s1400_s26 = smov (!%p121_p2), 88   ;;  %s1401_s27 = smov (!%p121_p2), 92  }
   0xb   : > { %s1402_s28 = smov (!%p121_p2), 84   ;;  %s1403_s29 = smov (!%p121_p2), 80  }
   0xc   : > { %s1404_s30 = smov (!%p121_p2), 72   ;;  %s1405_s3 = smov (!%p121_p2), 68  }
   0xd   : > { %s1600_s10 = smov (!%p144_p3, %s1160_s10), 1  ;;  %s1406_s4 = smov 76  }
   0xe   : > { %s1443_s11 = sshll.u32 %s1600_s10, 2  ;;  %s1407_s5 = smov 4  }
   0xf   : > { %s151_s14 = scalar_lea.vmem %s1597_s1, %s1443_s11  ;;  %s147_s17 = scalar_lea.vmem %s1596_s0, %s1443_s11 }
  0x10   : > { %v157_v1 = vld [vmem:[%s151_s14] sm:$0xf]  ;;  %s1408_s6 = smov 8   ;;  %s1409_s7 = smov 12  }
  0x11   : > { %v164_v2 = vsel %vm159_vm1, %v157_v1, 0  ;;  %v158_v3 = vld [vmem:[%s147_s17] sm:$0xf]  ;;  %v1459_v10 = vcombine.low %v157_v1, %v157_v1  ;;  %s1410_s8 = smov 16   ;;  %s1411_s10 = smov 20  }
  0x12   : > { %1221 = vmatpush3.bf16.xpose.msra.mxu0 %v164_v2  ;;  %v1171_v11 = vcombine.low %v158_v3, %v158_v3  ;;  %s1412_s12 = smov 24   ;;  %s1413_s13 = smov 28  }
  0x13   : > { %1238 = vmatprep.subr.bf16.mxu0 %v1390_v0  ;;  %223 = vrot.lane.b32.xlu1 %v1459_v10, %s1392_s18  ;;  %s155_s16 = scalar_lea.vmem %s1598_s2, %s1443_s11 }
  0x17   : > { %277 = vrot.lane.b32.xlu1 %v1459_v10, %s1393_s19 }
  0x19   : > { %1223 = vmatmul.mubr.msk.bf16.vlgmr.msra.gmra.mrb[0].mxu0 %vm159_vm1, %v158_v3 }
  0x1a   : > { %1240 = vmatprep.mubr.msk.bf16.mxu0 %vm1391_vm0, %v1390_v0 }
  0x1b   : > { %388 = vrot.lane.b32.xlu1 %v1459_v10, %s1394_s20 }
  0x1f   : > { %386 = vrot.lane.b32.xlu1 %v1171_v11, %s1394_s20 }
  0x23   : > { %499 = vrot.lane.b32.xlu1 %v1459_v10, %s1395_s21 }
  0x27   : > { %497 = vrot.lane.b32.xlu1 %v1171_v11, %s1395_s21 }
  0x2b   : > { %610 = vrot.lane.b32.xlu1 %v1459_v10, %s1396_s22 }
  0x2f   : > { %608 = vrot.lane.b32.xlu1 %v1171_v11, %s1396_s22 }
  0x33   : > { %719 = vrot.lane.b32.xlu1 %v1171_v11, %s1397_s23 }
  0x37   : > { %830 = vrot.lane.b32.xlu1 %v1171_v11, %s1398_s24 }
  0x3b   : > { %941 = vrot.lane.b32.xlu1 %v1171_v11, %s1399_s25 }
  0x85   : > { %v224_v17 = vpop.permute.xlu1 %223 }
  0x86   : > { %v230_v18 = vsel %vm228_vm3, %v224_v17, 0 }
  0x87   : > { %1227 = vmatpush3.bf16.msra.mxu1 %v230_v18 }
  0x88   : > { %1232 = vmatprep.subr.bf16.mxu1 %v1390_v0 }
  0x89   : > { %v278_v20 = vpop.permute.xlu1 %277 }
  0x8a   : > { %v283_v24 = vsel %vm159_vm1, %v278_v20, 0 }
  0x8d   : > { %v389_v22 = vpop.permute.xlu1 %388 }
  0x8e   : > { %v394_v28 = vsel %vm159_vm1, %v389_v22, 0 }
  0x91   : > { %v387_v26 = vpop.permute.xlu1 %386 }
  0x95   : > { %v500_v29 = vpop.permute.xlu1 %499 }
  0x96   : > { %v505_v31 = vsel %vm159_vm1, %v500_v29, 0 }
  0x99   : > { %v498_v30 = vpop.permute.xlu1 %497 }
  0x9d   : > { %v611_v32 = vpop.permute.xlu1 %610 }
  0x9e   : > { %v616_v33 = vsel %vm159_vm1, %v611_v32, 0 }
  0xa1   : > { %v609_v35 = vpop.permute.xlu1 %608 }
  0xa5   : > { %v720_v38 = vpop.permute.xlu1 %719 }
  0xa9   : > { %v831_v41 = vpop.permute.xlu1 %830 }
  0xad   : > { %v942_v43 = vpop.permute.xlu1 %941 }
  0xec   : > { %v200_v4 = vpop.f32.mrb[0].mxu0 }
  0xed   : > { %v206_v5 = vmul.f32 0.5, %v200_v4  ;;  %v1224_v6 = vpop.f32.mrb[1].mxu0 }
  0xee   : > { %v203_v7 = vpop.f32.mrb[2].mxu0 }
  0xef   : > { %v1225_v8 = vpop.f32.mrb[3].mxu0  ;;  %v208_v9 = vsel %vm207_vm2, %v206_v5, -inf }
  0xf0   : > { %209 = vmax.xlane.f32.xlu0 %v208_v9 }
 0x17d   : > { %v210_v12 = vpop.xlane.xlu0 %209 }
 0x17e   : > { %v211_v13 = vsub.f32 %v206_v5, %v210_v12 }
 0x180   : > { %v212_v14 = vmul.f32 1.442695, %v211_v13 }
 0x182   : > { %1350 = vpow2.f32 %v212_v14 }
 0x18c   : > { %v1351_v15 = vpop.eup %1350 }
 0x18d   : > { %v214_v16 = vsel %vm207_vm2, %v1351_v15, 0.0 }
 0x18e   : > { %215 = vadd.xlane.f32.xlu0 %v214_v16 }
 0x1a4   : > { %275 = vrot.lane.b32.xlu0 %v1171_v11, %s1393_s19 }
 0x1a8   : > { %721 = vrot.lane.b32.xlu0 %v1459_v10, %s1397_s23 }
 0x1ac   : > { %832 = vrot.lane.b32.xlu0 %v1459_v10, %s1398_s24 }
 0x1b0   : > { %943 = vrot.lane.b32.xlu0 %v1459_v10, %s1399_s25 }
 0x21b   : > { %v216_v19 = vpop.xlane.xlu0 %215 }
 0x21c   : > { %1352 = vrcp.f32 %v216_v19 }
 0x21f   : > { %v276_v27 = vpop.permute.xlu0 %275 }
 0x223   : > { %v722_v34 = vpop.permute.xlu0 %721 }
 0x224   : > { %v727_v36 = vsel %vm159_vm1, %v722_v34, 0 }
 0x226   : > { %v1353_v21 = vpop.eup %1352 }
 0x227   : > { %v218_v23 = vmul.f32 %v1353_v21, %v1351_v15  ;;  %v833_v37 = vpop.permute.xlu0 %832 }
 0x228   : > { %v838_v39 = vsel %vm159_vm1, %v833_v37, 0 }
 0x229   : > { %v219_v25 = vpack.c.bf16 %v218_v23, %v218_v23 }
 0x22b   : > { %1229 = vmatmul.mubr.msk.bf16.vlgmr.msra.gmra.mrb[0].mxu1 %vm207_vm2, %v219_v25  ;;  %v944_v40 = vpop.permute.xlu0 %943 }
 0x22c   : > { %1233 = vmatpush3.bf16.xpose.msra.mxu1 %v283_v24  ;;  %1234 = vmatprep.mubr.msk.bf16.mxu1 %vm1391_vm0, %v1390_v0  ;;  %v949_v42 = vsel %vm159_vm1, %v944_v40, 0 }
 0x22d   : > { %1244 = vmatprep.subr.bf16.mxu1 %v1390_v0 }
 0x233   : > { %1235 = vmatmul.mubr.msk.bf16.vlgmr.msra.gmra.mrb[4].mxu1 %vm159_vm1, %v276_v27 }
 0x234   : > { %1245 = vmatpush3.bf16.xpose.msra.mxu1 %v394_v28  ;;  %1246 = vmatprep.mubr.msk.bf16.mxu1 %vm1391_vm0, %v1390_v0 }
 0x235   : > { %1256 = vmatprep.subr.bf16.mxu1 %v1390_v0 }
 0x23b   : > { %1247 = vmatmul.mubr.msk.bf16.vlgmr.msra.gmra.mrb[8].mxu1 %vm159_vm1, %v387_v26 }
 0x23c   : > { %1257 = vmatpush3.bf16.xpose.msra.mxu1 %v505_v31  ;;  %1258 = vmatprep.mubr.msk.bf16.mxu1 %vm1391_vm0, %v1390_v0 }
 0x23d   : > { %1268 = vmatprep.subr.bf16.mxu1 %v1390_v0 }
 0x243   : > { %1259 = vmatmul.mubr.msk.bf16.vlgmr.msra.gmra.mrb[12].mxu1 %vm159_vm1, %v498_v30 }
 0x244   : > { %1269 = vmatpush3.bf16.xpose.msra.mxu1 %v616_v33  ;;  %1270 = vmatprep.mubr.msk.bf16.mxu1 %vm1391_vm0, %v1390_v0 }
 0x245   : > { %1280 = vmatprep.subr.bf16.mxu1 %v1390_v0 }
 0x24b   : > { %1271 = vmatmul.mubr.msk.bf16.vlgmr.msra.gmra.mrb[16].mxu1 %vm159_vm1, %v609_v35 }
 0x24c   : > { %1281 = vmatpush3.bf16.xpose.msra.mxu1 %v727_v36  ;;  %1282 = vmatprep.mubr.msk.bf16.mxu1 %vm1391_vm0, %v1390_v0 }
 0x24d   : > { %1292 = vmatprep.subr.bf16.mxu1 %v1390_v0 }
 0x253   : > { %1283 = vmatmul.mubr.msk.bf16.vlgmr.msra.gmra.mrb[20].mxu1 %vm159_vm1, %v720_v38 }
 0x254   : > { %1293 = vmatpush3.bf16.xpose.msra.mxu1 %v838_v39  ;;  %1294 = vmatprep.mubr.msk.bf16.mxu1 %vm1391_vm0, %v1390_v0 }
 0x255   : > { %1304 = vmatprep.subr.bf16.mxu1 %v1390_v0 }
 0x25b   : > { %1295 = vmatmul.mubr.msk.bf16.vlgmr.msra.gmra.mrb[24].mxu1 %vm159_vm1, %v831_v41 }
 0x25c   : > { %1305 = vmatpush3.bf16.xpose.msra.mxu1 %v949_v42  ;;  %1306 = vmatprep.mubr.msk.bf16.mxu1 %vm1391_vm0, %v1390_v0 }
 0x263   : > { %1307 = vmatmul.mubr.msk.bf16.vlgmr.msra.gmra.mrb[28].mxu1 %vm159_vm1, %v942_v43 }
 0x2fe   : > { %v1507_v44 = vpop.f32.mrb[0].mxu1 }
 0x2ff   : > { %v1230_v45 = vpop.f32.mrb[1].mxu1 }
 0x300   : > { %v269_v46 = vpop.f32.mrb[2].mxu1 }
 0x301   : > { %v1231_v47 = vpop.f32.mrb[3].mxu1 }
 0x306   : > { %v319_v48 = vpop.f32.mrb[4].mxu1 }
 0x307   : > { %v325_v49 = vmul.f32 0.5, %v319_v48  ;;  %v1236_v50 = vpop.f32.mrb[5].mxu1 }
 0x308   : > { %v322_v51 = vpop.f32.mrb[6].mxu1 }
 0x309   : > { %v1237_v52 = vpop.f32.mrb[7].mxu1  ;;  %v326_v53 = vsel %vm207_vm2, %v325_v49, -inf }
 0x30a   : > { %327 = vmax.xlane.f32.xlu0 %v326_v53 }
 0x30e   : > { %v430_v54 = vpop.f32.mrb[8].mxu1 }
 0x30f   : > { %v436_v55 = vmul.f32 0.5, %v430_v54  ;;  %v1248_v56 = vpop.f32.mrb[9].mxu1 }
 0x310   : > { %v433_v57 = vpop.f32.mrb[10].mxu1 }
 0x311   : > { %v1249_v58 = vpop.f32.mrb[11].mxu1  ;;  %v437_v59 = vsel %vm207_vm2, %v436_v55, -inf }
 0x312   : > { %438 = vmax.xlane.f32.xlu1 %v437_v59 }
 0x316   : > { %v541_v60 = vpop.f32.mrb[12].mxu1 }
 0x317   : > { %v547_v61 = vmul.f32 0.5, %v541_v60  ;;  %v1260_v62 = vpop.f32.mrb[13].mxu1 }
 0x318   : > { %v544_v63 = vpop.f32.mrb[14].mxu1 }
 0x319   : > { %v1261_v1 = vpop.f32.mrb[15].mxu1  ;;  %v548_v2 = vsel %vm207_vm2, %v547_v61, -inf }
 0x31a   : > { %549 = vmax.xlane.f32.xlu0 %v548_v2 }
 0x31e   : > { %v652_v3 = vpop.f32.mrb[16].mxu1 }
 0x31f   : > { %v1512_v4 = vmul.f32 0.5, %v652_v3  ;;  %v1272_v5 = vpop.f32.mrb[17].mxu1 }
 0x320   : > { %v655_v6 = vpop.f32.mrb[18].mxu1 }
 0x321   : > { %v1273_v7 = vpop.f32.mrb[19].mxu1  ;;  %v659_v8 = vsel %vm207_vm2, %v1512_v4, -inf }
 0x322   : > { %660 = vmax.xlane.f32.xlu0 %v659_v8 }
 0x326   : > { %v763_v9 = vpop.f32.mrb[20].mxu1 }
 0x327   : > { %v769_v11 = vmul.f32 0.5, %v763_v9  ;;  %v1284_v12 = vpop.f32.mrb[21].mxu1 }
 0x328   : > { %v766_v13 = vpop.f32.mrb[22].mxu1 }
 0x329   : > { %v1285_v14 = vpop.f32.mrb[23].mxu1  ;;  %v770_v15 = vsel %vm207_vm2, %v769_v11, -inf }
 0x32a   : > { %771 = vmax.xlane.f32.xlu1 %v770_v15 }
 0x32e   : > { %v874_v16 = vpop.f32.mrb[24].mxu1 }
 0x32f   : > { %v880_v17 = vmul.f32 0.5, %v874_v16  ;;  %v1296_v18 = vpop.f32.mrb[25].mxu1 }
 0x330   : > { %v877_v19 = vpop.f32.mrb[26].mxu1 }
 0x331   : > { %v881_v20 = vsel %vm207_vm2, %v880_v17, -inf  ;;  %v1297_v21 = vpop.f32.mrb[27].mxu1 }
 0x332   : > { %882 = vmax.xlane.f32.xlu0 %v881_v20 }
 0x336   : > { %v985_v22 = vpop.f32.mrb[28].mxu1 }
 0x337   : > { %v1308_v23 = vpop.f32.mrb[29].mxu1  ;;  %v991_v26 = vmul.f32 0.5, %v985_v22 }
 0x338   : > { %v988_v24 = vpop.f32.mrb[30].mxu1 }
 0x339   : > { %v1309_v25 = vpop.f32.mrb[31].mxu1  ;;  %v992_v27 = vsel %vm207_vm2, %v991_v26, -inf }
 0x33b   : > { %449 = vrot.lane.b32.xlu1 %v1459_v10, %s1400_s26 }
 0x348   : > { %338 = vrot.lane.b32.xlu0 %v1459_v10, %s1401_s27 }
 0x35f   : > { %993 = vmax.xlane.f32.xlu1 %v992_v27 }
 0x397   : > { %v328_v28 = vpop.xlane.xlu0 %327 }
 0x398   : > { %v329_v29 = vsub.f32 %v325_v49, %v328_v28 }
 0x39a   : > { %v330_v30 = vmul.f32 1.442695, %v329_v29 }
 0x39c   : > { %1354 = vpow2.f32 %v330_v30 }
 0x39f   : > { %v439_v31 = vpop.xlane.xlu1 %438 }
 0x3a0   : > { %v440_v32 = vsub.f32 %v436_v55, %v439_v31 }
 0x3a2   : > { %v441_v33 = vmul.f32 1.442695, %v440_v32 }
 0x3a4   : > { %1356 = vpow2.f32 %v441_v33 }
 0x3a6   : > { %v1355_v34 = vpop.eup %1354 }
 0x3a7   : > { %v550_v35 = vpop.xlane.xlu0 %549  ;;  %v332_v36 = vsel %vm207_vm2, %v1355_v34, 0.0 }
 0x3a8   : > { %v551_v37 = vsub.f32 %v547_v61, %v550_v35  ;;  %333 = vadd.xlane.f32.xlu0 %v332_v36 }
 0x3aa   : > { %v552_v38 = vmul.f32 1.442695, %v551_v37 }
 0x3ac   : > { %1358 = vpow2.f32 %v552_v38 }
 0x3ae   : > { %v1522_v39 = vpop.eup %1356 }
 0x3af   : > { %v443_v40 = vsel %vm207_vm2, %v1522_v39, 0.0  ;;  %v661_v43 = vpop.xlane.xlu0 %660 }
 0x3b0   : > { %444 = vadd.xlane.f32.xlu1 %v443_v40  ;;  %v662_v48 = vsub.f32 %v1512_v4, %v661_v43 }
 0x3b2   : > { %v663_v50 = vmul.f32 1.442695, %v662_v48 }
 0x3b4   : > { %1360 = vpow2.f32 %v663_v50 }
 0x3b6   : > { %v1526_v41 = vpop.eup %1358 }
 0x3b7   : > { %v554_v42 = vsel %vm207_vm2, %v1526_v41, 0.0  ;;  %v772_v49 = vpop.xlane.xlu1 %771 }
 0x3b8   : > { %555 = vadd.xlane.f32.xlu0 %v554_v42  ;;  %v773_v51 = vsub.f32 %v769_v11, %v772_v49 }
 0x3ba   : > { %v774_v52 = vmul.f32 1.442695, %v773_v51 }
 0x3bb   : > { %v450_v58 = vpop.permute.xlu1 %449 }
 0x3bc   : > { %1362 = vpow2.f32 %v774_v52  ;;  %v455_v9 = vsel %vm228_vm3, %v450_v58, 0 }
 0x3be   : > { %v1361_v55 = vpop.eup %1360 }
 0x3bf   : > { %v883_v45 = vpop.xlane.xlu0 %882  ;;  %v665_v56 = vsel %vm207_vm2, %v1361_v55, 0.0 }
 0x3c0   : > { %v884_v53 = vsub.f32 %v880_v17, %v883_v45 }
 0x3c1   : > { %560 = vrot.lane.b32.xlu1 %v1459_v10, %s1402_s28 }
 0x3c2   : > { %v885_v54 = vmul.f32 1.442695, %v884_v53 }
 0x3c3   : > { %v339_v46 = vpop.permute.xlu0 %338 }
 0x3c4   : > { %v344_v47 = vsel %vm228_vm3, %v339_v46, 0  ;;  %1364 = vpow2.f32 %v885_v54 }
 0x3c5   : > { %1239 = vmatpush3.bf16.msra.mxu0 %v344_v47 }
 0x3c6   : > { %1250 = vmatprep.subr.bf16.mxu0 %v1390_v0  ;;  %v1536_v57 = vpop.eup %1362 }
 0x3c7   : > { %v776_v59 = vsel %vm207_vm2, %v1536_v57, 0.0 }
 0x3ce   : > { %671 = vrot.lane.b32.xlu0 %v1459_v10, %s1403_s29  ;;  %v1540_v60 = vpop.eup %1364 }
 0x3cf   : > { %v887_v62 = vsel %vm207_vm2, %v1540_v60, 0.0 }
 0x3e5   : > { %666 = vadd.xlane.f32.xlu1 %v665_v56 }
 0x3e9   : > { %777 = vadd.xlane.f32.xlu1 %v776_v59 }
 0x3ec   : > { %v994_v61 = vpop.xlane.xlu1 %993 }
 0x3ed   : > { %v995_v63 = vsub.f32 %v991_v26, %v994_v61  ;;  %888 = vadd.xlane.f32.xlu0 %v887_v62 }
 0x3ef   : > { %v996_v1 = vmul.f32 1.442695, %v995_v63 }
 0x3f1   : > { %1366 = vpow2.f32 %v996_v1 }
 0x3fb   : > { %v1544_v2 = vpop.eup %1366 }
 0x3fc   : > { %v998_v3 = vsel %vm207_vm2, %v1544_v2, 0.0 }
 0x3fd   : > { %999 = vadd.xlane.f32.xlu1 %v998_v3 }
 0x403   : > { %893 = vrot.lane.b32.xlu0 %v1459_v10, %s1404_s30 }
 0x407   : > { %1004 = vrot.lane.b32.xlu0 %v1459_v10, %s1405_s3 }
 0x40e   : > { %782 = vrot.lane.b32.xlu1 %v1459_v10, %s1406_s4 }
 0x435   : > { %v334_v4 = vpop.xlane.xlu0 %333 }
 0x436   : > { %1368 = vrcp.f32 %v334_v4 }
 0x43d   : > { %v445_v5 = vpop.xlane.xlu1 %444 }
 0x43e   : > { %1370 = vrcp.f32 %v445_v5 }
 0x440   : > { %v1369_v6 = vpop.eup %1368 }
 0x441   : > { %v336_v7 = vmul.f32 %v1369_v6, %v1355_v34  ;;  %v561_v13 = vpop.permute.xlu1 %560 }
 0x442   : > { %v566_v15 = vsel %vm228_vm3, %v561_v13, 0 }
 0x443   : > { %v337_v8 = vpack.c.bf16 %v336_v7, %v336_v7 }
 0x445   : > { %1241 = vmatmul.mubr.msk.bf16.vlgmr.msra.gmra.mrb[4].mxu0 %vm207_vm2, %v337_v8  ;;  %v556_v11 = vpop.xlane.xlu0 %555 }
 0x446   : > { %1251 = vmatpush3.bf16.msra.mxu0 %v455_v9  ;;  %1372 = vrcp.f32 %v556_v11  ;;  %1252 = vmatprep.mubr.msk.bf16.mxu0 %vm1391_vm0, %v1390_v0 }
 0x447   : > { %1262 = vmatprep.subr.bf16.mxu0 %v1390_v0 }
 0x448   : > { %v1371_v10 = vpop.eup %1370 }
 0x449   : > { %v447_v12 = vmul.f32 %v1371_v10, %v1522_v39  ;;  %v672_v18 = vpop.permute.xlu0 %671 }
 0x44a   : > { %v677_v20 = vsel %vm228_vm3, %v672_v18, 0 }
 0x44b   : > { %v448_v14 = vpack.c.bf16 %v447_v12, %v447_v12 }
 0x44d   : > { %1253 = vmatmul.mubr.msk.bf16.vlgmr.msra.gmra.mrb[8].mxu0 %vm207_vm2, %v448_v14 }
 0x44e   : > { %1263 = vmatpush3.bf16.msra.mxu0 %v566_v15  ;;  %1264 = vmatprep.mubr.msk.bf16.mxu0 %vm1391_vm0, %v1390_v0 }
 0x44f   : > { %1274 = vmatprep.subr.bf16.mxu0 %v1390_v0 }
 0x450   : > { %v1373_v16 = vpop.eup %1372 }
 0x451   : > { %v558_v17 = vmul.f32 %v1373_v16, %v1526_v41 }
 0x453   : > { %v559_v19 = vpack.c.bf16 %v558_v17, %v558_v17 }
 0x455   : > { %1265 = vmatmul.mubr.msk.bf16.vlgmr.msra.gmra.mrb[12].mxu0 %vm207_vm2, %v559_v19 }
 0x456   : > { %1275 = vmatpush3.bf16.msra.mxu0 %v677_v20  ;;  %1276 = vmatprep.mubr.msk.bf16.mxu0 %vm1391_vm0, %v1390_v0 }
 0x457   : > { %1286 = vmatprep.subr.bf16.mxu0 %v1390_v0 }
 0x472   : > { %v667_v21 = vpop.xlane.xlu1 %666 }
 0x473   : > { %1374 = vrcp.f32 %v667_v21 }
 0x476   : > { %v778_v23 = vpop.xlane.xlu1 %777 }
 0x477   : > { %1376 = vrcp.f32 %v778_v23 }
 0x47a   : > { %v889_v26 = vpop.xlane.xlu0 %888 }
 0x47b   : > { %1378 = vrcp.f32 %v889_v26 }
 0x47d   : > { %v1375_v22 = vpop.eup %1374 }
 0x47e   : > { %v669_v24 = vmul.f32 %v1375_v22, %v1361_v55  ;;  %v894_v31 = vpop.permute.xlu0 %893 }
 0x47f   : > { %v899_v34 = vsel %vm228_vm3, %v894_v31, 0 }
 0x480   : > { %v670_v25 = vpack.c.bf16 %v669_v24, %v669_v24 }
 0x481   : > { %v1377_v27 = vpop.eup %1376 }
 0x482   : > { %1277 = vmatmul.mubr.msk.bf16.vlgmr.msra.gmra.mrb[16].mxu0 %vm207_vm2, %v670_v25  ;;  %v780_v29 = vmul.f32 %v1377_v27, %v1536_v57  ;;  %v1005_v37 = vpop.permute.xlu0 %1004 }
 0x483   : > { %1288 = vmatprep.mubr.msk.bf16.mxu0 %vm1391_vm0, %v1390_v0  ;;  %v1010_v39 = vsel %vm228_vm3, %v1005_v37, 0 }
 0x484   : > { %v781_v33 = vpack.c.bf16 %v780_v29, %v780_v29 }
 0x485   : > { %v1379_v35 = vpop.eup %1378 }
 0x486   : > { %v891_v36 = vmul.f32 %v1379_v35, %v1540_v60 }
 0x488   : > { %v892_v38 = vpack.c.bf16 %v891_v36, %v891_v36 }
 0x48a   : > { %v1000_v28 = vpop.xlane.xlu1 %999 }
 0x48b   : > { %1380 = vrcp.f32 %v1000_v28 }
 0x48e   : > { %v783_v30 = vpop.permute.xlu1 %782 }
 0x48f   : > { %v788_v32 = vsel %vm228_vm3, %v783_v30, 0 }
 0x490   : > { %1287 = vmatpush3.bf16.msra.mxu0 %v788_v32 }
 0x491   : > { %1298 = vmatprep.subr.bf16.mxu0 %v1390_v0 }
 0x493   : > { %1289 = vmatmul.mubr.msk.bf16.vlgmr.msra.gmra.mrb[20].mxu0 %vm207_vm2, %v781_v33 }
 0x494   : > { %1299 = vmatpush3.bf16.msra.mxu0 %v899_v34  ;;  %1300 = vmatprep.mubr.msk.bf16.mxu0 %vm1391_vm0, %v1390_v0 }
 0x495   : > { %1310 = vmatprep.subr.bf16.mxu0 %v1390_v0  ;;  %v1381_v40 = vpop.eup %1380 }
 0x496   : > { %v1002_v41 = vmul.f32 %v1381_v40, %v1544_v2 }
 0x498   : > { %v1003_v42 = vpack.c.bf16 %v1002_v41, %v1002_v41 }
 0x49b   : > { %1301 = vmatmul.mubr.msk.bf16.vlgmr.msra.gmra.mrb[24].mxu0 %vm207_vm2, %v892_v38 }
 0x49c   : > { %1311 = vmatpush3.bf16.msra.mxu0 %v1010_v39  ;;  %1312 = vmatprep.mubr.msk.bf16.mxu0 %vm1391_vm0, %v1390_v0 }
 0x4a3   : > { %1313 = vmatmul.mubr.msk.bf16.vlgmr.msra.gmra.mrb[28].mxu0 %vm207_vm2, %v1003_v42 }
 0x518   : > { %v380_v43 = vpop.f32.mrb[4].mxu0 }
 0x519   : > { %1053 = vrot.lane.b32.xlu1 %v380_v43, %s1407_s5  ;;  %v1242_v45 = vpop.f32.mrb[5].mxu0 }
 0x51a   : > { %v383_v46 = vpop.f32.mrb[6].mxu0 }
 0x51b   : > { %v1243_v47 = vpop.f32.mrb[7].mxu0 }
 0x520   : > { %v491_v48 = vpop.f32.mrb[8].mxu0 }
 0x521   : > { %1057 = vrot.lane.b32.xlu0 %v491_v48, %s1408_s6  ;;  %v1254_v49 = vpop.f32.mrb[9].mxu0 }
 0x522   : > { %v494_v50 = vpop.f32.mrb[10].mxu0 }
 0x523   : > { %v1255_v51 = vpop.f32.mrb[11].mxu0 }
 0x528   : > { %v602_v52 = vpop.f32.mrb[12].mxu0 }
 0x529   : > { %1061 = vrot.lane.b32.xlu1 %v602_v52, %s1409_s7  ;;  %v1266_v0 = vpop.f32.mrb[13].mxu0 }
 0x52a   : > { %v605_v53 = vpop.f32.mrb[14].mxu0 }
 0x52b   : > { %v1267_v54 = vpop.f32.mrb[15].mxu0 }
 0x555   : > { %v713_v55 = vpop.f32.mrb[16].mxu0 }
 0x556   : > { %1065 = vrot.lane.b32.xlu0 %v713_v55, %s1410_s8  ;;  %v1278_v56 = vpop.f32.mrb[17].mxu0 }
 0x557   : > { %v716_v57 = vpop.f32.mrb[18].mxu0 }
 0x558   : > { %v1279_v58 = vpop.f32.mrb[19].mxu0 }
 0x566   : > { %v824_v59 = vpop.f32.mrb[20].mxu0 }
 0x567   : > { %1069 = vrot.lane.b32.xlu1 %v824_v59, %s1411_s10  ;;  %v1290_v60 = vpop.f32.mrb[21].mxu0 }
 0x568   : > { %v827_v61 = vpop.f32.mrb[22].mxu0 }
 0x569   : > { %v1291_v62 = vpop.f32.mrb[23].mxu0 }
 0x56e   : > { %v935_v63 = vpop.f32.mrb[24].mxu0 }
 0x56f   : > { %1073 = vrot.lane.b32.xlu0 %v935_v63, %s1412_s12  ;;  %v1302_v1 = vpop.f32.mrb[25].mxu0 }
 0x570   : > { %v938_v2 = vpop.f32.mrb[26].mxu0 }
 0x571   : > { %v1303_v3 = vpop.f32.mrb[27].mxu0 }
 0x576   : > { %v1046_v4 = vpop.f32.mrb[28].mxu0 }
 0x577   : > { %1077 = vrot.lane.b32.xlu1 %v1046_v4, %s1413_s13  ;;  %v1314_v5 = vpop.f32.mrb[29].mxu0 }
 0x578   : > { %v1049_v6 = vpop.f32.mrb[30].mxu0 }
 0x579   : > { %v1315_v7 = vpop.f32.mrb[31].mxu0 }
 0x58b   : > { %v1054_v8 = vpop.permute.xlu1 %1053 }
 0x58c   : > { %v1080_v12 = vsel %vm159_vm1, %v1507_v44, %v1054_v8 }
 0x593   : > { %v1058_v9 = vpop.permute.xlu0 %1057 }
 0x594   : > { %v1081_v13 = vsel %vm207_vm2, %v1080_v12, %v1058_v9 }
 0x59b   : > { %v1062_v11 = vpop.permute.xlu1 %1061 }
 0x59c   : > { %v1083_v15 = vsel %vm1082_vm4, %v1081_v13, %v1062_v11 }
 0x5c8   : > { %v1066_v10 = vpop.permute.xlu0 %1065 }
 0x5c9   : > { %v1085_v17 = vsel %vm1084_vm5, %v1083_v15, %v1066_v10 }
 0x5d9   : > { %v1070_v14 = vpop.permute.xlu1 %1069 }
 0x5da   : > { %v1087_v18 = vsel %vm1086_vm6, %v1085_v17, %v1070_v14 }
 0x5e1   : > { %v1074_v16 = vpop.permute.xlu0 %1073 }
 0x5e2   : > { %v1089_v19 = vsel %vm1088_vm7, %v1087_v18, %v1074_v16 }
 0x5e9   : > { %v1078_v20 = vpop.permute.xlu1 %1077 }
 0x5ea   : > { %v1091_v21 = vsel %vm1090_vm8, %v1089_v19, %v1078_v20 }
 0x5eb   : > { %v1092_v44 = vpack.c.bf16 %v1091_v21, %v1091_v21 }
 0x5ed   : > { %1094 = vst.msk [vmem:[%s155_s16] sm:$0xf] %vm1093_vm9, %v1092_v44 }
 0x5ee PF: > { %s12_s9 = sadd.s32 1, %s1388_s9  }
 0x5ef   : > { %p9_p4 = scmp.ge.s32.totalorder %s12_s9, 4  }
 0x5f1   :  { %11 = sbr.rel (!%p9_p4) target bundleno = 1 (0x1), region = 61 }

// kernel: transformer_decoder.37
= control target key start
LH: loop header
LB: loop body
LE: loop exit
PB: predicated region body
PF: predicated region fallthrough
CT: control target
= control target key end

     0   :  { %v208_v1 = vmov 0.0   ;;  %vm209_vm0 = vmmov 0   ;;  %vm20_vm1 = vcmask 130048   ;;  %s267_s0 = inlined_call_operand.vmem [shape: bf16[16,32], index: 0, kind: input, shape index: {}]   ;;  %s268_s1 = inlined_call_operand.vmem [shape: bf16[32,16], index: 1, kind: input, shape index: {}]   ;;  %s269_s2 = inlined_call_operand.vmem [shape: f32[1,16], index: 2, kind: input, shape index: {}]   ;;  %s270_s3 = inlined_call_operand.hbm [shape: f32[16,16], index: 3, kind: output, shape index: {}]  }
   0x1   :  { %v173_v0 = vld [vmem:[%s268_s1] sm:$0xff]   ;;  %160 = vmatprep.subr.bf16.mxu0 %v208_v1  ;;  %v174_v2 = vld [vmem:[%s268_s1 + $0x8] sm:$0xff]   ;;  %164 = vmatprep.mubr.msk.bf16.mxu0 %vm209_vm0, %v208_v1 }
   0x2   :  { %161 = vmatpush3.bf16.msra.mxu0 %v173_v0 }
   0x3   :  { %162 = vmatprep.subr.bf16.mxu0 %v208_v1 }
   0x4   :  { %8 = vsyncpa [#allocation4], 0  ;;  %21 = vst.msk [vmem:[#allocation2] sm:$0xff] %vm20_vm1, %v208_v1  ;;  %v175_v3 = vld [vmem:[%s267_s0] sm:$0xff]   ;;  %vm48_vm2 = vcmask 261120   ;;  %s210_s0 = smov [#allocation3]  }
   0x5   :  { %22 = vst.msk [vmem:[#allocation2 + $0x8] sm:$0xff] %vm20_vm1, %v208_v1  ;;  %v156_v12 = vld [vmem:[%s269_s2] ss:$0 sm:$0xff]  ;;  %s141_s2 = sshll.u32 %s210_s0, 4  ;;  %s142_s2 = int_to_ptr.vmem [resolvable:$true] %s141_s2 }
   0x6   :  { %163 = vmatpush3.bf16.msra.mxu0 %v174_v2  ;;  %s184_s19 = scalar_lea.vmem %s142_s2, 256  ;;  %p189_p1 = scmp.lt.s32.totalorder %s142_s2, %s142_s2 }
   0x7   :  { %p185_p0 = scmp.ne.s32.totalorder %s142_s2, %s184_s19  ;;  %p190_p2 = scmp.lt.s32.totalorder %s184_s19, %s184_s19 }
   0x9   :  { %165 = vmatmul.mubr.msk.bf16.vlgmr.msra.gmra.mrb[0].mxu0 %vm48_vm2, %v175_v3  ;;  %p191_p3 = por %p190_p2, %p189_p1 }
   0xb   :  { %v23_v4 = vld [vmem:[#allocation2] sm:$0xff]  ;;  %p192_p4 = pnand %p191_p3, %p185_p0 }
   0xc   :  { %v24_v6 = vld [vmem:[#allocation2 + $0x8] sm:$0xff] }
  0xdc   :  { %v86_v5 = vpop.f32.mrb[0].mxu0 }
  0xdd   :  { %v93_v7 = vadd.f32 %v86_v5, %v23_v4  ;;  %v166_v8 = vpop.f32.mrb[1].mxu0 }
  0xde   :  { %v89_v9 = vpop.f32.mrb[2].mxu0 }
  0xdf   :  { %96 = vst.msk [vmem:[#allocation2] sm:$0xff] %vm20_vm1, %v93_v7  ;;  %v94_v10 = vadd.f32 %v89_v9, %v24_v6  ;;  %v167_v11 = vpop.f32.mrb[3].mxu0 }
  0xe1   :  { %97 = vst.msk [vmem:[#allocation2 + $0x8] sm:$0xff] %vm20_vm1, %v94_v10 }
  0xe6   :  { %v101_v13 = vld [vmem:[#allocation2] sm:$0xff] }
  0xe7   :  { %v110_v14 = vadd.f32 %v156_v12, %v101_v13 }
  0xe8   :  { %v102_v15 = vld [vmem:[#allocation2 + $0x8] sm:$0xff] }
  0xe9   :  { %v112_v16 = vsel %vm20_vm1, %v110_v14, -inf  ;;  %v111_v17 = vadd.f32 %v156_v12, %v102_v15 }
  0xea   :  { %113 = vmax.xlane.f32.xlu0 %v112_v16 }
  0xeb   :  { %v115_v18 = vsel %vm20_vm1, %v111_v17, -inf }
  0xee   :  { %116 = vmax.xlane.f32.xlu0 %v115_v18 }
 0x177   :  { %v114_v19 = vpop.xlane.xlu0 %113 }
 0x178   :  { %v118_v20 = vsub.f32 %v110_v14, %v114_v19 }
 0x17a   :  { %v120_v21 = vmul.f32 1.442695, %v118_v20 }
 0x17b   :  { %v117_v22 = vpop.xlane.xlu0 %116 }
 0x17c   :  { %176 = vpow2.f32 %v120_v21  ;;  %v119_v23 = vsub.f32 %v111_v17, %v117_v22 }
 0x17e   :  { %v122_v24 = vmul.f32 1.442695, %v119_v23 }
 0x180   :  { %178 = vpow2.f32 %v122_v24 }
 0x186   :  { %v177_v25 = vpop.eup %176 }
 0x187   :  { %v124_v26 = vsel %vm20_vm1, %v177_v25, 0.0 }
 0x188   :  { %125 = vadd.xlane.f32.xlu1 %v124_v26 }
 0x18a   :  { %v179_v27 = vpop.eup %178 }
 0x18b   :  { %v127_v28 = vsel %vm20_vm1, %v179_v27, 0.0 }
 0x18c   :  { %128 = vadd.xlane.f32.xlu1 %v127_v28 }
 0x215   :  { %v126_v29 = vpop.xlane.xlu1 %125 }
 0x216   :  { %180 = vrcp.f32 %v126_v29 }
 0x219   :  { %v129_v30 = vpop.xlane.xlu1 %128 }
 0x21a   :  { %182 = vrcp.f32 %v129_v30 }
 0x220   :  { %v181_v31 = vpop.eup %180 }
 0x221   :  { %v132_v32 = vmul.f32 %v181_v31, %v177_v25 }
 0x223   :  { %134 = vst.msk [vmem:[#allocation3] sm:$0xff] %vm20_vm1, %v132_v32 }
 0x224   :  { %v183_v33 = vpop.eup %182 }
 0x225   :  { %v133_v34 = vmul.f32 %v183_v33, %v179_v27 }
 0x227   :  { %135 = vst.msk [vmem:[#allocation3 + $0x8] sm:$0xff] %vm20_vm1, %v133_v34 }
 0x228   :  { %195 = shalt.err (!%p192_p4)
}
 0x229   :  { %s196_s22 = scalar_lea.hbm %s270_s3, 256 }
 0x22a   :  { %p197_p5 = scmp.ne.s32.totalorder %s270_s3, %s196_s22  ;;  %p200_p6 = scmp.lt.u32.totalorder %s196_s22, %s270_s3 }
 0x22c   :  { %p202_p7 = pnand %p200_p6, %p197_p5 }
 0x22e   :  { %205 = shalt.err (!%p202_p7)
}
 0x22f   :  { %s211_s27 = smov 128   ;;  %s212_s28 = smov 8  }
 0x230   :  { %147 = dma.vmem_to_hbm [thread:$0]  %s142_s2, 256, %s270_s3, [#allocation4], %s211_s27, %s211_s27, %s212_s28  }
 0x231   :  { %206 = dma.done.wait [#allocation4], 256  }
 0x232   :  { %207 = vsyncadd [#allocation4], 4294967040 }
 0x233   :  { %151 = vsyncpa [#allocation4], 1 }

// kernel: transformer_decoder.27
= control target key start
LH: loop header
LB: loop body
LE: loop exit
PB: predicated region body
PF: predicated region fallthrough
CT: control target
= control target key end

     0   :  { %vm28_vm0 = vcmask 261120   ;;  %v295_v0 = vmov 0.0   ;;  %vm296_vm1 = vmmov 0   ;;  %vm224_vm2 = vcmask 257024   ;;  %s385_s1 = inlined_call_operand.vmem [shape: bf16[128,32], index: 1, kind: input, shape index: {}]   ;;  %s386_s0 = inlined_call_operand.vmem [shape: bf16[16,128], index: 0, kind: input, shape index: {}]   ;;  %s387_s3 = inlined_call_operand.vmem [shape: bf16[16,32], index: 3, kind: input, shape index: {}]   ;;  %s388_s2 = inlined_call_operand.vmem [shape: f32[1,32], index: 2, kind: input, shape index: {}]   ;;  %s389_s4 = inlined_call_operand.vmem [shape: f32[1,32], index: 4, kind: input, shape index: {}]   ;;  %s390_s5 = inlined_call_operand.vmem [shape: f32[1,32], index: 5, kind: input, shape index: {}]   ;;  %s391_s6 = inlined_call_operand.vmem [shape: bf16[16,32], index: 6, kind: output, shape index: {}]  }
   0x1   :  { %260 = vmatprep.subr.bf16.mxu0 %v295_v0  ;;  %v282_v1 = vld [vmem:[%s385_s1] sm:$0xff]   ;;  %276 = vmatprep.mubr.msk.bf16.mxu0 %vm296_vm1, %v295_v0  ;;  %29 = vst.msk [vmem:[#allocation2] sm:$0xff] %vm28_vm0, %v295_v0  ;;  %30 = vst.msk [vmem:[#allocation2 + $0x8] sm:$0xff] %vm28_vm0, %v295_v0  ;;  %v283_v2 = vld [vmem:[%s385_s1 + $0x8] sm:$0xff]  }
   0x2   :  { %261 = vmatpush3.bf16.msra.mxu0 %v282_v1  ;;  %v284_v3 = vld [vmem:[%s385_s1 + $0x10] sm:$0xff]   ;;  %v285_v4 = vld [vmem:[%s385_s1 + $0x18] sm:$0xff]   ;;  %v286_v5 = vld [vmem:[%s385_s1 + $0x20] sm:$0xff]  }
   0x3   :  { %262 = vmatprep.subr.bf16.mxu0 %v295_v0  ;;  %v287_v6 = vld [vmem:[%s385_s1 + $0x28] sm:$0xff]   ;;  %v288_v7 = vld [vmem:[%s385_s1 + $0x30] sm:$0xff]   ;;  %v289_v8 = vld [vmem:[%s385_s1 + $0x38] sm:$0xff]  }
   0x4   :  { %v290_v9 = vld [vmem:[%s386_s0] sm:$0xff]  }
   0x5   :  { %v248_v18 = vld [vmem:[%s387_s3] sm:$0xff]  }
   0x6   :  { %263 = vmatpush3.bf16.msra.mxu0 %v283_v2  ;;  %v240_v19 = vld [vmem:[%s388_s2] ss:$0 sm:$0xff]  ;;  %v249_v20 = vunpack.c.l.bf16 %v248_v18  ;;  %v250_v23 = vunpack.c.h.bf16 %v248_v18 }
   0x7   :  { %264 = vmatprep.subr.bf16.mxu0 %v295_v0  ;;  %v241_v47 = vld [vmem:[%s389_s4] ss:$0 sm:$0xff] }
   0x8   :  { %v31_v10 = vld [vmem:[#allocation2] sm:$0xff]  ;;  %v32_v12 = vld [vmem:[#allocation2 + $0x8] sm:$0xff] }
   0x9   :  { %v242_v49 = vld [vmem:[%s390_s5] ss:$0 sm:$0xff] }
   0xa   :  { %265 = vmatpush3.bf16.msra.mxu0 %v284_v3 }
   0xb   :  { %266 = vmatprep.subr.bf16.mxu0 %v295_v0 }
   0xe   :  { %267 = vmatpush3.bf16.msra.mxu0 %v285_v4 }
   0xf   :  { %268 = vmatprep.subr.bf16.mxu0 %v295_v0 }
  0x12   :  { %269 = vmatpush3.bf16.msra.mxu0 %v286_v5 }
  0x13   :  { %270 = vmatprep.subr.bf16.mxu0 %v295_v0 }
  0x16   :  { %271 = vmatpush3.bf16.msra.mxu0 %v287_v6 }
  0x17   :  { %272 = vmatprep.subr.bf16.mxu0 %v295_v0 }
  0x1a   :  { %273 = vmatpush3.bf16.msra.mxu0 %v288_v7 }
  0x1b   :  { %274 = vmatprep.subr.bf16.mxu0 %v295_v0 }
  0x1e   :  { %275 = vmatpush3.bf16.msra.mxu0 %v289_v8 }
  0x21   :  { %277 = vmatmul.mubr.bf16.vlgmr.msra.gmra.mrb[0].mxu0 %v290_v9 }
  0xf4   :  { %v139_v11 = vpop.f32.mrb[0].mxu0 }
  0xf5   :  { %v146_v13 = vadd.f32 %v139_v11, %v31_v10  ;;  %v278_v14 = vpop.f32.mrb[1].mxu0 }
  0xf6   :  { %v142_v15 = vpop.f32.mrb[2].mxu0 }
  0xf7   :  { %149 = vst.msk [vmem:[#allocation2] sm:$0xff] %vm28_vm0, %v146_v13  ;;  %v147_v16 = vadd.f32 %v142_v15, %v32_v12  ;;  %v279_v17 = vpop.f32.mrb[3].mxu0 }
  0xf9   :  { %150 = vst.msk [vmem:[#allocation2 + $0x8] sm:$0xff] %vm28_vm0, %v147_v16 }
  0xfe   :  { %v154_v21 = vld [vmem:[#allocation2] sm:$0xff] }
  0xff   :  { %v163_v22 = vadd.f32 %v240_v19, %v154_v21 }
 0x100   :  { %v155_v24 = vld [vmem:[#allocation2 + $0x8] sm:$0xff] }
 0x101   :  { %v169_v25 = vadd.f32 %v249_v20, %v163_v22  ;;  %v164_v26 = vadd.f32 %v240_v19, %v155_v24 }
 0x103   :  { %v171_v27 = vsel %vm28_vm0, %v169_v25, 0.0  ;;  %v170_v28 = vadd.f32 %v250_v23, %v164_v26 }
 0x104   :  { %172 = vadd.xlane.f32.xlu0 %v171_v27 }
 0x105   :  { %v174_v29 = vsel %vm28_vm0, %v170_v28, 0.0 }
 0x108   :  { %175 = vadd.xlane.f32.xlu0 %v174_v29 }
 0x191   :  { %v173_v30 = vpop.xlane.xlu0 %172 }
 0x192   :  { %v178_v31 = vmul.f32 0.03125, %v173_v30 }
 0x194   :  { %v180_v32 = vsub.f32 %v169_v25, %v178_v31 }
 0x195   :  { %v176_v33 = vpop.xlane.xlu0 %175 }
 0x196   :  { %v179_v34 = vmul.f32 0.03125, %v176_v33  ;;  %v182_v35 = vmul.f32 %v180_v32, %v180_v32 }
 0x198   :  { %v181_v36 = vsub.f32 %v170_v28, %v179_v34  ;;  %v184_v37 = vsel %vm28_vm0, %v182_v35, 0.0 }
 0x199   :  { %185 = vadd.xlane.f32.xlu1 %v184_v37 }
 0x19a   :  { %v183_v38 = vmul.f32 %v181_v36, %v181_v36 }
 0x19c   :  { %v187_v39 = vsel %vm28_vm0, %v183_v38, 0.0 }
 0x19d   :  { %188 = vadd.xlane.f32.xlu1 %v187_v39 }
 0x226   :  { %v186_v40 = vpop.xlane.xlu1 %185 }
 0x227   :  { %v190_v41 = vmul.f32 0.03125, %v186_v40 }
 0x229   :  { %v192_v42 = vadd.f32 1e-05, %v190_v41 }
 0x22a   :  { %v189_v43 = vpop.xlane.xlu1 %188 }
 0x22b   :  { %291 = vrsqrt.f32 %v192_v42  ;;  %v191_v44 = vmul.f32 0.03125, %v189_v43 }
 0x22d   :  { %v193_v45 = vadd.f32 1e-05, %v191_v44 }
 0x22f   :  { %293 = vrsqrt.f32 %v193_v45 }
 0x235   :  { %v292_v46 = vpop.eup %291 }
 0x236   :  { %v196_v48 = vmul.f32 %v292_v46, %v180_v32 }
 0x238   :  { %v205_v50 = vmul.f32 %v241_v47, %v196_v48 }
 0x239   :  { %v294_v51 = vpop.eup %293 }
 0x23a   :  { %v214_v52 = vadd.f32 %v242_v49, %v205_v50  ;;  %v197_v53 = vmul.f32 %v294_v51, %v181_v36 }
 0x23c   :  { %v245_v54 = vpack.c.bf16 %v214_v52, %v214_v52  ;;  %v206_v55 = vmul.f32 %v241_v47, %v197_v53 }
 0x23e   :  { %225 = vst.msk [vmem:[%s391_s6] sm:$0xf] %vm224_vm2, %v245_v54  ;;  %v215_v56 = vadd.f32 %v242_v49, %v206_v55 }
 0x240   :  { %v246_v57 = vpack.c.bf16 %v215_v56, %v215_v56 }
 0x242   :  { %226 = vst.msk [vmem:[%s391_s6 + $0x4] sm:$0xf] %vm224_vm2, %v246_v57 }

</bundles_post_ra>
